<compile_context>
chip_gen: v5e
topology: v5e:2x2
jax: 0.10.0
libtpu: 0.0.40
codegen_flags: <defaults>
</compile_context>

<pallas_src>
import functools

import jax
import jax.numpy as jnp
from jax.experimental import pallas as pl
from jax.experimental.pallas import tpu as pltpu


_MASK_LOGIT = -1e30  # finite "minus infinity" that stays NaN-free through max/exp algebra


def _round_up(x, m):
    return ((x + m - 1) // m) * m


def _pick_tiles(n):
    """(dst tile, src tile): lane/MXU aligned; large dst tile amortizes per-step cost."""
    if n <= 128:
        return 128, 128
    if n <= 1024:
        return 256, 256
    return 512, 256          # tk divides tq -> one n_pad works for both


# --------------------------------------------------------------------------- #
# Pallas kernel: masked multi-head softmax attention over a dense adjacency.  #
# grid = (dst_tiles, src_tiles); online softmax over the source axis.         #
# Heads are packed on the lane axis of theta / acc / output.                  #
# --------------------------------------------------------------------------- #
def gat_attn_kernel(tflag_ref, adj_ref, sdst_ref, ssrc_ref, theta_ref, o_ref,
                    m_sc, l_sc, acc_sc, *, heads, out_ch, neg_slope, tk,
                    theta_resident):
    qi = pl.program_id(0)
    ki = pl.program_id(1)
    tq = acc_sc.shape[0]
    hc_pad = o_ref.shape[-1]
    col = jax.lax.broadcasted_iota(jnp.int32, (1, hc_pad), 1)   # lane index

    @pl.when(ki == 0)
    def _init():
        m_sc[...] = jnp.full(m_sc.shape, _MASK_LOGIT, m_sc.dtype)
        l_sc[...] = jnp.zeros(l_sc.shape, l_sc.dtype)
        acc_sc[...] = jnp.zeros(acc_sc.shape, acc_sc.dtype)

    # Skip all compute for (dst-tile, src-tile) pairs with no edges (block sparsity).
    # Correctness: a fully masked tile leaves m/l/acc unchanged, so skipping is exact.
    @pl.when(tflag_ref[qi, ki] > 0)
    def _compute():
        edge = adj_ref[...] != 0                                 # (tq, tk) bool (int8 stream)

        # raw logits e[h,i,j] = LeakyReLU(s_dst[h,i] + s_src[h,j]); f32 math throughout
        e = sdst_ref[...] + ssrc_ref[...]                        # (H,tq,1)+(H,1,tk)->(H,tq,tk)
        e = jnp.where(e >= 0, e, neg_slope * e)
        e = jnp.where(edge[None], e, _MASK_LOGIT)

        # online softmax update (per head, per destination row)
        m_prev = m_sc[...]                                       # (H, tq, 1)
        m_new = jnp.maximum(m_prev, jnp.max(e, axis=-1, keepdims=True))
        corr = jnp.exp(m_prev - m_new)
        # explicit zeroing of non-edges is required (fully-masked rows give exp(0)=1)
        p = jnp.where(edge[None], jnp.exp(e - m_new), 0.0)       # (H, tq, tk) f32
        l_sc[...] = corr * l_sc[...] + jnp.sum(p, axis=-1, keepdims=True)
        m_sc[...] = m_new

        # source-tile rows of the head-packed projection
        if theta_resident:
            row0 = pl.multiple_of(ki * tk, tk)
            th = theta_ref[pl.ds(row0, tk), :]                   # (tk, hc_pad)
        else:
            th = theta_ref[...]                                  # streamed (tk, hc_pad)
        p_c = p.astype(th.dtype)

        # per-head aggregation; every op stays full 128-lane width (no sub-vreg slicing)
        corr_packed = jnp.zeros((tq, hc_pad), jnp.float32)
        contrib = jnp.zeros((tq, hc_pad), jnp.float32)
        for h in range(heads):
            sel = (col >= h * out_ch) & (col < (h + 1) * out_ch)  # (1, hc_pad)
            corr_packed = jnp.where(sel, corr[h], corr_packed)
            th_h = jnp.where(sel, th, jnp.zeros_like(th))         # head-h columns only
            contrib = contrib + jnp.dot(p_c[h], th_h,
                                        preferred_element_type=jnp.float32)
        acc_sc[...] = corr_packed * acc_sc[...] + contrib

    @pl.when(ki == pl.num_programs(1) - 1)
    def _finalize():
        inv = jnp.zeros((tq, hc_pad), jnp.float32)
        for h in range(heads):
            sel = (col >= h * out_ch) & (col < (h + 1) * out_ch)
            inv = jnp.where(sel, pl.reciprocal(l_sc[h], approx=True), inv)
        o_ref[...] = (acc_sc[...] * inv).astype(o_ref.dtype)     # lane-dense full store


def gat_conv_pallas(x, adj_pad, tile_flags, layer_params, *, heads, out_ch, concat,
                    neg_slope, compute_dtype, tq, tk):
    """One GATConv layer. x: [N, F_in] f32 -> [N, heads*out_ch] (concat) or [N, out_ch]."""
    w, a_src, a_dst, bias = layer_params
    n = x.shape[0]
    n_pad = adj_pad.shape[0]
    hc = heads * out_ch
    hc_pad = _round_up(hc, 128)               # heads packed on lanes, padded once

    # ---- hoisted projection + attention logits (cheap O(N*F) glue, done once) ----
    theta_cat = x @ w                                            # [N, H*C] f32
    theta = theta_cat.reshape(n, heads, out_ch)
    s_src = jnp.einsum("nhc,hc->hn", theta, a_src)               # [H, N] f32
    s_dst = jnp.einsum("nhc,hc->hn", theta, a_dst)               # [H, N] f32

    # ---- pad to tile-aligned, lane-dense shapes (single jnp.pad calls) ------------
    theta_p = jnp.pad(theta_cat.astype(compute_dtype),
                      ((0, n_pad - n), (0, hc_pad - hc)))        # [n_pad, hc_pad]
    sdst_p = jnp.pad(s_dst, ((0, 0), (0, n_pad - n)))[:, :, None]   # [H, n_pad, 1] f32
    ssrc_p = jnp.pad(s_src, ((0, 0), (0, n_pad - n)))[:, None, :]   # [H, 1, n_pad] f32

    grid = (n_pad // tq, n_pad // tk)

    # theta residency: keep the whole projection in VMEM when it fits (x2 buffering);
    # otherwise stream one source tile per grid step (safe on v7x's 64 MiB VMEM).
    theta_bytes = theta_p.size * theta_p.dtype.itemsize
    theta_resident = (2 * theta_bytes) <= (16 * 2 ** 20)
    if theta_resident:
        theta_spec = pl.BlockSpec((n_pad, hc_pad), lambda qi, ki, tf: (0, 0))
    else:
        theta_spec = pl.BlockSpec((tk, hc_pad), lambda qi, ki, tf: (ki, 0))

    kernel = functools.partial(gat_attn_kernel, heads=heads, out_ch=out_ch,
                               neg_slope=neg_slope, tk=tk,
                               theta_resident=theta_resident)

    flops = 2 * heads * n_pad * n_pad * hc_pad + 12 * heads * n_pad * n_pad
    bytes_accessed = (adj_pad.size                                   # int8 adjacency
                      + theta_bytes * (1 if theta_resident else grid[0])
                      + 4 * n_pad * hc_pad                           # f32 output
                      + 8 * heads * n_pad)                           # logits

    out = pl.pallas_call(
        kernel,
        out_shape=jax.ShapeDtypeStruct((n_pad, hc_pad), jnp.float32),
        grid_spec=pltpu.PrefetchScalarGridSpec(
            num_scalar_prefetch=1,                                   # tile_flags -> SMEM
            grid=grid,
            in_specs=[
                pl.BlockSpec((tq, tk), lambda qi, ki, tf: (qi, ki)),          # adjacency i8
                pl.BlockSpec((heads, tq, 1), lambda qi, ki, tf: (0, qi, 0)),  # dst logits
                pl.BlockSpec((heads, 1, tk), lambda qi, ki, tf: (0, 0, ki)),  # src logits
                theta_spec,                                                   # theta slab
            ],
            out_specs=pl.BlockSpec((tq, hc_pad), lambda qi, ki, tf: (qi, 0)),
            scratch_shapes=[
                pltpu.VMEM((heads, tq, 1), jnp.float32),   # running max m (lane-padded)
                pltpu.VMEM((heads, tq, 1), jnp.float32),   # running sum l (lane-padded)
                pltpu.VMEM((tq, hc_pad), jnp.float32),     # head-packed f32 accumulator
            ],
        ),
        compiler_params=pltpu.CompilerParams(
            dimension_semantics=("parallel", "arbitrary"),
            vmem_limit_bytes=64 * 2 ** 20),
        cost_estimate=pl.CostEstimate(
            flops=int(flops),
            transcendentals=int(2 * heads * n_pad * n_pad),
            bytes_accessed=int(bytes_accessed)),
    )(tile_flags, adj_pad, sdst_p, ssrc_p, theta_p)

    out = out[:n, :hc]                                           # already concat layout
    if concat:
        return out + bias[None, :]
    out = out.reshape(n, heads, out_ch).mean(axis=1)             # mean over heads (last layer)
    return out + bias[None, :]


def dense_adjacency(edge_index, num_nodes):
    """Dense {0,1} mask adj[dst, src] with self loops."""
    src, dst = edge_index[0], edge_index[1]
    adj = jnp.zeros((num_nodes, num_nodes), jnp.float32)
    adj = adj.at[dst, src].set(1.0)    # duplicate edges collapse (== PyG after coalesce)
    return jnp.maximum(adj, jnp.eye(num_nodes, dtype=jnp.float32))


def init_gat_params(key, n_dims, n_heads):
    """Glorot-style init matching torch_geometric GATConv parameter shapes."""
    params = []
    n_in = n_dims[0]
    num_layers = len(n_dims) - 1
    for i in range(num_layers):
        out_ch = n_dims[i + 1]
        heads = n_heads[i]
        concat = i != num_layers - 1
        key, kw, ks, kd = jax.random.split(key, 4)
        lim_w = (6.0 / (n_in + heads * out_ch)) ** 0.5
        w = jax.random.uniform(kw, (n_in, heads * out_ch), jnp.float32, -lim_w, lim_w)
        lim_a = (6.0 / (out_ch + 1)) ** 0.5
        a_src = jax.random.uniform(ks, (heads, out_ch), jnp.float32, -lim_a, lim_a)
        a_dst = jax.random.uniform(kd, (heads, out_ch), jnp.float32, -lim_a, lim_a)
        bias = jnp.zeros((heads * out_ch if concat else out_ch,), jnp.float32)
        params.append((w, a_src, a_dst, bias))
        n_in = heads * out_ch if concat else out_ch
    return params


def gat_forward(x, edge_index, params, n_heads, *, alpha=0.2,
                compute_dtype=jnp.bfloat16):
    """Forward pass of the GAT module (dropout == identity, inference mode)."""
    n = x.shape[0]
    tq, tk = _pick_tiles(n)
    n_pad = _round_up(n, max(tq, tk))

    # int8 adjacency: self loops on padded rows keep every softmax row non-empty
    # (no NaN); padded theta rows are zero so padded outputs are zero / sliced off.
    adj = dense_adjacency(edge_index, n)
    adj_pad = (jnp.eye(n_pad, dtype=jnp.int8)
               .at[:n, :n].set((adj > 0).astype(jnp.int8)))

    # per-(dst-tile, src-tile) "has any edge" flags for block-sparse compute skipping
    n_qt, n_kt = n_pad // tq, n_pad // tk
    tile_flags = (adj_pad.reshape(n_qt, tq, n_kt, tk) != 0).any(axis=(1, 3))
    tile_flags = tile_flags.astype(jnp.int32)

    num_layers = len(params)
    x = x.astype(jnp.float32)                 # input dropout: identity at inference
    for i, layer in enumerate(params):
        heads = n_heads[i]
        out_ch = layer[0].shape[1] // heads
        concat = i != num_layers - 1
        x = gat_conv_pallas(x, adj_pad, tile_flags, layer, heads=heads, out_ch=out_ch,
                            concat=concat, neg_slope=alpha,
                            compute_dtype=compute_dtype, tq=tq, tk=tk)
        if i != num_layers - 1:
            x = jax.nn.elu(x)                 # dropout after ELU: identity at inference
    return x


def gat_reference(x, edge_index, params, n_heads, *, alpha=0.2):
    """Plain-JAX dense GAT reference for sanity checking."""
    n = x.shape[0]
    adj = dense_adjacency(edge_index, n)
    num_layers = len(params)
    x = x.astype(jnp.float32)
    for i, (w, a_src, a_dst, bias) in enumerate(params):
        heads = n_heads[i]
        out_ch = w.shape[1] // heads
        theta = (x @ w).reshape(n, heads, out_ch)
        s_src = jnp.einsum("nhc,hc->hn", theta, a_src)
        s_dst = jnp.einsum("nhc,hc->hn", theta, a_dst)
        e = s_dst[:, :, None] + s_src[:, None, :]                    # [H, dst, src]
        e = jnp.where(e >= 0, e, alpha * e)
        e = jnp.where(adj[None] > 0, e, -jnp.inf)
        att = jax.nn.softmax(e, axis=-1)
        out = jnp.einsum("hij,hjc->hic", att, jnp.transpose(theta, (1, 0, 2)))
        if i != num_layers - 1:
            x = jnp.transpose(out, (1, 0, 2)).reshape(n, heads * out_ch) + bias
            x = jax.nn.elu(x)
        else:
            x = jnp.mean(out, axis=0) + bias
    return x


if __name__ == "__main__":
    key = jax.random.PRNGKey(0)
    k_x, k_e, k_p = jax.random.split(key, 3)

    num_nodes = 16
    num_edges = 40
    n_dims = [16, 8, 6]          # GAT(n_dims, n_heads): 16 -> 8 x 4 heads -> 6
    n_heads = [4, 1]
    alpha = 0.2

    x = jax.random.normal(k_x, (num_nodes, n_dims[0]), jnp.float32)
    edge_index = jax.random.randint(k_e, (2, num_edges), 0, num_nodes, jnp.int32)
    params = init_gat_params(k_p, n_dims, n_heads)

    ref = gat_reference(x, edge_index, params, n_heads, alpha=alpha)

    # f32 compute path (tolerance kept robust to TPU matmul precision modes)
    out_f32 = jax.block_until_ready(
        gat_forward(x, edge_index, params, n_heads, alpha=alpha,
                    compute_dtype=jnp.float32))
    assert out_f32.shape == (num_nodes, n_dims[-1])
    err_f32 = float(jnp.max(jnp.abs(out_f32 - ref)))
    assert jnp.allclose(out_f32, ref, atol=3e-2, rtol=3e-2), err_f32

    # bf16 streaming path (default: halves the O(N*F) theta traffic on v6e/v7x)
    out_bf16 = jax.block_until_ready(
        gat_forward(x, edge_index, params, n_heads, alpha=alpha,
                    compute_dtype=jnp.bfloat16))
    err_bf16 = float(jnp.max(jnp.abs(out_bf16 - ref)))
    assert jnp.allclose(out_bf16, ref, atol=7e-2, rtol=7e-2), err_bf16

    print("KERNEL_OK")
</pallas_src>

<mosaic_0001>
module attributes {stable_mosaic.version = 11 : i64} {
  func.func @gat_attn_kernel(%arg0: i32, %arg1: i32, %arg2: memref<1x1xi32, #tpu.memory_space<smem>>, %arg3: memref<128x128xi8, #tpu.memory_space<vmem>>, %arg4: memref<4x128x1xf32, #tpu.memory_space<vmem>>, %arg5: memref<4x1x128xf32, #tpu.memory_space<vmem>>, %arg6: memref<128x128xf32, #tpu.memory_space<vmem>>, %arg7: memref<128x128xf32, #tpu.memory_space<vmem>>, %arg8: memref<4x128x1xf32, #tpu.memory_space<vmem>>, %arg9: memref<4x128x1xf32, #tpu.memory_space<vmem>>, %arg10: memref<128x128xf32, #tpu.memory_space<vmem>>) attributes {dimension_semantics = [#tpu.dimension_semantics<parallel>, #tpu.dimension_semantics<arbitrary>], iteration_bounds = array<i64: 1, 1>, scalar_prefetch = 1 : i64, scratch_operands = 3 : i64, tpu.core_type = #tpu.core_type<tc>, window_params = [{transform_indices = @transform_0, window_bounds = array<i64: 128, 128>}, {transform_indices = @transform_1, window_bounds = array<i64: 4, 128, 1>}, {transform_indices = @transform_2, window_bounds = array<i64: 4, 1, 128>}, {pipeline_mode = #tpu.pipeline_mode<synchronous>, transform_indices = @transform_3, window_bounds = array<i64: 128, 128>}, {transform_indices = @transform_4, window_bounds = array<i64: 128, 128>}]} {
    %0 = tpu.iota {dimensions = array<i32: 1>} : vector<1x128xi32>
    %c0_i32 = arith.constant 0 : i32
    %1 = arith.cmpi eq, %arg1, %c0_i32 : i32
    %2 = arith.extui %1 : i1 to i32
    %c0_i32_0 = arith.constant 0 : i32
    %3 = arith.cmpi ne, %2, %c0_i32_0 : i32
    scf.if %3 {
      %cst = arith.constant -1.000000e+30 : f32
      %13 = vector.broadcast %cst : f32 to vector<4x128x1xf32>
      %c0 = arith.constant 0 : index
      %c0_5 = arith.constant 0 : index
      %c0_6 = arith.constant 0 : index
      %14 = vector.load %arg8[%c0, %c0_5, %c0_6] : memref<4x128x1xf32, #tpu.memory_space<vmem>>, vector<4x128x1xf32>
      tpu.vector_store %arg8[%c0, %c0_5, %c0_6], %13 {strides = array<i32>} : memref<4x128x1xf32, #tpu.memory_space<vmem>>, vector<4x128x1xf32>,
      %cst_7 = arith.constant 0.000000e+00 : f32
      %15 = vector.broadcast %cst_7 : f32 to vector<4x128x1xf32>
      %c0_8 = arith.constant 0 : index
      %c0_9 = arith.constant 0 : index
      %c0_10 = arith.constant 0 : index
      %16 = vector.load %arg9[%c0_8, %c0_9, %c0_10] : memref<4x128x1xf32, #tpu.memory_space<vmem>>, vector<4x128x1xf32>
      tpu.vector_store %arg9[%c0_8, %c0_9, %c0_10], %15 {strides = array<i32>} : memref<4x128x1xf32, #tpu.memory_space<vmem>>, vector<4x128x1xf32>,
      %cst_11 = arith.constant 0.000000e+00 : f32
      %17 = vector.broadcast %cst_11 : f32 to vector<128x128xf32>
      %c0_12 = arith.constant 0 : index
      %c0_13 = arith.constant 0 : index
      %18 = vector.load %arg10[%c0_12, %c0_13] : memref<128x128xf32, #tpu.memory_space<vmem>>, vector<128x128xf32>
      tpu.vector_store %arg10[%c0_12, %c0_13], %17 {strides = array<i32>} : memref<128x128xf32, #tpu.memory_space<vmem>>, vector<128x128xf32>,
    } else {
    }
    %4 = arith.index_cast %arg0 : i32 to index
    %5 = arith.index_cast %arg1 : i32 to index
    %6 = memref.load %arg2[%4, %5] : memref<1x1xi32, #tpu.memory_space<smem>>
    %c0_i32_1 = arith.constant 0 : i32
    %7 = arith.cmpi sgt, %6, %c0_i32_1 : i32
    %8 = arith.extui %7 : i1 to i32
    %c0_i32_2 = arith.constant 0 : i32
    %9 = arith.cmpi ne, %8, %c0_i32_2 : i32
    scf.if %9 {
      %c0 = arith.constant 0 : index
      %c0_5 = arith.constant 0 : index
      %13 = vector.load %arg3[%c0, %c0_5] : memref<128x128xi8, #tpu.memory_space<vmem>>, vector<128x128xi8>
      %c0_i8 = arith.constant 0 : i8
      %14 = vector.broadcast %c0_i8 : i8 to vector<128x128xi8>
      %15 = arith.cmpi ne, %13, %14 : vector<128x128xi8>
      %c0_6 = arith.constant 0 : index
      %c0_7 = arith.constant 0 : index
      %c0_8 = arith.constant 0 : index
      %16 = vector.load %arg4[%c0_6, %c0_7, %c0_8] : memref<4x128x1xf32, #tpu.memory_space<vmem>>, vector<4x128x1xf32>
      %c0_9 = arith.constant 0 : index
      %c0_10 = arith.constant 0 : index
      %c0_11 = arith.constant 0 : index
      %17 = vector.load %arg5[%c0_9, %c0_10, %c0_11] : memref<4x1x128xf32, #tpu.memory_space<vmem>>, vector<4x1x128xf32>
      %18 = vector.broadcast %16 : vector<4x128x1xf32> to vector<4x128x128xf32>
      %19 = vector.broadcast %17 : vector<4x1x128xf32> to vector<4x128x128xf32>
      %20 = arith.addf %18, %19 : vector<4x128x128xf32>
      %cst = arith.constant 0.000000e+00 : f32
      %21 = vector.broadcast %cst : f32 to vector<4x128x128xf32>
      %22 = arith.cmpf oge, %20, %21 : vector<4x128x128xf32>
      %cst_12 = arith.constant 2.000000e-01 : f32
      %23 = vector.broadcast %cst_12 : f32 to vector<4x128x128xf32>
      %24 = arith.mulf %23, %20 : vector<4x128x128xf32>
      %25 = arith.select %22, %20, %24 : vector<4x128x128xi1>, vector<4x128x128xf32>
      %26 = vector.shape_cast %15 : vector<128x128xi1> to vector<1x128x128xi1>
      %cst_13 = arith.constant -1.000000e+30 : f32
      %27 = vector.shape_cast %26 : vector<1x128x128xi1> to vector<1x128x128xi1>
      %28 = vector.broadcast %27 : vector<1x128x128xi1> to vector<4x128x128xi1>
      %29 = vector.broadcast %cst_13 : f32 to vector<4x128x128xf32>
      %30 = arith.select %28, %25, %29 : vector<4x128x128xi1>, vector<4x128x128xf32>
      %c0_14 = arith.constant 0 : index
      %c0_15 = arith.constant 0 : index
      %c0_16 = arith.constant 0 : index
      %31 = vector.load %arg8[%c0_14, %c0_15, %c0_16] : memref<4x128x1xf32, #tpu.memory_space<vmem>>, vector<4x128x1xf32>
      %cst_17 = arith.constant dense<0xFF800000> : vector<4x128xf32>
      %32 = vector.multi_reduction <maximumf>, %30, %cst_17 [2] : vector<4x128x128xf32> to vector<4x128xf32>
      %33 = vector.shape_cast %32 : vector<4x128xf32> to vector<4x128x1xf32>
      %34 = arith.maximumf %31, %33 : vector<4x128x1xf32>
      %35 = arith.subf %31, %34 : vector<4x128x1xf32>
      %36 = math.exp %35 : vector<4x128x1xf32>
      %37 = vector.shape_cast %15 : vector<128x128xi1> to vector<1x128x128xi1>
      %38 = vector.broadcast %34 : vector<4x128x1xf32> to vector<4x128x128xf32>
      %39 = arith.subf %30, %38 : vector<4x128x128xf32>
      %40 = math.exp %39 : vector<4x128x128xf32>
      %cst_18 = arith.constant 0.000000e+00 : f32
      %41 = vector.shape_cast %37 : vector<1x128x128xi1> to vector<1x128x128xi1>
      %42 = vector.broadcast %41 : vector<1x128x128xi1> to vector<4x128x128xi1>
      %43 = vector.broadcast %cst_18 : f32 to vector<4x128x128xf32>
      %44 = arith.select %42, %40, %43 : vector<4x128x128xi1>, vector<4x128x128xf32>
      %c0_19 = arith.constant 0 : index
      %c0_20 = arith.constant 0 : index
      %c0_21 = arith.constant 0 : index
      %45 = vector.load %arg9[%c0_19, %c0_20, %c0_21] : memref<4x128x1xf32, #tpu.memory_space<vmem>>, vector<4x128x1xf32>
      %46 = arith.mulf %36, %45 : vector<4x128x1xf32>
      %cst_22 = arith.constant dense<0.000000e+00> : vector<4x128xf32>
      %47 = vector.multi_reduction <add>, %44, %cst_22 [2] : vector<4x128x128xf32> to vector<4x128xf32>
      %48 = vector.shape_cast %47 : vector<4x128xf32> to vector<4x128x1xf32>
      %49 = arith.addf %46, %48 : vector<4x128x1xf32>
      %c0_23 = arith.constant 0 : index
      %c0_24 = arith.constant 0 : index
      %c0_25 = arith.constant 0 : index
      %50 = vector.load %arg9[%c0_23, %c0_24, %c0_25] : memref<4x128x1xf32, #tpu.memory_space<vmem>>, vector<4x128x1xf32>
      tpu.vector_store %arg9[%c0_23, %c0_24, %c0_25], %49 {strides = array<i32>} : memref<4x128x1xf32, #tpu.memory_space<vmem>>, vector<4x128x1xf32>,
      %c0_26 = arith.constant 0 : index
      %c0_27 = arith.constant 0 : index
      %c0_28 = arith.constant 0 : index
      %51 = vector.load %arg8[%c0_26, %c0_27, %c0_28] : memref<4x128x1xf32, #tpu.memory_space<vmem>>, vector<4x128x1xf32>
      tpu.vector_store %arg8[%c0_26, %c0_27, %c0_28], %34 {strides = array<i32>} : memref<4x128x1xf32, #tpu.memory_space<vmem>>, vector<4x128x1xf32>,
      %c128_i32 = arith.constant 128 : i32
      %52 = arith.muli %arg1, %c128_i32 : i32
      %53 = tpu.assume_multiple %52, 128 : i32
      %54 = arith.index_cast %53 : i32 to index
      %c0_29 = arith.constant 0 : index
      %55 = vector.load %arg6[%54, %c0_29] : memref<128x128xf32, #tpu.memory_space<vmem>>, vector<128x128xf32>
      %cst_30 = arith.constant 0.000000e+00 : f32
      %56 = vector.broadcast %cst_30 : f32 to vector<128x128xf32>
      %cst_31 = arith.constant 0.000000e+00 : f32
      %57 = vector.broadcast %cst_31 : f32 to vector<128x128xf32>
      %c0_i32_32 = arith.constant 0 : i32
      %58 = vector.broadcast %c0_i32_32 : i32 to vector<1x128xi32>
      %59 = arith.cmpi sge, %0, %58 : vector<1x128xi32>
      %c8_i32 = arith.constant 8 : i32
      %60 = vector.broadcast %c8_i32 : i32 to vector<1x128xi32>
      %61 = arith.cmpi slt, %0, %60 : vector<1x128xi32>
      %62 = arith.andi %59, %61 : vector<1x128xi1>
      %63 = vector.extract_strided_slice %36 {offsets = [0, 0, 0], sizes = [1, 128, 1], strides = [1, 1, 1]} : vector<4x128x1xf32> to vector<1x128x1xf32>
      %64 = vector.shape_cast %63 : vector<1x128x1xf32> to vector<128x1xf32>
      %65 = vector.shape_cast %62 : vector<1x128xi1> to vector<1x128xi1>
      %66 = vector.broadcast %65 : vector<1x128xi1> to vector<128x128xi1>
      %67 = vector.shape_cast %64 : vector<128x1xf32> to vector<128x1xf32>
      %68 = vector.broadcast %67 : vector<128x1xf32> to vector<128x128xf32>
      %69 = arith.select %66, %68, %56 : vector<128x128xi1>, vector<128x128xf32>
      %cst_33 = arith.constant 0.000000e+00 : f32
      %70 = vector.broadcast %cst_33 : f32 to vector<128x128xf32>
      %71 = vector.shape_cast %62 : vector<1x128xi1> to vector<1x128xi1>
      %72 = vector.broadcast %71 : vector<1x128xi1> to vector<128x128xi1>
      %73 = arith.select %72, %55, %70 : vector<128x128xi1>, vector<128x128xf32>
      %74 = vector.extract_strided_slice %44 {offsets = [0, 0, 0], sizes = [1, 128, 128], strides = [1, 1, 1]} : vector<4x128x128xf32> to vector<1x128x128xf32>
      %75 = vector.shape_cast %74 : vector<1x128x128xf32> to vector<128x128xf32>
      %cst_34 = arith.constant dense<0.000000e+00> : vector<128x128xf32>
      %76 = tpu.matmul %75, %73, %cst_34 {dimension_numbers = #tpu.dot_dimension_numbers<[1], [0], [0], [1], [0, 0, 1, 1], [], []>} : vector<128x128xf32>, vector<128x128xf32>, vector<128x128xf32> -> vector<128x128xf32>
      %77 = arith.addf %57, %76 : vector<128x128xf32>
      %c8_i32_35 = arith.constant 8 : i32
      %78 = vector.broadcast %c8_i32_35 : i32 to vector<1x128xi32>
      %79 = arith.cmpi sge, %0, %78 : vector<1x128xi32>
      %c16_i32 = arith.constant 16 : i32
      %80 = vector.broadcast %c16_i32 : i32 to vector<1x128xi32>
      %81 = arith.cmpi slt, %0, %80 : vector<1x128xi32>
      %82 = arith.andi %79, %81 : vector<1x128xi1>
      %83 = vector.extract_strided_slice %36 {offsets = [1, 0, 0], sizes = [1, 128, 1], strides = [1, 1, 1]} : vector<4x128x1xf32> to vector<1x128x1xf32>
      %84 = vector.shape_cast %83 : vector<1x128x1xf32> to vector<128x1xf32>
      %85 = vector.shape_cast %82 : vector<1x128xi1> to vector<1x128xi1>
      %86 = vector.broadcast %85 : vector<1x128xi1> to vector<128x128xi1>
      %87 = vector.shape_cast %84 : vector<128x1xf32> to vector<128x1xf32>
      %88 = vector.broadcast %87 : vector<128x1xf32> to vector<128x128xf32>
      %89 = arith.select %86, %88, %69 : vector<128x128xi1>, vector<128x128xf32>
      %cst_36 = arith.constant 0.000000e+00 : f32
      %90 = vector.broadcast %cst_36 : f32 to vector<128x128xf32>
      %91 = vector.shape_cast %82 : vector<1x128xi1> to vector<1x128xi1>
      %92 = vector.broadcast %91 : vector<1x128xi1> to vector<128x128xi1>
      %93 = arith.select %92, %55, %90 : vector<128x128xi1>, vector<128x128xf32>
      %94 = vector.extract_strided_slice %44 {offsets = [1, 0, 0], sizes = [1, 128, 128], strides = [1, 1, 1]} : vector<4x128x128xf32> to vector<1x128x128xf32>
      %95 = vector.shape_cast %94 : vector<1x128x128xf32> to vector<128x128xf32>
      %cst_37 = arith.constant dense<0.000000e+00> : vector<128x128xf32>
      %96 = tpu.matmul %95, %93, %cst_37 {dimension_numbers = #tpu.dot_dimension_numbers<[1], [0], [0], [1], [0, 0, 1, 1], [], []>} : vector<128x128xf32>, vector<128x128xf32>, vector<128x128xf32> -> vector<128x128xf32>
      %97 = arith.addf %77, %96 : vector<128x128xf32>
      %c16_i32_38 = arith.constant 16 : i32
      %98 = vector.broadcast %c16_i32_38 : i32 to vector<1x128xi32>
      %99 = arith.cmpi sge, %0, %98 : vector<1x128xi32>
      %c24_i32 = arith.constant 24 : i32
      %100 = vector.broadcast %c24_i32 : i32 to vector<1x128xi32>
      %101 = arith.cmpi slt, %0, %100 : vector<1x128xi32>
      %102 = arith.andi %99, %101 : vector<1x128xi1>
      %103 = vector.extract_strided_slice %36 {offsets = [2, 0, 0], sizes = [1, 128, 1], strides = [1, 1, 1]} : vector<4x128x1xf32> to vector<1x128x1xf32>
      %104 = vector.shape_cast %103 : vector<1x128x1xf32> to vector<128x1xf32>
      %105 = vector.shape_cast %102 : vector<1x128xi1> to vector<1x128xi1>
      %106 = vector.broadcast %105 : vector<1x128xi1> to vector<128x128xi1>
      %107 = vector.shape_cast %104 : vector<128x1xf32> to vector<128x1xf32>
      %108 = vector.broadcast %107 : vector<128x1xf32> to vector<128x128xf32>
      %109 = arith.select %106, %108, %89 : vector<128x128xi1>, vector<128x128xf32>
      %cst_39 = arith.constant 0.000000e+00 : f32
      %110 = vector.broadcast %cst_39 : f32 to vector<128x128xf32>
      %111 = vector.shape_cast %102 : vector<1x128xi1> to vector<1x128xi1>
      %112 = vector.broadcast %111 : vector<1x128xi1> to vector<128x128xi1>
      %113 = arith.select %112, %55, %110 : vector<128x128xi1>, vector<128x128xf32>
      %114 = vector.extract_strided_slice %44 {offsets = [2, 0, 0], sizes = [1, 128, 128], strides = [1, 1, 1]} : vector<4x128x128xf32> to vector<1x128x128xf32>
      %115 = vector.shape_cast %114 : vector<1x128x128xf32> to vector<128x128xf32>
      %cst_40 = arith.constant dense<0.000000e+00> : vector<128x128xf32>
      %116 = tpu.matmul %115, %113, %cst_40 {dimension_numbers = #tpu.dot_dimension_numbers<[1], [0], [0], [1], [0, 0, 1, 1], [], []>} : vector<128x128xf32>, vector<128x128xf32>, vector<128x128xf32> -> vector<128x128xf32>
      %117 = arith.addf %97, %116 : vector<128x128xf32>
      %c24_i32_41 = arith.constant 24 : i32
      %118 = vector.broadcast %c24_i32_41 : i32 to vector<1x128xi32>
      %119 = arith.cmpi sge, %0, %118 : vector<1x128xi32>
      %c32_i32 = arith.constant 32 : i32
      %120 = vector.broadcast %c32_i32 : i32 to vector<1x128xi32>
      %121 = arith.cmpi slt, %0, %120 : vector<1x128xi32>
      %122 = arith.andi %119, %121 : vector<1x128xi1>
      %123 = vector.extract_strided_slice %36 {offsets = [3, 0, 0], sizes = [1, 128, 1], strides = [1, 1, 1]} : vector<4x128x1xf32> to vector<1x128x1xf32>
      %124 = vector.shape_cast %123 : vector<1x128x1xf32> to vector<128x1xf32>
      %125 = vector.shape_cast %122 : vector<1x128xi1> to vector<1x128xi1>
      %126 = vector.broadcast %125 : vector<1x128xi1> to vector<128x128xi1>
      %127 = vector.shape_cast %124 : vector<128x1xf32> to vector<128x1xf32>
      %128 = vector.broadcast %127 : vector<128x1xf32> to vector<128x128xf32>
      %129 = arith.select %126, %128, %109 : vector<128x128xi1>, vector<128x128xf32>
      %cst_42 = arith.constant 0.000000e+00 : f32
      %130 = vector.broadcast %cst_42 : f32 to vector<128x128xf32>
      %131 = vector.shape_cast %122 : vector<1x128xi1> to vector<1x128xi1>
      %132 = vector.broadcast %131 : vector<1x128xi1> to vector<128x128xi1>
      %133 = arith.select %132, %55, %130 : vector<128x128xi1>, vector<128x128xf32>
      %134 = vector.extract_strided_slice %44 {offsets = [3, 0, 0], sizes = [1, 128, 128], strides = [1, 1, 1]} : vector<4x128x128xf32> to vector<1x128x128xf32>
      %135 = vector.shape_cast %134 : vector<1x128x128xf32> to vector<128x128xf32>
      %cst_43 = arith.constant dense<0.000000e+00> : vector<128x128xf32>
      %136 = tpu.matmul %135, %133, %cst_43 {dimension_numbers = #tpu.dot_dimension_numbers<[1], [0], [0], [1], [0, 0, 1, 1], [], []>} : vector<128x128xf32>, vector<128x128xf32>, vector<128x128xf32> -> vector<128x128xf32>
      %137 = arith.addf %117, %136 : vector<128x128xf32>
      %c0_44 = arith.constant 0 : index
      %c0_45 = arith.constant 0 : index
      %138 = vector.load %arg10[%c0_44, %c0_45] : memref<128x128xf32, #tpu.memory_space<vmem>>, vector<128x128xf32>
      %139 = arith.mulf %129, %138 : vector<128x128xf32>
      %140 = arith.addf %139, %137 : vector<128x128xf32>
      %c0_46 = arith.constant 0 : index
      %c0_47 = arith.constant 0 : index
      %141 = vector.load %arg10[%c0_46, %c0_47] : memref<128x128xf32, #tpu.memory_space<vmem>>, vector<128x128xf32>
      tpu.vector_store %arg10[%c0_46, %c0_47], %140 {strides = array<i32>} : memref<128x128xf32, #tpu.memory_space<vmem>>, vector<128x128xf32>,
    } else {
    }
    %c0_i32_3 = arith.constant 0 : i32
    %10 = arith.cmpi eq, %arg1, %c0_i32_3 : i32
    %11 = arith.extui %10 : i1 to i32
    %c0_i32_4 = arith.constant 0 : i32
    %12 = arith.cmpi ne, %11, %c0_i32_4 : i32
    scf.if %12 {
      %cst = arith.constant 0.000000e+00 : f32
      %13 = vector.broadcast %cst : f32 to vector<128x128xf32>
      %c0_i32_5 = arith.constant 0 : i32
      %14 = vector.broadcast %c0_i32_5 : i32 to vector<1x128xi32>
      %15 = arith.cmpi sge, %0, %14 : vector<1x128xi32>
      %c8_i32 = arith.constant 8 : i32
      %16 = vector.broadcast %c8_i32 : i32 to vector<1x128xi32>
      %17 = arith.cmpi slt, %0, %16 : vector<1x128xi32>
      %18 = arith.andi %15, %17 : vector<1x128xi1>
      %c0 = arith.constant 0 : index
      %c0_6 = arith.constant 0 : index
      %c0_7 = arith.constant 0 : index
      %19 = vector.load %arg9[%c0, %c0_6, %c0_7] : memref<4x128x1xf32, #tpu.memory_space<vmem>>, vector<1x128x1xf32>
      %20 = vector.shape_cast %19 : vector<1x128x1xf32> to vector<128x1xf32>
      %21 = tpu.reciprocal %20 {approx = true} : vector<128x1xf32> -> vector<128x1xf32>
      %22 = vector.shape_cast %18 : vector<1x128xi1> to vector<1x128xi1>
      %23 = vector.broadcast %22 : vector<1x128xi1> to vector<128x128xi1>
      %24 = vector.shape_cast %21 : vector<128x1xf32> to vector<128x1xf32>
      %25 = vector.broadcast %24 : vector<128x1xf32> to vector<128x128xf32>
      %26 = arith.select %23, %25, %13 : vector<128x128xi1>, vector<128x128xf32>
      %c8_i32_8 = arith.constant 8 : i32
      %27 = vector.broadcast %c8_i32_8 : i32 to vector<1x128xi32>
      %28 = arith.cmpi sge, %0, %27 : vector<1x128xi32>
      %c16_i32 = arith.constant 16 : i32
      %29 = vector.broadcast %c16_i32 : i32 to vector<1x128xi32>
      %30 = arith.cmpi slt, %0, %29 : vector<1x128xi32>
      %31 = arith.andi %28, %30 : vector<1x128xi1>
      %c1 = arith.constant 1 : index
      %c0_9 = arith.constant 0 : index
      %c0_10 = arith.constant 0 : index
      %32 = vector.load %arg9[%c1, %c0_9, %c0_10] : memref<4x128x1xf32, #tpu.memory_space<vmem>>, vector<1x128x1xf32>
      %33 = vector.shape_cast %32 : vector<1x128x1xf32> to vector<128x1xf32>
      %34 = tpu.reciprocal %33 {approx = true} : vector<128x1xf32> -> vector<128x1xf32>
      %35 = vector.shape_cast %31 : vector<1x128xi1> to vector<1x128xi1>
      %36 = vector.broadcast %35 : vector<1x128xi1> to vector<128x128xi1>
      %37 = vector.shape_cast %34 : vector<128x1xf32> to vector<128x1xf32>
      %38 = vector.broadcast %37 : vector<128x1xf32> to vector<128x128xf32>
      %39 = arith.select %36, %38, %26 : vector<128x128xi1>, vector<128x128xf32>
      %c16_i32_11 = arith.constant 16 : i32
      %40 = vector.broadcast %c16_i32_11 : i32 to vector<1x128xi32>
      %41 = arith.cmpi sge, %0, %40 : vector<1x128xi32>
      %c24_i32 = arith.constant 24 : i32
      %42 = vector.broadcast %c24_i32 : i32 to vector<1x128xi32>
      %43 = arith.cmpi slt, %0, %42 : vector<1x128xi32>
      %44 = arith.andi %41, %43 : vector<1x128xi1>
      %c2 = arith.constant 2 : index
      %c0_12 = arith.constant 0 : index
      %c0_13 = arith.constant 0 : index
      %45 = vector.load %arg9[%c2, %c0_12, %c0_13] : memref<4x128x1xf32, #tpu.memory_space<vmem>>, vector<1x128x1xf32>
      %46 = vector.shape_cast %45 : vector<1x128x1xf32> to vector<128x1xf32>
      %47 = tpu.reciprocal %46 {approx = true} : vector<128x1xf32> -> vector<128x1xf32>
      %48 = vector.shape_cast %44 : vector<1x128xi1> to vector<1x128xi1>
      %49 = vector.broadcast %48 : vector<1x128xi1> to vector<128x128xi1>
      %50 = vector.shape_cast %47 : vector<128x1xf32> to vector<128x1xf32>
      %51 = vector.broadcast %50 : vector<128x1xf32> to vector<128x128xf32>
      %52 = arith.select %49, %51, %39 : vector<128x128xi1>, vector<128x128xf32>
      %c24_i32_14 = arith.constant 24 : i32
      %53 = vector.broadcast %c24_i32_14 : i32 to vector<1x128xi32>
      %54 = arith.cmpi sge, %0, %53 : vector<1x128xi32>
      %c32_i32 = arith.constant 32 : i32
      %55 = vector.broadcast %c32_i32 : i32 to vector<1x128xi32>
      %56 = arith.cmpi slt, %0, %55 : vector<1x128xi32>
      %57 = arith.andi %54, %56 : vector<1x128xi1>
      %c3 = arith.constant 3 : index
      %c0_15 = arith.constant 0 : index
      %c0_16 = arith.constant 0 : index
      %58 = vector.load %arg9[%c3, %c0_15, %c0_16] : memref<4x128x1xf32, #tpu.memory_space<vmem>>, vector<1x128x1xf32>
      %59 = vector.shape_cast %58 : vector<1x128x1xf32> to vector<128x1xf32>
      %60 = tpu.reciprocal %59 {approx = true} : vector<128x1xf32> -> vector<128x1xf32>
      %61 = vector.shape_cast %57 : vector<1x128xi1> to vector<1x128xi1>
      %62 = vector.broadcast %61 : vector<1x128xi1> to vector<128x128xi1>
      %63 = vector.shape_cast %60 : vector<128x1xf32> to vector<128x1xf32>
      %64 = vector.broadcast %63 : vector<128x1xf32> to vector<128x128xf32>
      %65 = arith.select %62, %64, %52 : vector<128x128xi1>, vector<128x128xf32>
      %c0_17 = arith.constant 0 : index
      %c0_18 = arith.constant 0 : index
      %66 = vector.load %arg10[%c0_17, %c0_18] : memref<128x128xf32, #tpu.memory_space<vmem>>, vector<128x128xf32>
      %67 = arith.mulf %66, %65 : vector<128x128xf32>
      %c0_19 = arith.constant 0 : index
      %c0_20 = arith.constant 0 : index
      %68 = vector.load %arg7[%c0_19, %c0_20] : memref<128x128xf32, #tpu.memory_space<vmem>>, vector<128x128xf32>
      tpu.vector_store %arg7[%c0_19, %c0_20], %67 {strides = array<i32>} : memref<128x128xf32, #tpu.memory_space<vmem>>, vector<128x128xf32>,
    } else {
    }
    return
  }
  func.func @transform_0(%arg0: i32, %arg1: i32, %arg2: memref<1x1xi32, #tpu.memory_space<smem>>) -> (i32, i32) {
    %c0_i32 = arith.constant 0 : i32
    return %arg0, %arg1 : i32, i32
  }
  func.func @transform_1(%arg0: i32, %arg1: i32, %arg2: memref<1x1xi32, #tpu.memory_space<smem>>) -> (i32, i32, i32) {
    %c0_i32 = arith.constant 0 : i32
    %c0_i32_0 = arith.constant 0 : i32
    %c0_i32_1 = arith.constant 0 : i32
    return %c0_i32, %arg0, %c0_i32_0 : i32, i32, i32
  }
  func.func @transform_2(%arg0: i32, %arg1: i32, %arg2: memref<1x1xi32, #tpu.memory_space<smem>>) -> (i32, i32, i32) {
    %c0_i32 = arith.constant 0 : i32
    %c0_i32_0 = arith.constant 0 : i32
    %c0_i32_1 = arith.constant 0 : i32
    return %c0_i32, %c0_i32_0, %arg1 : i32, i32, i32
  }
  func.func @transform_3(%arg0: i32, %arg1: i32, %arg2: memref<1x1xi32, #tpu.memory_space<smem>>) -> (i32, i32) {
    %c0_i32 = arith.constant 0 : i32
    %c0_i32_0 = arith.constant 0 : i32
    %c0_i32_1 = arith.constant 0 : i32
    return %c0_i32, %c0_i32_0 : i32, i32
  }
  func.func @transform_4(%arg0: i32, %arg1: i32, %arg2: memref<1x1xi32, #tpu.memory_space<smem>>) -> (i32, i32) {
    %c0_i32 = arith.constant 0 : i32
    %c0_i32_0 = arith.constant 0 : i32
    return %arg0, %c0_i32 : i32, i32
  }
}

</mosaic_0001>

<bundles_post_ra>
// kernel: tpu_custom_call.1
= control target key start
LH: loop header
LB: loop body
LE: loop exit
PB: predicated region body
PF: predicated region fallthrough
CT: control target
= control target key end

     0   :  { %11 = vsyncpa [#allocation8], 0  ;;  %v22_v0 = vlaneseq  ;;  %vm8313_vm0 = vcmask 7168   ;;  %v4532_v1 = vmov -1e+30   ;;  %v4533_v3 = vmov 0.0   ;;  %s8305_s0 = inlined_call_operand.<no memory space> [shape: s32[1,1], index: 0, kind: input, shape index: {}]   ;;  %s8306_s1 = inlined_call_operand.vmem [shape: s8[128,128], index: 1, kind: input, shape index: {}]   ;;  %s8307_s2 = inlined_call_operand.vmem [shape: f32[4,128,1], index: 2, kind: input, shape index: {}]   ;;  %s8308_s3 = inlined_call_operand.vmem [shape: f32[4,1,128], index: 3, kind: input, shape index: {}]   ;;  %s8309_s4 = inlined_call_operand.vmem [shape: f32[128,128], index: 4, kind: input, shape index: {}]   ;;  %s8310_s5 = inlined_call_operand.hbm [shape: f32[128,128], index: 5, kind: output, shape index: {}]  }
   0x1   :  { %29 = vst.msk [vmem:[#allocation2] sm:$0xff] %vm8313_vm0, %v4532_v1  ;;  %p3976_p0 = scmp.le.s32.totalorder %s8305_s0, 0 }
   0x2   :  { %v4571_v2 = vand.u32 127, %v22_v0  ;;  %30 = vst.msk [vmem:[#allocation2 + $0x8] sm:$0xff] %vm8313_vm0, %v4532_v1 }
   0x3   :  { %31 = vst.msk [vmem:[#allocation2 + $0x10] sm:$0xff] %vm8313_vm0, %v4532_v1 }
   0x4   :  { %8562 = vst [vmem:[#allocation10_spill] sm:$0xff] %v4571_v2 }
   0x5   :  { %32 = vst.msk [vmem:[#allocation2 + $0x18] sm:$0xff] %vm8313_vm0, %v4532_v1 }
   0x6   :  { %33 = vst.msk [vmem:[#allocation2 + $0x20] sm:$0xff] %vm8313_vm0, %v4532_v1 }
   0x7   :  { %34 = vst.msk [vmem:[#allocation2 + $0x28] sm:$0xff] %vm8313_vm0, %v4532_v1 }
   0x8   :  { %35 = vst.msk [vmem:[#allocation2 + $0x30] sm:$0xff] %vm8313_vm0, %v4532_v1 }
   0x9   :  { %36 = vst.msk [vmem:[#allocation2 + $0x38] sm:$0xff] %vm8313_vm0, %v4532_v1 }
   0xa   :  { %37 = vst.msk [vmem:[#allocation2 + $0x40] sm:$0xff] %vm8313_vm0, %v4532_v1 }
   0xb   :  { %38 = vst.msk [vmem:[#allocation2 + $0x48] sm:$0xff] %vm8313_vm0, %v4532_v1 }
   0xc   :  { %39 = vst.msk [vmem:[#allocation2 + $0x50] sm:$0xff] %vm8313_vm0, %v4532_v1 }
   0xd   :  { %40 = vst.msk [vmem:[#allocation2 + $0x58] sm:$0xff] %vm8313_vm0, %v4532_v1 }
   0xe   :  { %41 = vst.msk [vmem:[#allocation2 + $0x60] sm:$0xff] %vm8313_vm0, %v4532_v1 }
   0xf   :  { %42 = vst.msk [vmem:[#allocation2 + $0x68] sm:$0xff] %vm8313_vm0, %v4532_v1 }
  0x10   :  { %43 = vst.msk [vmem:[#allocation2 + $0x70] sm:$0xff] %vm8313_vm0, %v4532_v1 }
  0x11   :  { %44 = vst.msk [vmem:[#allocation2 + $0x78] sm:$0xff] %vm8313_vm0, %v4532_v1 }
  0x12   :  { %45 = vst.msk [vmem:[#allocation2 + $0x80] sm:$0xff] %vm8313_vm0, %v4532_v1 }
  0x13   :  { %46 = vst.msk [vmem:[#allocation2 + $0x88] sm:$0xff] %vm8313_vm0, %v4532_v1 }
  0x14   :  { %47 = vst.msk [vmem:[#allocation2 + $0x90] sm:$0xff] %vm8313_vm0, %v4532_v1 }
  0x15   :  { %48 = vst.msk [vmem:[#allocation2 + $0x98] sm:$0xff] %vm8313_vm0, %v4532_v1 }
  0x16   :  { %49 = vst.msk [vmem:[#allocation2 + $0xa0] sm:$0xff] %vm8313_vm0, %v4532_v1 }
  0x17   :  { %50 = vst.msk [vmem:[#allocation2 + $0xa8] sm:$0xff] %vm8313_vm0, %v4532_v1 }
  0x18   :  { %51 = vst.msk [vmem:[#allocation2 + $0xb0] sm:$0xff] %vm8313_vm0, %v4532_v1 }
  0x19   :  { %52 = vst.msk [vmem:[#allocation2 + $0xb8] sm:$0xff] %vm8313_vm0, %v4532_v1 }
  0x1a   :  { %53 = vst.msk [vmem:[#allocation2 + $0xc0] sm:$0xff] %vm8313_vm0, %v4532_v1 }
  0x1b   :  { %54 = vst.msk [vmem:[#allocation2 + $0xc8] sm:$0xff] %vm8313_vm0, %v4532_v1 }
  0x1c   :  { %55 = vst.msk [vmem:[#allocation2 + $0xd0] sm:$0xff] %vm8313_vm0, %v4532_v1 }
  0x1d   :  { %56 = vst.msk [vmem:[#allocation2 + $0xd8] sm:$0xff] %vm8313_vm0, %v4532_v1 }
  0x1e   :  { %57 = vst.msk [vmem:[#allocation2 + $0xe0] sm:$0xff] %vm8313_vm0, %v4532_v1 }
  0x1f   :  { %58 = vst.msk [vmem:[#allocation2 + $0xe8] sm:$0xff] %vm8313_vm0, %v4532_v1 }
  0x20   :  { %59 = vst.msk [vmem:[#allocation2 + $0xf0] sm:$0xff] %vm8313_vm0, %v4532_v1 }
  0x21   :  { %60 = vst.msk [vmem:[#allocation2 + $0xf8] sm:$0xff] %vm8313_vm0, %v4532_v1 }
  0x22   :  { %61 = vst.msk [vmem:[#allocation2 + $0x100] sm:$0xff] %vm8313_vm0, %v4532_v1 }
  0x23   :  { %62 = vst.msk [vmem:[#allocation2 + $0x108] sm:$0xff] %vm8313_vm0, %v4532_v1 }
  0x24   :  { %63 = vst.msk [vmem:[#allocation2 + $0x110] sm:$0xff] %vm8313_vm0, %v4532_v1 }
  0x25   :  { %64 = vst.msk [vmem:[#allocation2 + $0x118] sm:$0xff] %vm8313_vm0, %v4532_v1 }
  0x26   :  { %65 = vst.msk [vmem:[#allocation2 + $0x120] sm:$0xff] %vm8313_vm0, %v4532_v1 }
  0x27   :  { %66 = vst.msk [vmem:[#allocation2 + $0x128] sm:$0xff] %vm8313_vm0, %v4532_v1 }
  0x28   :  { %67 = vst.msk [vmem:[#allocation2 + $0x130] sm:$0xff] %vm8313_vm0, %v4532_v1 }
  0x29   :  { %68 = vst.msk [vmem:[#allocation2 + $0x138] sm:$0xff] %vm8313_vm0, %v4532_v1 }
  0x2a   :  { %69 = vst.msk [vmem:[#allocation2 + $0x140] sm:$0xff] %vm8313_vm0, %v4532_v1 }
  0x2b   :  { %70 = vst.msk [vmem:[#allocation2 + $0x148] sm:$0xff] %vm8313_vm0, %v4532_v1 }
  0x2c   :  { %71 = vst.msk [vmem:[#allocation2 + $0x150] sm:$0xff] %vm8313_vm0, %v4532_v1 }
  0x2d   :  { %72 = vst.msk [vmem:[#allocation2 + $0x158] sm:$0xff] %vm8313_vm0, %v4532_v1 }
  0x2e   :  { %73 = vst.msk [vmem:[#allocation2 + $0x160] sm:$0xff] %vm8313_vm0, %v4532_v1 }
  0x2f   :  { %74 = vst.msk [vmem:[#allocation2 + $0x168] sm:$0xff] %vm8313_vm0, %v4532_v1 }
  0x30   :  { %75 = vst.msk [vmem:[#allocation2 + $0x170] sm:$0xff] %vm8313_vm0, %v4532_v1 }
  0x31   :  { %76 = vst.msk [vmem:[#allocation2 + $0x178] sm:$0xff] %vm8313_vm0, %v4532_v1 }
  0x32   :  { %77 = vst.msk [vmem:[#allocation2 + $0x180] sm:$0xff] %vm8313_vm0, %v4532_v1 }
  0x33   :  { %78 = vst.msk [vmem:[#allocation2 + $0x188] sm:$0xff] %vm8313_vm0, %v4532_v1 }
  0x34   :  { %79 = vst.msk [vmem:[#allocation2 + $0x190] sm:$0xff] %vm8313_vm0, %v4532_v1 }
  0x35   :  { %80 = vst.msk [vmem:[#allocation2 + $0x198] sm:$0xff] %vm8313_vm0, %v4532_v1 }
  0x36   :  { %81 = vst.msk [vmem:[#allocation2 + $0x1a0] sm:$0xff] %vm8313_vm0, %v4532_v1 }
  0x37   :  { %82 = vst.msk [vmem:[#allocation2 + $0x1a8] sm:$0xff] %vm8313_vm0, %v4532_v1 }
  0x38   :  { %83 = vst.msk [vmem:[#allocation2 + $0x1b0] sm:$0xff] %vm8313_vm0, %v4532_v1 }
  0x39   :  { %84 = vst.msk [vmem:[#allocation2 + $0x1b8] sm:$0xff] %vm8313_vm0, %v4532_v1 }
  0x3a   :  { %85 = vst.msk [vmem:[#allocation2 + $0x1c0] sm:$0xff] %vm8313_vm0, %v4532_v1 }
  0x3b   :  { %86 = vst.msk [vmem:[#allocation2 + $0x1c8] sm:$0xff] %vm8313_vm0, %v4532_v1 }
  0x3c   :  { %87 = vst.msk [vmem:[#allocation2 + $0x1d0] sm:$0xff] %vm8313_vm0, %v4532_v1 }
  0x3d   :  { %88 = vst.msk [vmem:[#allocation2 + $0x1d8] sm:$0xff] %vm8313_vm0, %v4532_v1 }
  0x3e   :  { %89 = vst.msk [vmem:[#allocation2 + $0x1e0] sm:$0xff] %vm8313_vm0, %v4532_v1 }
  0x3f   :  { %90 = vst.msk [vmem:[#allocation2 + $0x1e8] sm:$0xff] %vm8313_vm0, %v4532_v1 }
  0x40   :  { %91 = vst.msk [vmem:[#allocation2 + $0x1f0] sm:$0xff] %vm8313_vm0, %v4532_v1 }
  0x41   :  { %92 = vst.msk [vmem:[#allocation2 + $0x1f8] sm:$0xff] %vm8313_vm0, %v4532_v1 }
  0x42   :  { %93 = vst.msk [vmem:[#allocation3] sm:$0xff] %vm8313_vm0, %v4533_v3 }
  0x43   :  { %94 = vst.msk [vmem:[#allocation3 + $0x8] sm:$0xff] %vm8313_vm0, %v4533_v3 }
  0x44   :  { %95 = vst.msk [vmem:[#allocation3 + $0x10] sm:$0xff] %vm8313_vm0, %v4533_v3 }
  0x45   :  { %96 = vst.msk [vmem:[#allocation3 + $0x18] sm:$0xff] %vm8313_vm0, %v4533_v3 }
  0x46   :  { %97 = vst.msk [vmem:[#allocation3 + $0x20] sm:$0xff] %vm8313_vm0, %v4533_v3 }
  0x47   :  { %98 = vst.msk [vmem:[#allocation3 + $0x28] sm:$0xff] %vm8313_vm0, %v4533_v3 }
  0x48   :  { %99 = vst.msk [vmem:[#allocation3 + $0x30] sm:$0xff] %vm8313_vm0, %v4533_v3 }
  0x49   :  { %100 = vst.msk [vmem:[#allocation3 + $0x38] sm:$0xff] %vm8313_vm0, %v4533_v3 }
  0x4a   :  { %101 = vst.msk [vmem:[#allocation3 + $0x40] sm:$0xff] %vm8313_vm0, %v4533_v3 }
  0x4b   :  { %102 = vst.msk [vmem:[#allocation3 + $0x48] sm:$0xff] %vm8313_vm0, %v4533_v3 }
  0x4c   :  { %103 = vst.msk [vmem:[#allocation3 + $0x50] sm:$0xff] %vm8313_vm0, %v4533_v3 }
  0x4d   :  { %104 = vst.msk [vmem:[#allocation3 + $0x58] sm:$0xff] %vm8313_vm0, %v4533_v3 }
  0x4e   :  { %105 = vst.msk [vmem:[#allocation3 + $0x60] sm:$0xff] %vm8313_vm0, %v4533_v3 }
  0x4f   :  { %106 = vst.msk [vmem:[#allocation3 + $0x68] sm:$0xff] %vm8313_vm0, %v4533_v3 }
  0x50   :  { %107 = vst.msk [vmem:[#allocation3 + $0x70] sm:$0xff] %vm8313_vm0, %v4533_v3 }
  0x51   :  { %108 = vst.msk [vmem:[#allocation3 + $0x78] sm:$0xff] %vm8313_vm0, %v4533_v3 }
  0x52   :  { %109 = vst.msk [vmem:[#allocation3 + $0x80] sm:$0xff] %vm8313_vm0, %v4533_v3 }
  0x53   :  { %110 = vst.msk [vmem:[#allocation3 + $0x88] sm:$0xff] %vm8313_vm0, %v4533_v3 }
  0x54   :  { %111 = vst.msk [vmem:[#allocation3 + $0x90] sm:$0xff] %vm8313_vm0, %v4533_v3 }
  0x55   :  { %112 = vst.msk [vmem:[#allocation3 + $0x98] sm:$0xff] %vm8313_vm0, %v4533_v3 }
  0x56   :  { %113 = vst.msk [vmem:[#allocation3 + $0xa0] sm:$0xff] %vm8313_vm0, %v4533_v3 }
  0x57   :  { %114 = vst.msk [vmem:[#allocation3 + $0xa8] sm:$0xff] %vm8313_vm0, %v4533_v3 }
  0x58   :  { %115 = vst.msk [vmem:[#allocation3 + $0xb0] sm:$0xff] %vm8313_vm0, %v4533_v3 }
  0x59   :  { %116 = vst.msk [vmem:[#allocation3 + $0xb8] sm:$0xff] %vm8313_vm0, %v4533_v3 }
  0x5a   :  { %117 = vst.msk [vmem:[#allocation3 + $0xc0] sm:$0xff] %vm8313_vm0, %v4533_v3 }
  0x5b   :  { %118 = vst.msk [vmem:[#allocation3 + $0xc8] sm:$0xff] %vm8313_vm0, %v4533_v3 }
  0x5c   :  { %119 = vst.msk [vmem:[#allocation3 + $0xd0] sm:$0xff] %vm8313_vm0, %v4533_v3 }
  0x5d   :  { %120 = vst.msk [vmem:[#allocation3 + $0xd8] sm:$0xff] %vm8313_vm0, %v4533_v3 }
  0x5e   :  { %121 = vst.msk [vmem:[#allocation3 + $0xe0] sm:$0xff] %vm8313_vm0, %v4533_v3 }
  0x5f   :  { %122 = vst.msk [vmem:[#allocation3 + $0xe8] sm:$0xff] %vm8313_vm0, %v4533_v3 }
  0x60   :  { %123 = vst.msk [vmem:[#allocation3 + $0xf0] sm:$0xff] %vm8313_vm0, %v4533_v3 }
  0x61   :  { %124 = vst.msk [vmem:[#allocation3 + $0xf8] sm:$0xff] %vm8313_vm0, %v4533_v3 }
  0x62   :  { %125 = vst.msk [vmem:[#allocation3 + $0x100] sm:$0xff] %vm8313_vm0, %v4533_v3 }
  0x63   :  { %126 = vst.msk [vmem:[#allocation3 + $0x108] sm:$0xff] %vm8313_vm0, %v4533_v3 }
  0x64   :  { %127 = vst.msk [vmem:[#allocation3 + $0x110] sm:$0xff] %vm8313_vm0, %v4533_v3 }
  0x65   :  { %128 = vst.msk [vmem:[#allocation3 + $0x118] sm:$0xff] %vm8313_vm0, %v4533_v3 }
  0x66   :  { %129 = vst.msk [vmem:[#allocation3 + $0x120] sm:$0xff] %vm8313_vm0, %v4533_v3 }
  0x67   :  { %130 = vst.msk [vmem:[#allocation3 + $0x128] sm:$0xff] %vm8313_vm0, %v4533_v3 }
  0x68   :  { %131 = vst.msk [vmem:[#allocation3 + $0x130] sm:$0xff] %vm8313_vm0, %v4533_v3 }
  0x69   :  { %132 = vst.msk [vmem:[#allocation3 + $0x138] sm:$0xff] %vm8313_vm0, %v4533_v3 }
  0x6a   :  { %133 = vst.msk [vmem:[#allocation3 + $0x140] sm:$0xff] %vm8313_vm0, %v4533_v3 }
  0x6b   :  { %134 = vst.msk [vmem:[#allocation3 + $0x148] sm:$0xff] %vm8313_vm0, %v4533_v3 }
  0x6c   :  { %135 = vst.msk [vmem:[#allocation3 + $0x150] sm:$0xff] %vm8313_vm0, %v4533_v3 }
  0x6d   :  { %136 = vst.msk [vmem:[#allocation3 + $0x158] sm:$0xff] %vm8313_vm0, %v4533_v3 }
  0x6e   :  { %137 = vst.msk [vmem:[#allocation3 + $0x160] sm:$0xff] %vm8313_vm0, %v4533_v3 }
  0x6f   :  { %138 = vst.msk [vmem:[#allocation3 + $0x168] sm:$0xff] %vm8313_vm0, %v4533_v3 }
  0x70   :  { %139 = vst.msk [vmem:[#allocation3 + $0x170] sm:$0xff] %vm8313_vm0, %v4533_v3 }
  0x71   :  { %140 = vst.msk [vmem:[#allocation3 + $0x178] sm:$0xff] %vm8313_vm0, %v4533_v3 }
  0x72   :  { %141 = vst.msk [vmem:[#allocation3 + $0x180] sm:$0xff] %vm8313_vm0, %v4533_v3 }
  0x73   :  { %142 = vst.msk [vmem:[#allocation3 + $0x188] sm:$0xff] %vm8313_vm0, %v4533_v3 }
  0x74   :  { %143 = vst.msk [vmem:[#allocation3 + $0x190] sm:$0xff] %vm8313_vm0, %v4533_v3 }
  0x75   :  { %144 = vst.msk [vmem:[#allocation3 + $0x198] sm:$0xff] %vm8313_vm0, %v4533_v3 }
  0x76   :  { %145 = vst.msk [vmem:[#allocation3 + $0x1a0] sm:$0xff] %vm8313_vm0, %v4533_v3 }
  0x77   :  { %146 = vst.msk [vmem:[#allocation3 + $0x1a8] sm:$0xff] %vm8313_vm0, %v4533_v3 }
  0x78   :  { %147 = vst.msk [vmem:[#allocation3 + $0x1b0] sm:$0xff] %vm8313_vm0, %v4533_v3 }
  0x79   :  { %148 = vst.msk [vmem:[#allocation3 + $0x1b8] sm:$0xff] %vm8313_vm0, %v4533_v3 }
  0x7a   :  { %149 = vst.msk [vmem:[#allocation3 + $0x1c0] sm:$0xff] %vm8313_vm0, %v4533_v3 }
  0x7b   :  { %150 = vst.msk [vmem:[#allocation3 + $0x1c8] sm:$0xff] %vm8313_vm0, %v4533_v3 }
  0x7c   :  { %151 = vst.msk [vmem:[#allocation3 + $0x1d0] sm:$0xff] %vm8313_vm0, %v4533_v3 }
  0x7d   :  { %152 = vst.msk [vmem:[#allocation3 + $0x1d8] sm:$0xff] %vm8313_vm0, %v4533_v3 }
  0x7e   :  { %153 = vst.msk [vmem:[#allocation3 + $0x1e0] sm:$0xff] %vm8313_vm0, %v4533_v3 }
  0x7f   :  { %154 = vst.msk [vmem:[#allocation3 + $0x1e8] sm:$0xff] %vm8313_vm0, %v4533_v3 }
  0x80   :  { %155 = vst.msk [vmem:[#allocation3 + $0x1f0] sm:$0xff] %vm8313_vm0, %v4533_v3 }
  0x81   :  { %156 = vst.msk [vmem:[#allocation3 + $0x1f8] sm:$0xff] %vm8313_vm0, %v4533_v3 }
  0x82   :  { %157 = vst [vmem:[#allocation4 + $0x30] sm:$0xff] %v4533_v3 }
  0x83   :  { %158 = vst [vmem:[#allocation4] sm:$0xff] %v4533_v3 }
  0x84   :  { %159 = vst [vmem:[#allocation4 + $0x58] sm:$0xff] %v4533_v3 }
  0x85   :  { %160 = vst [vmem:[#allocation4 + $0x18] sm:$0xff] %v4533_v3 }
  0x86   :  { %161 = vst [vmem:[#allocation4 + $0x50] sm:$0xff] %v4533_v3 }
  0x87   :  { %162 = vst [vmem:[#allocation4 + $0x68] sm:$0xff] %v4533_v3 }
  0x88   :  { %163 = vst [vmem:[#allocation4 + $0x8] sm:$0xff] %v4533_v3 }
  0x89   :  { %164 = vst [vmem:[#allocation4 + $0x48] sm:$0xff] %v4533_v3 }
  0x8a   :  { %165 = vst [vmem:[#allocation4 + $0x40] sm:$0xff] %v4533_v3 }
  0x8b   :  { %166 = vst [vmem:[#allocation4 + $0x20] sm:$0xff] %v4533_v3 }
  0x8c   :  { %167 = vst [vmem:[#allocation4 + $0x10] sm:$0xff] %v4533_v3 }
  0x8d   :  { %168 = vst [vmem:[#allocation4 + $0x38] sm:$0xff] %v4533_v3  ;;  %180 = sbr.rel (%p3976_p0) target bundleno = 1503 (0x5df), region = 25 }
  0x8e   :  { %169 = vst [vmem:[#allocation4 + $0x60] sm:$0xff] %v4533_v3 }
  0x8f   :  { %170 = vst [vmem:[#allocation4 + $0x70] sm:$0xff] %v4533_v3 }
  0x90   :  { %171 = vst [vmem:[#allocation4 + $0x78] sm:$0xff] %v4533_v3 }
  0x91   :  { %172 = vst [vmem:[#allocation4 + $0x28] sm:$0xff] %v4533_v3 }
  0x92   :  { %v193_v4 = vld [vmem:[%s8307_s2 + $0x20] sm:$0xff]  ;;  %v191_v5 = vld [vmem:[%s8307_s2 + $0x10] sm:$0xff]  ;;  %v4534_v7 = vmov 0   ;;  %v194_v8 = vld [vmem:[%s8307_s2 + $0x28] sm:$0xff] }
  0x93   :  { %v189_v6 = vld [vmem:[%s8307_s2] sm:$0xff]  ;;  %4114 = vset.pattern.permute.xlu2 %v4534_v7  ;;  %4113 = vset.pattern.permute.xlu1 %v4534_v7  ;;  %v192_v9 = vld [vmem:[%s8307_s2 + $0x18] sm:$0xff]  ;;  %v190_v10 = vld [vmem:[%s8307_s2 + $0x8] sm:$0xff] }
  0x94   :  { %4112 = vset.pattern.permute.xlu0 %v4534_v7  ;;  %279 = vperm.xlu2 %4114, %v193_v4   ;;  %v197_v11 = vld [vmem:[%s8307_s2 + $0x40] sm:$0xff]  ;;  %v196_v12 = vld [vmem:[%s8307_s2 + $0x38] sm:$0xff]  ;;  %v195_v13 = vld [vmem:[%s8307_s2 + $0x30] sm:$0xff] }
  0x95   :  { %269 = vperm.xlu1 %4113, %v191_v5   ;;  %259 = vperm.xlu0 %4112, %v189_v6   ;;  %v200_v14 = vld [vmem:[%s8307_s2 + $0x58] sm:$0xff]  ;;  %v199_v15 = vld [vmem:[%s8307_s2 + $0x50] sm:$0xff]  ;;  %v198_v16 = vld [vmem:[%s8307_s2 + $0x48] sm:$0xff] }
  0x96   :  { %v203_v17 = vld [vmem:[%s8307_s2 + $0x70] sm:$0xff]  ;;  %v202_v18 = vld [vmem:[%s8307_s2 + $0x68] sm:$0xff]  ;;  %v201_v19 = vld [vmem:[%s8307_s2 + $0x60] sm:$0xff] }
  0x97   :  { %v206_v20 = vld [vmem:[%s8307_s2 + $0x88] sm:$0xff]  ;;  %v205_v21 = vld [vmem:[%s8307_s2 + $0x80] sm:$0xff]  ;;  %v204_v22 = vld [vmem:[%s8307_s2 + $0x78] sm:$0xff] }
  0x98   :  { %v209_v23 = vld [vmem:[%s8307_s2 + $0xa0] sm:$0xff]  ;;  %v208_v24 = vld [vmem:[%s8307_s2 + $0x98] sm:$0xff]  ;;  %v207_v25 = vld [vmem:[%s8307_s2 + $0x90] sm:$0xff] }
  0x99   :  { %v212_v26 = vld [vmem:[%s8307_s2 + $0xb8] sm:$0xff]  ;;  %v211_v27 = vld [vmem:[%s8307_s2 + $0xb0] sm:$0xff]  ;;  %v210_v28 = vld [vmem:[%s8307_s2 + $0xa8] sm:$0xff] }
  0x9a   :  { %v215_v29 = vld [vmem:[%s8307_s2 + $0xd0] sm:$0xff]  ;;  %v214_v30 = vld [vmem:[%s8307_s2 + $0xc8] sm:$0xff]  ;;  %v213_v31 = vld [vmem:[%s8307_s2 + $0xc0] sm:$0xff] }
  0x9b   :  { %v218_v32 = vld [vmem:[%s8307_s2 + $0xe8] sm:$0xff]  ;;  %v217_v33 = vld [vmem:[%s8307_s2 + $0xe0] sm:$0xff]  ;;  %v216_v34 = vld [vmem:[%s8307_s2 + $0xd8] sm:$0xff] }
  0x9c   :  { %284 = vperm.xlu2 %4114, %v194_v8   ;;  %v221_v35 = vld [vmem:[%s8307_s2 + $0x100] sm:$0xff]  ;;  %v220_v36 = vld [vmem:[%s8307_s2 + $0xf8] sm:$0xff]  ;;  %v219_v37 = vld [vmem:[%s8307_s2 + $0xf0] sm:$0xff] }
  0x9d   :  { %274 = vperm.xlu1 %4113, %v192_v9   ;;  %264 = vperm.xlu0 %4112, %v190_v10   ;;  %v224_v38 = vld [vmem:[%s8307_s2 + $0x118] sm:$0xff]  ;;  %v223_v39 = vld [vmem:[%s8307_s2 + $0x110] sm:$0xff]  ;;  %v222_v40 = vld [vmem:[%s8307_s2 + $0x108] sm:$0xff] }
  0x9e   :  { %v227_v41 = vld [vmem:[%s8307_s2 + $0x130] sm:$0xff]  ;;  %v226_v42 = vld [vmem:[%s8307_s2 + $0x128] sm:$0xff]  ;;  %v225_v43 = vld [vmem:[%s8307_s2 + $0x120] sm:$0xff] }
  0x9f   :  { %v230_v44 = vld [vmem:[%s8307_s2 + $0x148] sm:$0xff]  ;;  %v229_v45 = vld [vmem:[%s8307_s2 + $0x140] sm:$0xff]  ;;  %v228_v46 = vld [vmem:[%s8307_s2 + $0x138] sm:$0xff] }
  0xa0   :  { %v233_v48 = vld [vmem:[%s8307_s2 + $0x160] sm:$0xff]  ;;  %v232_v49 = vld [vmem:[%s8307_s2 + $0x158] sm:$0xff]  ;;  %v231_v50 = vld [vmem:[%s8307_s2 + $0x150] sm:$0xff] }
  0xa1   :  { %v236_v53 = vld [vmem:[%s8307_s2 + $0x178] sm:$0xff]  ;;  %v235_v55 = vld [vmem:[%s8307_s2 + $0x170] sm:$0xff]  ;;  %v234_v56 = vld [vmem:[%s8307_s2 + $0x168] sm:$0xff] }
  0xa2   :  { %v239_v59 = vld [vmem:[%s8307_s2 + $0x190] sm:$0xff]  ;;  %v238_v60 = vld [vmem:[%s8307_s2 + $0x188] sm:$0xff]  ;;  %v237_v61 = vld [vmem:[%s8307_s2 + $0x180] sm:$0xff] }
  0xa3   :  { %v242_v1 = vld [vmem:[%s8307_s2 + $0x1a8] sm:$0xff]  ;;  %v241_v3 = vld [vmem:[%s8307_s2 + $0x1a0] sm:$0xff]  ;;  %v240_v4 = vld [vmem:[%s8307_s2 + $0x198] sm:$0xff] }
  0xa4   :  { %299 = vperm.xlu2 %4114, %v197_v11   ;;  %v245_v9 = vld [vmem:[%s8307_s2 + $0x1c0] sm:$0xff]  ;;  %v244_v10 = vld [vmem:[%s8307_s2 + $0x1b8] sm:$0xff]  ;;  %v243_v11 = vld [vmem:[%s8307_s2 + $0x1b0] sm:$0xff] }
  0xa5   :  { %294 = vperm.xlu1 %4113, %v196_v12   ;;  %289 = vperm.xlu0 %4112, %v195_v13  }
  0xac   :  { %314 = vperm.xlu2 %4114, %v200_v14   ;;  %v248_v14 = vld [vmem:[%s8307_s2 + $0x1d8] sm:$0xff] }
  0xad   :  { %309 = vperm.xlu1 %4113, %v199_v15   ;;  %304 = vperm.xlu0 %4112, %v198_v16   ;;  %v247_v16 = vld [vmem:[%s8307_s2 + $0x1d0] sm:$0xff] }
  0xb4   :  { %329 = vperm.xlu2 %4114, %v203_v17   ;;  %v246_v17 = vld [vmem:[%s8307_s2 + $0x1c8] sm:$0xff] }
  0xb5   :  { %324 = vperm.xlu1 %4113, %v202_v18   ;;  %319 = vperm.xlu0 %4112, %v201_v19   ;;  %v251_v18 = vld [vmem:[%s8307_s2 + $0x1f0] sm:$0xff] }
  0xbc   :  { %344 = vperm.xlu2 %4114, %v206_v20  }
  0xbd   :  { %339 = vperm.xlu1 %4113, %v205_v21   ;;  %334 = vperm.xlu0 %4112, %v204_v22   ;;  %v250_v21 = vld [vmem:[%s8307_s2 + $0x1e8] sm:$0xff]  ;;  %v249_v22 = vld [vmem:[%s8307_s2 + $0x1e0] sm:$0xff] }
  0xc4   :  { %359 = vperm.xlu2 %4114, %v209_v23  }
  0xc5   :  { %354 = vperm.xlu1 %4113, %v208_v24   ;;  %349 = vperm.xlu0 %4112, %v207_v25   ;;  %v182_v24 = vld [vmem:[%s8306_s1 + $0x8] sm:$0xff]  ;;  %v252_v25 = vld [vmem:[%s8307_s2 + $0x1f8] sm:$0xff] }
  0xc6   :  { %vm186_vm1 = vnez %v182_v24 }
  0xcc   :  { %374 = vperm.xlu2 %4114, %v212_v26  }
  0xcd   :  { %369 = vperm.xlu1 %4113, %v211_v27   ;;  %364 = vperm.xlu0 %4112, %v210_v28   ;;  %v181_v28 = vld [vmem:[%s8306_s1] sm:$0xff] }
  0xce   :  { %vm185_vm2 = vnez %v181_v28 }
  0xd4   :  { %389 = vperm.xlu2 %4114, %v215_v29  }
  0xd5   :  { %384 = vperm.xlu1 %4113, %v214_v30   ;;  %379 = vperm.xlu0 %4112, %v213_v31   ;;  %v846_v30 = vsel %vm186_vm1, 16843009, %v4534_v7  ;;  %v845_v31 = vsel %vm185_vm2, 16843009, %v4534_v7 }
  0xdc   :  { %404 = vperm.xlu2 %4114, %v218_v32   ;;  %v853_v32 = vunpack.c.0.s8 %v846_v30 }
  0xdd   :  { %399 = vperm.xlu1 %4113, %v217_v33   ;;  %394 = vperm.xlu0 %4112, %v216_v34   ;;  %v850_v33 = vunpack.c.1.s8 %v845_v31  ;;  %v183_v34 = vld [vmem:[%s8306_s1 + $0x10] sm:$0xff] }
  0xde   :  { %vm187_vm3 = vnez %v183_v34  ;;  %v8563_v34 = vmov 0 }
  0xe4   :  { %419 = vperm.xlu2 %4114, %v221_v35  }
  0xe5   :  { %414 = vperm.xlu1 %4113, %v220_v36   ;;  %409 = vperm.xlu0 %4112, %v219_v37   ;;  %v873_v37 = vpack.c.b16 %v853_v32, %v853_v32 }
  0xec   :  { %434 = vperm.xlu2 %4114, %v224_v38   ;;  %v849_v38 = vunpack.c.0.s8 %v845_v31 }
  0xed   :  { %429 = vperm.xlu1 %4113, %v223_v39   ;;  %424 = vperm.xlu0 %4112, %v222_v40   ;;  %v854_v40 = vunpack.c.1.s8 %v846_v30 }
  0xee   :  { %v4975_v47 = vpop.permute.xlu2 %279 }
  0xf4   :  { %449 = vperm.xlu2 %4114, %v227_v41   ;;  %v867_v41 = vpack.c.b16 %v850_v33, %v850_v33 }
  0xf5   :  { %444 = vperm.xlu1 %4113, %v226_v42   ;;  %439 = vperm.xlu0 %4112, %v225_v43   ;;  %v874_v42 = vpack.c.b8 %v873_v37, %v873_v37  ;;  %v865_v43 = vpack.c.b16 %v849_v38, %v849_v38 }
  0xf6   :  { %v4993_v54 = vpop.permute.xlu2 %284 }
  0xf7   :  { %vm901_vm4 = vnez %v874_v42 }
  0xfc   :  { %464 = vperm.xlu2 %4114, %v230_v44   ;;  %v5101_v44 = vsel %vm187_vm3, 16843009, %v4534_v7 }
  0xfd   :  { %459 = vperm.xlu1 %4113, %v229_v45   ;;  %454 = vperm.xlu0 %4112, %v228_v46   ;;  %v875_v45 = vpack.c.b16 %v854_v40, %v854_v40  ;;  %v868_v46 = vpack.c.b8 %v867_v41, %v867_v41 }
  0xfe   :  { %v5014_v62 = vpop.permute.xlu2 %299 }
  0xff   :  { %vm898_vm5 = vnez %v868_v46 }
 0x104   :  { %479 = vperm.xlu2 %4114, %v233_v48   ;;  %v852_v48 = vunpack.c.3.s8 %v845_v31 }
 0x105   :  { %474 = vperm.xlu1 %4113, %v232_v49   ;;  %469 = vperm.xlu0 %4112, %v231_v50   ;;  %v857_v49 = vunpack.c.0.s8 %v5101_v44  ;;  %v5107_v50 = vld [vmem:[%s8308_s3] ss:$0 sm:$0xff] }
 0x106   :  { %v5029_v5 = vpop.permute.xlu2 %314 }
 0x107   :  { %v4986_v51 = vpop.permute.xlu1 %269  ;;  %v4988_v52 = vpop.permute.xlu0 %259 }
 0x108   :  { %v591_v46 = vadd.f32 %v5107_v50, %v4986_v51  ;;  %v184_v51 = vld [vmem:[%s8306_s1 + $0x18] sm:$0xff] }
 0x109   :  { %vm188_vm3 = vnez %v184_v51 }
 0x10c   :  { %494 = vperm.xlu2 %4114, %v236_v53   ;;  %v866_v53 = vpack.c.b8 %v865_v43, %v865_v43 }
 0x10d   :  { %489 = vperm.xlu1 %4113, %v235_v55   ;;  %484 = vperm.xlu0 %4112, %v234_v56   ;;  %v851_v55 = vunpack.c.2.s8 %v845_v31 }
 0x10e   :  { %v5044_v12 = vpop.permute.xlu2 %329  ;;  %vm897_vm6 = vnez %v866_v53 }
 0x10f   :  { %v5001_v57 = vpop.permute.xlu1 %274  ;;  %v5003_v58 = vpop.permute.xlu0 %264  ;;  %v913_v24 = vsel %vm897_vm6, 16843009, %v4534_v7 }
 0x110   :  { %v592_v33 = vadd.f32 %v5107_v50, %v5001_v57  ;;  %v860_v57 = vunpack.c.3.s8 %v5101_v44 }
 0x112   :  { %vm656_vm2 = vcmp.ge.f32.partialorder %v592_v33, 0.0 }
 0x114   :  { %509 = vperm.xlu2 %4114, %v239_v59  }
 0x115   :  { %504 = vperm.xlu1 %4113, %v238_v60   ;;  %499 = vperm.xlu0 %4112, %v237_v61   ;;  %v876_v60 = vpack.c.b8 %v875_v45, %v875_v45  ;;  %v590_v61 = vadd.f32 %v5107_v50, %v5003_v58  ;;  %v855_v58 = vunpack.c.2.s8 %v846_v30 }
 0x116   :  { %v5062_v19 = vpop.permute.xlu2 %344 }
 0x117   :  { %v5016_v63 = vpop.permute.xlu1 %294  ;;  %v5018_v0 = vpop.permute.xlu0 %289  ;;  %vm902_vm7 = vnez %v876_v60  ;;  %vm654_vm8 = vcmp.ge.f32.partialorder %v590_v61, 0.0  ;;  %v877_v38 = vpack.c.b16 %v855_v58, %v855_v58  ;;  %v594_v58 = vadd.f32 %v5107_v50, %v4993_v54 }
 0x118   :  { %v918_v32 = vsel %vm902_vm7, 16843009, %v4534_v7 }
 0x119   :  { %v934_v43 = vunpack.c.0.s8 %v918_v32 }
 0x11c   :  { %524 = vperm.xlu2 %4114, %v242_v1   ;;  %v871_v1 = vpack.c.b16 %v852_v48, %v852_v48 }
 0x11d   :  { %519 = vperm.xlu1 %4113, %v241_v3   ;;  %514 = vperm.xlu0 %4112, %v240_v4   ;;  %v917_v3 = vsel %vm901_vm4, 16843009, %v4534_v7  ;;  %vm655_vm4 = vcmp.ge.f32.partialorder %v591_v46, 0.0 }
 0x11e   :  { %v5080_v26 = vpop.permute.xlu2 %359 }
 0x11f   :  { %v5031_v6 = vpop.permute.xlu0 %304  ;;  %v5033_v8 = vpop.permute.xlu1 %309 }
 0x120   :  { %v599_v54 = vadd.f32 %v5107_v50, %v5033_v8 }
 0x124   :  { %539 = vperm.xlu2 %4114, %v245_v9   ;;  %v881_v9 = vpack.c.b16 %v857_v49, %v857_v49 }
 0x125   :  { %534 = vperm.xlu1 %4113, %v244_v10   ;;  %529 = vperm.xlu0 %4112, %v243_v11   ;;  %v589_v10 = vadd.f32 %v5107_v50, %v4988_v52  ;;  %v869_v11 = vpack.c.b16 %v851_v55, %v851_v55 }
 0x126   :  { %v5094_v35 = vpop.permute.xlu2 %374 }
 0x127   :  { %v5046_v13 = vpop.permute.xlu0 %319  ;;  %v5051_v15 = vpop.permute.xlu1 %324  ;;  %v717_v31 = vmul.f32 0.2, %v589_v10  ;;  %v870_v52 = vpack.c.b8 %v869_v11, %v869_v11  ;;  %vm653_vm9 = vcmp.ge.f32.partialorder %v589_v10, 0.0 }
 0x129   :  { %v781_v49 = vsel %vm653_vm9, %v589_v10, %v717_v31  ;;  %vm899_vm14 = vnez %v870_v52  ;;  %v858_v10 = vunpack.c.1.s8 %v5101_v44  ;;  %vm658_vm9 = vcmp.ge.f32.partialorder %v594_v58, 0.0 }
 0x12b   :  { %v883_v52 = vpack.c.b16 %v858_v10, %v858_v10 }
 0x12c   :  { %554 = vperm.xlu2 %4114, %v248_v14   ;;  %v914_v14 = vsel %vm898_vm5, 16843009, %v4534_v7  ;;  %vm5176_vm5 = vcmp.ne.s32.totalorder %v934_v43, 0 }
 0x12d   :  { %549 = vperm.xlu1 %4113, %v247_v16   ;;  %544 = vperm.xlu0 %4112, %v246_v17   ;;  %v933_v16 = vunpack.c.0.s8 %v917_v3  ;;  %v856_v17 = vunpack.c.3.s8 %v846_v30  ;;  %v930_v28 = vunpack.c.0.s8 %v914_v14  ;;  %v720_v3 = vmul.f32 0.2, %v592_v33 }
 0x12e   :  { %v5109_v56 = vpop.permute.xlu2 %389  ;;  %v915_v14 = vsel %vm899_vm14, 16843009, %v4534_v7 }
 0x12f   :  { %v5064_v20 = vpop.permute.xlu0 %334  ;;  %v5072_v23 = vpop.permute.xlu1 %339  ;;  %vm5127_vm10 = vcmp.ne.s32.totalorder %v933_v16, 0  ;;  %v879_v30 = vpack.c.b16 %v856_v17, %v856_v17  ;;  %vm5142_vm13 = vcmp.ne.s32.totalorder %v930_v28, 0  ;;  %v859_v16 = vunpack.c.2.s8 %v5101_v44 }
 0x130   :  { %v8564_v34 = vsel %vm5127_vm10, 4294967295, %v8563_v34  ;;  %v784_v28 = vsel %vm656_vm2, %v592_v33, %v720_v3  ;;  %v931_v31 = vunpack.c.0.s8 %v915_v14  ;;  %v8571_v44 = vmov 0 }
 0x131   :  { %v8572_v44 = vsel %vm5176_vm5, 4294967295, %v8571_v44  ;;  %v885_v32 = vpack.c.b16 %v859_v16, %v859_v16  ;;  %v596_v33 = vadd.f32 %v5107_v50, %v5016_v63 }
 0x133   :  { %vm660_vm14 = vcmp.ge.f32.partialorder %v596_v33, 0.0 }
 0x134   :  { %569 = vperm.xlu2 %4114, %v251_v18   ;;  %v718_v18 = vmul.f32 0.2, %v590_v61 }
 0x135   :  { %564 = vperm.xlu1 %4113, %v250_v21   ;;  %559 = vperm.xlu0 %4112, %v249_v22   ;;  %v872_v21 = vpack.c.b8 %v871_v1, %v871_v1  ;;  %v593_v22 = vadd.f32 %v5107_v50, %v4975_v47  ;;  %v929_v47 = vunpack.c.0.s8 %v913_v24 }
 0x136   :  { %v782_v37 = vsel %vm654_vm8, %v590_v61, %v718_v18  ;;  %v5131_v40 = vpop.permute.xlu2 %404  ;;  %v880_v61 = vpack.c.b8 %v879_v30, %v879_v30  ;;  %v719_v18 = vmul.f32 0.2, %v591_v46  ;;  %v5189_v30 = vsel %vm188_vm3, 16843009, %v4534_v7 }
 0x137   :  { %v5082_v27 = vpop.permute.xlu0 %349  ;;  %v5087_v29 = vpop.permute.xlu1 %354  ;;  %vm900_vm11 = vnez %v872_v21  ;;  %v721_v42 = vmul.f32 0.2, %v593_v22  ;;  %v5150_v55 = vsel %vm5142_vm13, %v782_v37, -1e+30  ;;  %vm657_vm15 = vcmp.ge.f32.partialorder %v593_v22, 0.0 }
 0x138   :  { %v916_v60 = vsel %vm900_vm11, 16843009, %v4534_v7  ;;  %vm5157_vm1 = vcmp.ne.s32.totalorder %v929_v47, 0  ;;  %vm5184_vm7 = vnez %v880_v61  ;;  %v595_v37 = vadd.f32 %v5107_v50, %v5018_v0 }
 0x139   :  { %v5164_v11 = vsel %vm5157_vm1, %v781_v49, -1e+30  ;;  %v932_v17 = vunpack.c.0.s8 %v916_v60  ;;  %v785_v21 = vsel %vm657_vm15, %v593_v22, %v721_v42  ;;  %v8575_v47 = vmov 0 }
 0x13a   :  { %v5182_v22 = vsel %vm5127_vm10, %v785_v21, -1e+30  ;;  %vm5209_vm11 = vcmp.ne.s32.totalorder %v931_v31, 0  ;;  %v722_v49 = vmul.f32 0.2, %v594_v58  ;;  %v861_v60 = vunpack.c.0.s8 %v5189_v30 }
 0x13b   :  { %vm5195_vm8 = vcmp.ne.s32.totalorder %v932_v17, 0  ;;  %v920_v3 = vsel %vm5184_vm7, 16843009, %v4534_v7  ;;  %v862_v10 = vunpack.c.1.s8 %v5189_v30  ;;  %v723_v14 = vmul.f32 0.2, %v595_v37 }
 0x13c   :  { %v8576_v47 = vsel %vm5195_vm8, 4294967295, %v8575_v47  ;;  %v5205_v45 = vsel %vm5195_vm8, %v784_v28, -1e+30  ;;  %v724_v17 = vmul.f32 0.2, %v596_v33  ;;  %v597_v21 = vadd.f32 %v5107_v50, %v5014_v62 }
 0x13d   :  { %574 = vperm.xlu0 %4112, %v252_v25   ;;  %v882_v25 = vpack.c.b8 %v881_v9, %v881_v9  ;;  %v878_v9 = vpack.c.b8 %v877_v38, %v877_v38  ;;  %v783_v38 = vsel %vm655_vm4, %v591_v46, %v719_v18  ;;  %v884_v46 = vpack.c.b8 %v883_v52, %v883_v52 }
 0x13e   :  { %v5199_v42 = vpop.permute.xlu2 %419  ;;  %v5218_v51 = vsel %vm5209_vm11, %v783_v38, -1e+30  ;;  %v786_v28 = vsel %vm658_vm9, %v594_v58, %v722_v49  ;;  %v936_v31 = vunpack.c.0.s8 %v920_v3  ;;  %v889_v52 = vpack.c.b16 %v861_v60, %v861_v60 }
 0x13f   :  { %v5096_v36 = vpop.permute.xlu0 %364  ;;  %v5098_v39 = vpop.permute.xlu1 %369  ;;  %vm5135_vm12 = vnez %v882_v25  ;;  %v887_v25 = vpack.c.b16 %v860_v57, %v860_v57  ;;  %vm903_vm6 = vnez %v878_v9  ;;  %v886_v9 = vpack.c.b8 %v885_v32, %v885_v32 }
 0x140   :  { %v5174_v24 = vsel %vm5135_vm12, 16843009, %v4534_v7  ;;  %v919_v57 = vsel %vm903_vm6, 16843009, %v4534_v7  ;;  %vm659_vm12 = vcmp.ge.f32.partialorder %v595_v37, 0.0  ;;  %vm906_vm15 = vnez %v884_v46 }
 0x141   :  { %v888_v63 = vpack.c.b8 %v887_v25, %v887_v25  ;;  %v935_v16 = vunpack.c.0.s8 %v919_v57  ;;  %v937_v18 = vunpack.c.0.s8 %v5174_v24  ;;  %v863_v25 = vunpack.c.2.s8 %v5189_v30 }
 0x142   :  { %vm5233_vm2 = vnez %v886_v9  ;;  %v891_v62 = vpack.c.b16 %v862_v10, %v862_v10  ;;  %v598_v38 = vadd.f32 %v5107_v50, %v5031_v6  ;;  %v787_v57 = vsel %vm659_vm12, %v595_v37, %v723_v14 }
 0x143   :  { %vm5237_vm3 = vnez %v888_v63  ;;  %vm5243_vm4 = vcmp.ne.s32.totalorder %v935_v16, 0  ;;  %v8583_v58 = vmov 0  ;;  %v788_v49 = vsel %vm660_vm14, %v596_v33, %v724_v17 }
 0x144   :  { %v8584_v58 = vsel %vm5243_vm4, 4294967295, %v8583_v58  ;;  %v5249_v8 = vsel %vm5176_vm5, %v786_v28, -1e+30  ;;  %v725_v46 = vmul.f32 0.2, %v597_v21  ;;  %v893_v60 = vpack.c.b16 %v863_v25, %v863_v25 }
 0x145   :  { %v922_v63 = vsel %vm906_vm15, 16843009, %v4534_v7  ;;  %vm5253_vm6 = vcmp.ne.s32.totalorder %v936_v31, 0  ;;  %vm661_vm7 = vcmp.ge.f32.partialorder %v597_v21, 0.0  ;;  %v890_v6 = vpack.c.b8 %v889_v52, %v889_v52 }
 0x146   :  { %v864_v37 = vunpack.c.3.s8 %v5189_v30  ;;  %v5258_v9 = vpop.permute.xlu2 %434  ;;  %v5264_v10 = vsel %vm5243_vm4, %v787_v57, -1e+30  ;;  %v5268_v14 = vsel %vm5253_vm6, %v788_v49, -1e+30  ;;  %v923_v16 = vsel %vm5233_vm2, 16843009, %v4534_v7 }
 0x147   :  { %v5111_v59 = vpop.permute.xlu0 %379  ;;  %v5116_v4 = vpop.permute.xlu1 %384  ;;  %8587 = vst [vmem:[#allocation11_spill] sm:$0xff] %v5264_v10  ;;  %v892_v17 = vpack.c.b8 %v891_v62, %v891_v62  ;;  %vm5275_vm9 = vcmp.ne.s32.totalorder %v937_v18, 0  ;;  %v8589_v30 = vmov 0  ;;  %v726_v25 = vmul.f32 0.2, %v598_v38 }
 0x148   :  { %8588 = vst [vmem:[#allocation12_spill] sm:$0xff] %v5268_v14  ;;  %v8590_v30 = vsel %vm5275_vm9, 4294967295, %v8589_v30  ;;  %v938_v28 = vunpack.c.0.s8 %v922_v63  ;;  %v727_v31 = vmul.f32 0.2, %v599_v54  ;;  %v789_v57 = vsel %vm661_vm7, %v597_v21, %v725_v46 }
 0x149   :  { %8591 = vst [vmem:[#allocation13_spill] sm:$0xff] %v8590_v30  ;;  %vm662_vm12 = vcmp.ge.f32.partialorder %v598_v38, 0.0  ;;  %vm663_vm14 = vcmp.ge.f32.partialorder %v599_v54, 0.0  ;;  %v924_v32 = vsel %vm5237_vm3, 16843009, %v4534_v7  ;;  %v600_v62 = vadd.f32 %v5107_v50, %v5029_v5 }
 0x14a   :  { %v939_v18 = vunpack.c.0.s8 %v923_v16  ;;  %vm909_vm15 = vnez %v890_v6  ;;  %v895_v49 = vpack.c.b16 %v864_v37, %v864_v37  ;;  %v602_v63 = vadd.f32 %v5107_v50, %v5051_v15 }
 0x14b   :  { %vm5289_vm2 = vnez %v892_v17  ;;  %v894_v21 = vpack.c.b8 %v893_v60, %v893_v60  ;;  %v601_v46 = vadd.f32 %v5107_v50, %v5046_v13  ;;  %vm5295_vm7 = vcmp.ne.s32.totalorder %v938_v28, 0 }
 0x14c   :  { %v8594_v24 = vmov 0  ;;  %v791_v5 = vsel %vm663_vm14, %v599_v54, %v727_v31  ;;  %v5301_v6 = vsel %vm5275_vm9, %v789_v57, -1e+30  ;;  %v940_v37 = vunpack.c.0.s8 %v924_v32 }
 0x14d   :  { %v8595_v24 = vsel %vm5295_vm7, 4294967295, %v8594_v24  ;;  %8597 = vst [vmem:[#allocation15_spill] sm:$0xff] %v5301_v6  ;;  %v925_v15 = vsel %vm909_vm15, 16843009, %v4534_v7  ;;  %vm5305_vm3 = vcmp.ne.s32.totalorder %v939_v18, 0  ;;  %v8598_v60 = vmov 0 }
 0x14e   :  { %8596 = vst [vmem:[#allocation14_spill] sm:$0xff] %v8595_v24  ;;  %v8599_v60 = vsel %vm5305_vm3, 4294967295, %v8598_v60  ;;  %v728_v13 = vmul.f32 0.2, %v600_v62  ;;  %v5315_v54 = vsel %vm5305_vm3, %v791_v5, -1e+30  ;;  %v941_v28 = vunpack.c.0.s8 %v925_v15  ;;  %v5322_v57 = vpop.permute.xlu2 %449 }
 0x14f   :  { %v5133_v41 = vpop.permute.xlu0 %394  ;;  %v5146_v53 = vpop.permute.xlu1 %399  ;;  %8600 = vst [vmem:[#allocation16_spill] sm:$0xff] %v8599_v60  ;;  %v926_v17 = vsel %vm5289_vm2, 16843009, %v4534_v7  ;;  %v730_v31 = vmul.f32 0.2, %v602_v63  ;;  %vm5326_vm14 = vcmp.ne.s32.totalorder %v940_v37, 0  ;;  %v604_v5 = vadd.f32 %v5107_v50, %v5064_v20 }
 0x150   :  { %8602 = vst [vmem:[#allocation18_spill] sm:$0xff] %v5315_v54  ;;  %v8603_v32 = vmov 0  ;;  %vm665_vm15 = vcmp.ge.f32.partialorder %v601_v46, 0.0  ;;  %vm666_vm0 = vcmp.ge.f32.partialorder %v602_v63, 0.0  ;;  %v5335_v18 = vld [vmem:[%s8308_s3 + $0x1] ss:$0 sm:$0xff] }
 0x151   :  { %v8604_v32 = vsel %vm5326_vm14, 4294967295, %v8603_v32  ;;  %vm8606_vm2 = vcmp.ge.f32.partialorder %v600_v62, 0.0  ;;  %v8611_v20 = vmov 0 }
 0x152   :  { %8605 = vst [vmem:[#allocation19_spill] sm:$0xff] %v8604_v32 }
 0x157   :  { %v5201_v43 = vpop.permute.xlu0 %409  ;;  %v5214_v61 = vpop.permute.xlu1 %414 }
 0x15d   :  { %1123 = vmax.xlane.f32.xlu2 %v5150_v55 }
 0x15f   :  { %1121 = vmax.xlane.f32.xlu1 %v5164_v11  ;;  %v5260_v33 = vpop.permute.xlu0 %424  ;;  %v5279_v52 = vpop.permute.xlu1 %429 }
 0x165   :  { %1127 = vmax.xlane.f32.xlu2 %v5205_v45 }
 0x167   :  { %1125 = vmax.xlane.f32.xlu0 %v5218_v51  ;;  %1129 = vmax.xlane.f32.xlu1 %v5182_v22  ;;  %v5340_v37 = vpop.permute.xlu1 %444 }
 0x16d   :  { %1131 = vmax.xlane.f32.xlu2 %v5249_v8 }
 0x16f   :  { %1133 = vmax.xlane.f32.xlu0 %v5264_v10  ;;  %1135 = vmax.xlane.f32.xlu1 %v5268_v14  ;;  %v790_v10 = vsel %vm662_vm12, %v598_v38, %v726_v25  ;;  %v896_v38 = vpack.c.b8 %v895_v49, %v895_v49  ;;  %v729_v25 = vmul.f32 0.2, %v601_v46  ;;  %vm911_vm12 = vnez %v894_v21 }
 0x170   :  { %v5311_v16 = vsel %vm5295_vm7, %v790_v10, -1e+30  ;;  %v5324_v10 = vpop.permute.xlu0 %439  ;;  %v603_v14 = vadd.f32 %v5107_v50, %v5044_v12  ;;  %v792_v49 = vsel %vm8606_vm2, %v600_v62, %v728_v13  ;;  %v942_v21 = vunpack.c.0.s8 %v926_v17 }
 0x171   :  { %8601 = vst [vmem:[#allocation17_spill] sm:$0xff] %v5311_v16  ;;  %vm912_vm3 = vnez %v896_v38  ;;  %v927_v15 = vsel %vm911_vm12, 16843009, %v4534_v7  ;;  %v793_v12 = vsel %vm665_vm15, %v601_v46, %v729_v25  ;;  %vm5345_vm7 = vcmp.ne.s32.totalorder %v941_v28, 0 }
 0x172   :  { %v5351_v62 = vsel %vm5326_vm14, %v792_v49, -1e+30  ;;  %v928_v13 = vsel %vm912_vm3, 16843009, %v4534_v7  ;;  %vm5355_vm2 = vcmp.ne.s32.totalorder %v942_v21, 0  ;;  %vm667_vm12 = vcmp.ge.f32.partialorder %v603_v14, 0.0  ;;  %v5375_v49 = vpop.permute.xlu2 %464 }
 0x173   :  { %8610 = vst [vmem:[#allocation21_spill] sm:$0xff] %v5351_v62  ;;  %v8612_v20 = vsel %vm5355_vm2, 4294967295, %v8611_v20  ;;  %v943_v50 = vunpack.c.0.s8 %v927_v15  ;;  %v5361_v46 = vsel %vm5345_vm7, %v793_v12, -1e+30  ;;  %v732_v38 = vmul.f32 0.2, %v604_v5 }
 0x174   :  { %8613 = vst [vmem:[#allocation22_spill] sm:$0xff] %v8612_v20  ;;  %v944_v7 = vunpack.c.0.s8 %v928_v13  ;;  %v606_v25 = vadd.f32 %v5335_v18, %v5062_v19  ;;  %v608_v15 = vadd.f32 %v5335_v18, %v5087_v29  ;;  %v607_v12 = vadd.f32 %v5335_v18, %v5082_v27 }
 0x175   :  { %1137 = vmax.xlane.f32.xlu2 %v5301_v6  ;;  %v794_v6 = vsel %vm666_vm0, %v602_v63, %v730_v31  ;;  %8614 = vst [vmem:[#allocation23_spill] sm:$0xff] %v5361_v46  ;;  %vm668_vm0 = vcmp.ge.f32.partialorder %v604_v5, 0.0  ;;  %vm5371_vm15 = vcmp.ne.s32.totalorder %v943_v50, 0  ;;  %v8616_v31 = vmov 0 }
 0x176   :  { %v5365_v63 = vsel %vm5355_vm2, %v794_v6, -1e+30  ;;  %v8617_v31 = vsel %vm5371_vm15, 4294967295, %v8616_v31  ;;  %v796_v21 = vsel %vm668_vm0, %v604_v5, %v732_v38  ;;  %vm5383_vm2 = vcmp.ne.s32.totalorder %v944_v7, 0 }
 0x177   :  { %1139 = vmax.xlane.f32.xlu0 %v5311_v16  ;;  %1141 = vmax.xlane.f32.xlu1 %v5315_v54  ;;  %v605_v54 = vadd.f32 %v5335_v18, %v5072_v23  ;;  %v8607_v16 = vmov 0  ;;  %v731_v23 = vmul.f32 0.2, %v603_v14  ;;  %8615 = vst [vmem:[#allocation24_spill] sm:$0xff] %v5365_v63  ;;  %v8619_v13 = vmov 0 }
 0x178   :  { %v8608_v16 = vsel %vm5345_vm7, 4294967295, %v8607_v16  ;;  %8618 = vst [vmem:[#allocation25_spill] sm:$0xff] %v8617_v31  ;;  %v5377_v6 = vpop.permute.xlu0 %454  ;;  %v8620_v13 = vsel %vm5383_vm2, 4294967295, %v8619_v13  ;;  %v734_v5 = vmul.f32 0.2, %v606_v25  ;;  %vm671_vm0 = vcmp.ge.f32.partialorder %v607_v12, 0.0 }
 0x179   :  { %8609 = vst [vmem:[#allocation20_spill] sm:$0xff] %v8608_v16  ;;  %v733_v17 = vmul.f32 0.2, %v605_v54  ;;  %vm669_vm3 = vcmp.ge.f32.partialorder %v605_v54, 0.0  ;;  %v795_v28 = vsel %vm667_vm12, %v603_v14, %v731_v23  ;;  %v5387_v14 = vpop.permute.xlu1 %459  ;;  %v5396_v29 = vsel %vm5383_vm2, %v796_v21, -1e+30 }
 0x17a   :  { %8621 = vst [vmem:[#allocation26_spill] sm:$0xff] %v8620_v13  ;;  %v5391_v23 = vsel %vm5371_vm15, %v795_v28, -1e+30  ;;  %vm670_vm12 = vcmp.ge.f32.partialorder %v606_v25, 0.0  ;;  %v736_v50 = vmul.f32 0.2, %v608_v15  ;;  %v609_v38 = vadd.f32 %v5335_v18, %v5080_v26 }
 0x17b   :  { %v797_v19 = vsel %vm669_vm3, %v605_v54, %v733_v17  ;;  %8622 = vst [vmem:[#allocation27_spill] sm:$0xff] %v5391_v23  ;;  %v735_v54 = vmul.f32 0.2, %v607_v12  ;;  %vm672_vm3 = vcmp.ge.f32.partialorder %v608_v15, 0.0  ;;  %v798_v7 = vsel %vm670_vm12, %v606_v25, %v734_v5  ;;  %v6237_v13 = vld [vmem:[%s8309_s4 + $0x58] sm:$0xff] }
 0x17c   :  { %8623 = vst [vmem:[#allocation28_spill] sm:$0xff] %v5396_v29  ;;  %v5400_v27 = vsel %vm5157_vm1, %v797_v19, -1e+30  ;;  %v611_v17 = vadd.f32 %v5335_v18, %v5098_v39  ;;  %v610_v28 = vadd.f32 %v5335_v18, %v5096_v36  ;;  %v800_v19 = vsel %vm672_vm3, %v608_v15, %v736_v50 }
 0x17d   :  { %1143 = vmax.xlane.f32.xlu2 %v5351_v62  ;;  %v799_v21 = vsel %vm671_vm0, %v607_v12, %v735_v54  ;;  %v737_v26 = vmul.f32 0.2, %v609_v38  ;;  %v5427_v36 = vsel %vm5195_vm8, %v800_v19, -1e+30  ;;  %vm673_vm12 = vcmp.ge.f32.partialorder %v609_v38, 0.0 }
 0x17e   :  { %v5423_v39 = vsel %vm5209_vm11, %v799_v21, -1e+30  ;;  %8625 = vst [vmem:[#allocation30_spill] sm:$0xff] %v5427_v36  ;;  %v738_v15 = vmul.f32 0.2, %v610_v28  ;;  %vm674_vm0 = vcmp.ge.f32.partialorder %v610_v28, 0.0  ;;  %v612_v5 = vadd.f32 %v5335_v18, %v5094_v35 }
 0x17f   :  { %1145 = vmax.xlane.f32.xlu0 %v5361_v46  ;;  %1147 = vmax.xlane.f32.xlu1 %v5365_v63  ;;  %v5416_v63 = vsel %vm5142_vm13, %v798_v7, -1e+30  ;;  %8624 = vst [vmem:[#allocation29_spill] sm:$0xff] %v5423_v39  ;;  %v739_v12 = vmul.f32 0.2, %v611_v17  ;;  %vm675_vm3 = vcmp.ge.f32.partialorder %v611_v17, 0.0  ;;  %v801_v54 = vsel %vm673_vm12, %v609_v38, %v737_v26 }
 0x180   :  { %v614_v50 = vadd.f32 %v5335_v18, %v5116_v4  ;;  %v613_v7 = vadd.f32 %v5335_v18, %v5111_v59  ;;  %v802_v21 = vsel %vm674_vm0, %v610_v28, %v738_v15  ;;  %v5439_v46 = vsel %vm5127_vm10, %v801_v54, -1e+30 }
 0x181   :  { %v5419_v25 = vpop.permute.xlu1 %474  ;;  %v803_v19 = vsel %vm675_vm3, %v611_v17, %v739_v12  ;;  %8626 = vst [vmem:[#allocation31_spill] sm:$0xff] %v5439_v46  ;;  %v740_v62 = vmul.f32 0.2, %v612_v5  ;;  %v5448_v35 = vsel %vm5176_vm5, %v802_v21, -1e+30  ;;  %vm676_vm12 = vcmp.ge.f32.partialorder %v612_v5, 0.0 }
 0x182   :  { %8627 = vst [vmem:[#allocation32_spill] sm:$0xff] %v5448_v35  ;;  %v5452_v59 = vsel %vm5243_vm4, %v803_v19, -1e+30  ;;  %v741_v4 = vmul.f32 0.2, %v613_v7  ;;  %vm677_vm0 = vcmp.ge.f32.partialorder %v613_v7, 0.0  ;;  %v615_v28 = vadd.f32 %v5335_v18, %v5109_v56 }
 0x183   :  { %8628 = vst [vmem:[#allocation33_spill] sm:$0xff] %v5452_v59  ;;  %v742_v38 = vmul.f32 0.2, %v614_v50  ;;  %vm678_vm3 = vcmp.ge.f32.partialorder %v614_v50, 0.0  ;;  %v804_v26 = vsel %vm676_vm12, %v612_v5, %v740_v62  ;;  %v617_v15 = vadd.f32 %v5335_v18, %v5146_v53 }
 0x184   :  { %v616_v12 = vadd.f32 %v5335_v18, %v5133_v41  ;;  %v805_v54 = vsel %vm677_vm0, %v613_v7, %v741_v4  ;;  %v5466_v19 = vsel %vm5253_vm6, %v804_v26, -1e+30  ;;  %vm8631_vm12 = vnez %v8595_v24 }
 0x185   :  { %1149 = vmax.xlane.f32.xlu2 %v5391_v23  ;;  %v5410_v23 = vpop.permute.xlu2 %479  ;;  %v806_v21 = vsel %vm678_vm3, %v614_v50, %v742_v38  ;;  %8629 = vst [vmem:[#allocation34_spill] sm:$0xff] %v5466_v19  ;;  %vm679_vm4 = vcmp.ge.f32.partialorder %v615_v28, 0.0  ;;  %v745_v53 = vmul.f32 0.2, %v617_v15  ;;  %vm681_vm3 = vcmp.ge.f32.partialorder %v617_v15, 0.0 }
 0x186   :  { %v5475_v56 = vsel %vm8631_vm12, %v806_v21, -1e+30  ;;  %v744_v41 = vmul.f32 0.2, %v616_v12  ;;  %vm680_vm0 = vcmp.ge.f32.partialorder %v616_v12, 0.0  ;;  %v618_v50 = vadd.f32 %v5335_v18, %v5131_v40 }
 0x187   :  { %1151 = vmax.xlane.f32.xlu0 %v5396_v29  ;;  %1153 = vmax.xlane.f32.xlu1 %v5400_v27  ;;  %v5412_v29 = vpop.permute.xlu0 %469  ;;  %8632 = vst [vmem:[#allocation36_spill] sm:$0xff] %v5475_v56  ;;  %v620_v38 = vadd.f32 %v5335_v18, %v5214_v61  ;;  %v619_v26 = vadd.f32 %v5335_v18, %v5201_v43  ;;  %vm8633_vm12 = vnez %v8599_v60 }
 0x188   :  { %v809_v21 = vsel %vm681_vm3, %v617_v15, %v745_v53  ;;  %v746_v40 = vmul.f32 0.2, %v618_v50 }
 0x189   :  { %v5456_v17 = vpop.permute.xlu1 %489  ;;  %v5507_v43 = vsel %vm5345_vm7, %v809_v21, -1e+30  ;;  %v747_v18 = vmul.f32 0.2, %v619_v26  ;;  %vm684_vm3 = vcmp.ge.f32.partialorder %v620_v38, 0.0  ;;  %vm8637_vm7 = vnez %v8612_v20  ;;  %v6276_v20 = vld [vmem:[%s8309_s4 + $0x40] sm:$0xff] }
 0x18a   :  { %8636 = vst [vmem:[#allocation39_spill] sm:$0xff] %v5507_v43 }
 0x18d   :  { %1155 = vmax.xlane.f32.xlu2 %v5416_v63 }
 0x18f   :  { %1157 = vmax.xlane.f32.xlu0 %v5423_v39  ;;  %1159 = vmax.xlane.f32.xlu1 %v5427_v36  ;;  %v5442_v36 = vpop.permute.xlu2 %494  ;;  %v5444_v39 = vpop.permute.xlu0 %484 }
 0x191   :  { %v5485_v4 = vpop.permute.xlu1 %504 }
 0x195   :  { %1161 = vmax.xlane.f32.xlu2 %v5439_v46  ;;  %v6386_v46 = vld [vmem:[%s8309_s4] sm:$0xff] }
 0x197   :  { %1163 = vmax.xlane.f32.xlu0 %v5448_v35  ;;  %1165 = vmax.xlane.f32.xlu1 %v5452_v59  ;;  %v743_v59 = vmul.f32 0.2, %v615_v28  ;;  %v5471_v35 = vsel %vm5275_vm9, %v805_v54, -1e+30  ;;  %v5479_v62 = vpop.permute.xlu2 %509  ;;  %v5481_v5 = vpop.permute.xlu0 %499  ;;  %v808_v54 = vsel %vm680_vm0, %v616_v12, %v744_v41  ;;  %vm683_vm0 = vcmp.ge.f32.partialorder %v619_v26, 0.0 }
 0x198   :  { %8630 = vst [vmem:[#allocation35_spill] sm:$0xff] %v5471_v35  ;;  %v5503_v61 = vsel %vm5326_vm14, %v808_v54, -1e+30  ;;  %v811_v54 = vsel %vm683_vm0, %v619_v26, %v747_v18 }
 0x199   :  { %v807_v7 = vsel %vm679_vm4, %v615_v28, %v743_v59  ;;  %8635 = vst [vmem:[#allocation38_spill] sm:$0xff] %v5503_v61  ;;  %vm682_vm4 = vcmp.ge.f32.partialorder %v618_v50, 0.0  ;;  %v748_v59 = vmul.f32 0.2, %v620_v38 }
 0x19a   :  { %v810_v15 = vsel %vm682_vm4, %v618_v50, %v746_v40  ;;  %v5530_v50 = vsel %vm5371_vm15, %v811_v54, -1e+30 }
 0x19b   :  { %v812_v21 = vsel %vm684_vm3, %v620_v38, %v748_v59  ;;  %8639 = vst [vmem:[#allocation41_spill] sm:$0xff] %v5530_v50 }
 0x19d   :  { %1167 = vmax.xlane.f32.xlu2 %v5466_v19 }
 0x19f   :  { %1169 = vmax.xlane.f32.xlu0 %v5471_v35  ;;  %1171 = vmax.xlane.f32.xlu1 %v5475_v56  ;;  %v5493_v56 = vsel %vm8633_vm12, %v807_v7, -1e+30  ;;  %v5498_v35 = vld [vmem:[%s8308_s3 + $0x2] ss:$0 sm:$0xff]  ;;  %v5513_v12 = vpop.permute.xlu2 %524  ;;  %v5515_v41 = vpop.permute.xlu0 %514 }
 0x1a0   :  { %8634 = vst [vmem:[#allocation37_spill] sm:$0xff] %v5493_v56  ;;  %v621_v28 = vadd.f32 %v5498_v35, %v5199_v42  ;;  %v623_v53 = vadd.f32 %v5498_v35, %v5279_v52  ;;  %v622_v7 = vadd.f32 %v5498_v35, %v5260_v33  ;;  %v5534_v52 = vsel %vm5383_vm2, %v812_v21, -1e+30 }
 0x1a1   :  { %8640 = vst [vmem:[#allocation42_spill] sm:$0xff] %v5534_v52  ;;  %v624_v26 = vadd.f32 %v5498_v35, %v5258_v9  ;;  %v626_v18 = vadd.f32 %v5498_v35, %v5340_v37  ;;  %v625_v59 = vadd.f32 %v5498_v35, %v5324_v10 }
 0x1a2   :  { %v749_v42 = vmul.f32 0.2, %v621_v28  ;;  %vm685_vm4 = vcmp.ge.f32.partialorder %v621_v28, 0.0  ;;  %v750_v33 = vmul.f32 0.2, %v622_v7  ;;  %vm686_vm0 = vcmp.ge.f32.partialorder %v622_v7, 0.0 }
 0x1a3   :  { %v751_v38 = vmul.f32 0.2, %v623_v53  ;;  %vm687_vm3 = vcmp.ge.f32.partialorder %v623_v53, 0.0  ;;  %v752_v9 = vmul.f32 0.2, %v624_v26 }
 0x1a4   :  { %v813_v40 = vsel %vm685_vm4, %v621_v28, %v749_v42  ;;  %vm688_vm4 = vcmp.ge.f32.partialorder %v624_v26, 0.0  ;;  %v627_v42 = vadd.f32 %v5498_v35, %v5322_v57 }
 0x1a5   :  { %1173 = vmax.xlane.f32.xlu2 %v5493_v56  ;;  %v815_v54 = vsel %vm687_vm3, %v623_v53, %v751_v38  ;;  %v753_v53 = vmul.f32 0.2, %v625_v59  ;;  %vm690_vm3 = vcmp.ge.f32.partialorder %v626_v18, 0.0  ;;  %v629_v38 = vadd.f32 %v5498_v35, %v5387_v14 }
 0x1a6   :  { %v5561_v10 = vsel %vm5209_vm11, %v815_v54, -1e+30  ;;  %v755_v56 = vmul.f32 0.2, %v627_v42 }
 0x1a7   :  { %1175 = vmax.xlane.f32.xlu0 %v5503_v61  ;;  %1177 = vmax.xlane.f32.xlu1 %v5507_v43  ;;  %v5521_v43 = vpop.permute.xlu1 %519  ;;  %v5525_v61 = vsel %vm8637_vm7, %v810_v15, -1e+30  ;;  %v814_v15 = vsel %vm686_vm0, %v622_v7, %v750_v33  ;;  %v5544_v21 = vpop.permute.xlu2 %539  ;;  %8643 = vst [vmem:[#allocation45_spill] sm:$0xff] %v5561_v10  ;;  %v754_v7 = vmul.f32 0.2, %v626_v18  ;;  %vm689_vm0 = vcmp.ge.f32.partialorder %v625_v59, 0.0 }
 0x1a8   :  { %8638 = vst [vmem:[#allocation40_spill] sm:$0xff] %v5525_v61  ;;  %v5557_v37 = vsel %vm5142_vm13, %v814_v15, -1e+30  ;;  %v816_v33 = vsel %vm688_vm4, %v624_v26, %v752_v9  ;;  %v817_v15 = vsel %vm689_vm0, %v625_v59, %v753_v53  ;;  %vm691_vm4 = vcmp.ge.f32.partialorder %v627_v42, 0.0 }
 0x1a9   :  { %8642 = vst [vmem:[#allocation44_spill] sm:$0xff] %v5557_v37  ;;  %v818_v54 = vsel %vm690_vm3, %v626_v18, %v754_v7  ;;  %v5582_v57 = vsel %vm5127_vm10, %v817_v15, -1e+30  ;;  %v757_v26 = vmul.f32 0.2, %v629_v38  ;;  %vm693_vm3 = vcmp.ge.f32.partialorder %v629_v38, 0.0 }
 0x1aa   :  { %8645 = vst [vmem:[#allocation47_spill] sm:$0xff] %v5582_v57  ;;  %v630_v59 = vadd.f32 %v5498_v35, %v5375_v49  ;;  %v819_v9 = vsel %vm691_vm4, %v627_v42, %v755_v56  ;;  %v631_v53 = vadd.f32 %v5498_v35, %v5412_v29  ;;  %v632_v7 = vadd.f32 %v5498_v35, %v5419_v25 }
 0x1ab   :  { %v821_v15 = vsel %vm693_vm3, %v629_v38, %v757_v26  ;;  %v634_v26 = vadd.f32 %v5498_v35, %v5444_v39  ;;  %vm8651_vm3 = vnez %v8595_v24 }
 0x1ac   :  { %vm694_vm10 = vcmp.ge.f32.partialorder %v630_v59, 0.0  ;;  %v5609_v29 = vsel %vm5275_vm9, %v821_v15, -1e+30  ;;  %v759_v56 = vmul.f32 0.2, %v631_v53  ;;  %vm695_vm4 = vcmp.ge.f32.partialorder %v631_v53, 0.0 }
 0x1ad   :  { %1179 = vmax.xlane.f32.xlu2 %v5525_v61  ;;  %v5573_v61 = vsel %vm5195_vm8, %v816_v33, -1e+30  ;;  %8650 = vst [vmem:[#allocation51_spill] sm:$0xff] %v5609_v29  ;;  %v760_v25 = vmul.f32 0.2, %v632_v7  ;;  %v635_v15 = vadd.f32 %v5498_v35, %v5456_v17 }
 0x1ae   :  { %8644 = vst [vmem:[#allocation46_spill] sm:$0xff] %v5573_v61  ;;  %v762_v17 = vmul.f32 0.2, %v634_v26 }
 0x1af   :  { %1181 = vmax.xlane.f32.xlu0 %v5530_v50  ;;  %1183 = vmax.xlane.f32.xlu1 %v5534_v52  ;;  %v5546_v50 = vpop.permute.xlu0 %529  ;;  %v5550_v52 = vsel %vm5157_vm1, %v813_v40, -1e+30  ;;  %v5553_v28 = vpop.permute.xlu1 %534  ;;  %v628_v40 = vadd.f32 %v5498_v35, %v5377_v6  ;;  %v5586_v6 = vsel %vm5176_vm5, %v818_v54, -1e+30  ;;  %vm8647_vm5 = vnez %v8584_v58 }
 0x1b0   :  { %8641 = vst [vmem:[#allocation43_spill] sm:$0xff] %v5550_v52  ;;  %v5576_v19 = vpop.permute.xlu2 %554  ;;  %v5600_v54 = vsel %vm8647_vm5, %v819_v9, -1e+30 }
 0x1b1   :  { %8646 = vst [vmem:[#allocation48_spill] sm:$0xff] %v5586_v6  ;;  %v756_v14 = vmul.f32 0.2, %v628_v40  ;;  %vm692_vm0 = vcmp.ge.f32.partialorder %v628_v40, 0.0 }
 0x1b2   :  { %8648 = vst [vmem:[#allocation49_spill] sm:$0xff] %v5600_v54 }
 0x1b3   :  { %v820_v33 = vsel %vm692_vm0, %v628_v40, %v756_v14  ;;  %vm696_vm0 = vcmp.ge.f32.partialorder %v632_v7, 0.0  ;;  %v633_v40 = vadd.f32 %v5498_v35, %v5410_v23 }
 0x1b4   :  { %v5605_v49 = vsel %vm5253_vm6, %v820_v33, -1e+30  ;;  %v823_v33 = vsel %vm695_vm4, %v631_v53, %v759_v56  ;;  %vm698_vm4 = vcmp.ge.f32.partialorder %v634_v26, 0.0  ;;  %v763_v53 = vmul.f32 0.2, %v635_v15 }
 0x1b5   :  { %1185 = vmax.xlane.f32.xlu2 %v5550_v52  ;;  %8649 = vst [vmem:[#allocation50_spill] sm:$0xff] %v5605_v49  ;;  %v5632_v23 = vsel %vm8633_vm12, %v823_v33, -1e+30  ;;  %vm8660_vm12 = vnez %v8608_v16 }
 0x1b6   :  { %8653 = vst [vmem:[#allocation53_spill] sm:$0xff] %v5632_v23 }
 0x1b7   :  { %1187 = vmax.xlane.f32.xlu0 %v5557_v37  ;;  %1189 = vmax.xlane.f32.xlu1 %v5561_v10  ;;  %v5578_v10 = vpop.permute.xlu0 %544  ;;  %v5590_v18 = vpop.permute.xlu1 %549  ;;  %v6332_v37 = vld [vmem:[%s8309_s4 + $0x20] sm:$0xff] }
 0x1b8   :  { %v5613_v42 = vpop.permute.xlu2 %569 }
 0x1bd   :  { %1191 = vmax.xlane.f32.xlu2 %v5573_v61 }
 0x1bf   :  { %1193 = vmax.xlane.f32.xlu0 %v5582_v57  ;;  %1195 = vmax.xlane.f32.xlu1 %v5586_v6  ;;  %v758_v6 = vmul.f32 0.2, %v630_v59  ;;  %v5615_v38 = vpop.permute.xlu0 %559  ;;  %v5621_v9 = vpop.permute.xlu1 %564 }
 0x1c1   :  { %v822_v14 = vsel %vm694_vm10, %v630_v59, %v758_v6  ;;  %v761_v6 = vmul.f32 0.2, %v633_v40  ;;  %v5638_v59 = vld [vmem:[#allocation2 + $0x8] sm:$0xff]  ;;  %vm697_vm10 = vcmp.ge.f32.partialorder %v633_v40, 0.0 }
 0x1c2   :  { %8655 = vst [vmem:[#allocation55_spill] sm:$0xff] %v5638_v59 }
 0x1c3   :  { %v825_v33 = vsel %vm697_vm10, %v633_v40, %v761_v6 }
 0x1c5   :  { %1197 = vmax.xlane.f32.xlu2 %v5600_v54  ;;  %v826_v54 = vsel %vm698_vm4, %v634_v26, %v762_v17  ;;  %v5684_v17 = vld [vmem:[#allocation2 + $0x10] sm:$0xff] }
 0x1c6   :  { %8666 = vst [vmem:[#allocation63_spill] sm:$0xff] %v5684_v17 }
 0x1c7   :  { %1199 = vmax.xlane.f32.xlu0 %v5605_v49  ;;  %1201 = vmax.xlane.f32.xlu1 %v5609_v29  ;;  %v824_v29 = vsel %vm696_vm0, %v632_v7, %v760_v25  ;;  %v5627_v49 = vsel %vm8651_vm3, %v822_v14, -1e+30  ;;  %v5645_v7 = vld [vmem:[%s8308_s3 + $0x3] ss:$0 sm:$0xff]  ;;  %vm699_vm0 = vcmp.ge.f32.partialorder %v635_v15, 0.0 }
 0x1c8   :  { %8652 = vst [vmem:[#allocation52_spill] sm:$0xff] %v5627_v49  ;;  %v5636_v39 = vsel %vm5326_vm14, %v824_v29, -1e+30  ;;  %v5647_v25 = vld [vmem:[#allocation2] sm:$0xff]  ;;  %v636_v29 = vadd.f32 %v5498_v35, %v5442_v36  ;;  %v638_v57 = vadd.f32 %v5645_v7, %v5485_v4  ;;  %vm8658_vm14 = vcmask 7168  }
 0x1c9   :  { %8654 = vst [vmem:[#allocation54_spill] sm:$0xff] %v5636_v39  ;;  %v827_v36 = vsel %vm699_vm0, %v635_v15, %v763_v53  ;;  %v5667_v35 = vsel %vm8660_vm12, %v825_v33, -1e+30  ;;  %vm8662_vm10 = vmmov %vm8658_vm14  ;;  %v639_v53 = vadd.f32 %v5645_v7, %v5479_v62 }
 0x1ca   :  { %8656 = vst [vmem:[#allocation56_spill] sm:$0xff] %v5647_v25  ;;  %v764_v4 = vmul.f32 0.2, %v636_v29  ;;  %v5678_v40 = vsel %vm5371_vm15, %v827_v36, -1e+30  ;;  %vm702_vm0 = vcmp.ge.f32.partialorder %v638_v57, 0.0  ;;  %v640_v36 = vadd.f32 %v5645_v7, %v5515_v41 }
 0x1cb   :  { %8661 = vst [vmem:[#allocation59_spill] sm:$0xff] %v5667_v35  ;;  %v766_v15 = vmul.f32 0.2, %v638_v57 }
 0x1cc   :  { %8664 = vst [vmem:[#allocation61_spill] sm:$0xff] %v5678_v40 }
 0x1cd   :  { %1203 = vmax.xlane.f32.xlu2 %v5627_v49 }
 0x1cf   :  { %1205 = vmax.xlane.f32.xlu0 %v5632_v23  ;;  %1207 = vmax.xlane.f32.xlu1 %v5636_v39  ;;  %v637_v39 = vadd.f32 %v5645_v7, %v5481_v5  ;;  %v5656_v23 = vpop.permute.xlu0 %574  ;;  %v5674_v5 = vsel %vm8637_vm7, %v826_v54, -1e+30  ;;  %v5686_v54 = vld [vmem:[#allocation2 + $0x20] sm:$0xff] }
 0x1d0   :  { %v1124_v56 = vpop.xlane.xlu2 %1123  ;;  %8663 = vst [vmem:[#allocation60_spill] sm:$0xff] %v5674_v5 }
 0x1d1   :  { %v5652_v14 = vmax.f32 %v5638_v59, %v1124_v56  ;;  %v765_v26 = vmul.f32 0.2, %v637_v39  ;;  %vm701_vm4 = vcmp.ge.f32.partialorder %v637_v39, 0.0  ;;  %8667 = vst [vmem:[#allocation64_spill] sm:$0xff] %v5686_v54  ;;  %v641_v59 = vadd.f32 %v5645_v7, %v5521_v43 }
 0x1d2   :  { %v1122_v49 = vpop.xlane.xlu1 %1121 }
 0x1d3   :  { %8657 = vst [vmem:[#allocation57_spill] sm:$0xff] %v5652_v14  ;;  %v5663_v61 = vmax.f32 %v5647_v25, %v1122_v49  ;;  %v5680_v49 = vld [vmem:[#allocation2 + $0x18] sm:$0xff] }
 0x1d4   :  { %2467 = vst.msk [vmem:[#allocation2 + $0x8] sm:$0xff] %vm8658_vm14, %v5652_v14  ;;  %vm700_vm14 = vcmp.ge.f32.partialorder %v636_v29, 0.0 }
 0x1d5   :  { %8659 = vst [vmem:[#allocation58_spill] sm:$0xff] %v5663_v61  ;;  %1209 = vmax.xlane.f32.xlu2 %v5667_v35  ;;  %v828_v33 = vsel %vm700_vm14, %v636_v29, %v764_v4  ;;  %vm8672_vm14 = vmmov %vm8662_vm10  ;;  %v768_v4 = vmul.f32 0.2, %v640_v36 }
 0x1d6   :  { %2466 = vst.msk [vmem:[#allocation2] sm:$0xff] %vm8662_vm10, %v5663_v61  ;;  %v5707_v29 = vsel %vm5383_vm2, %v828_v33, -1e+30  ;;  %v642_v33 = vadd.f32 %v5645_v7, %v5513_v12 }
 0x1d7   :  { %8665 = vst [vmem:[#allocation62_spill] sm:$0xff] %v5680_v49  ;;  %1211 = vmax.xlane.f32.xlu0 %v5674_v5  ;;  %1213 = vmax.xlane.f32.xlu1 %v5678_v40  ;;  %v829_v5 = vsel %vm701_vm4, %v637_v39, %v765_v26  ;;  %vm703_vm4 = vcmp.ge.f32.partialorder %v639_v53, 0.0  ;;  %v767_v39 = vmul.f32 0.2, %v639_v53  ;;  %v5728_v26 = vld [vmem:[#allocation2 + $0x30] sm:$0xff] }
 0x1d8   :  { %v1128_v6 = vpop.xlane.xlu2 %1127  ;;  %8671 = vst [vmem:[#allocation68_spill] sm:$0xff] %v5707_v29  ;;  %v5716_v43 = vsel %vm5157_vm1, %v829_v5, -1e+30 }
 0x1d9   :  { %v5691_v56 = vmax.f32 %v5680_v49, %v1128_v6  ;;  %v830_v6 = vsel %vm702_vm0, %v638_v57, %v766_v15  ;;  %8673 = vst [vmem:[#allocation69_spill] sm:$0xff] %v5716_v43  ;;  %vm8674_vm0 = vmmov %vm8662_vm10  ;;  %v5730_v15 = vld [vmem:[#allocation2 + $0x38] sm:$0xff]  ;;  %v831_v41 = vsel %vm703_vm4, %v639_v53, %v767_v39  ;;  %v643_v49 = vadd.f32 %v5645_v7, %v5546_v50  ;;  %v5773_v39 = vld [vmem:[#allocation2 + $0x50] sm:$0xff] }
 0x1da   :  { %v1126_v25 = vpop.xlane.xlu0 %1125  ;;  %v1130_v40 = vpop.xlane.xlu1 %1129  ;;  %v5722_v57 = vsel %vm5142_vm13, %v830_v6, -1e+30  ;;  %8677 = vst [vmem:[#allocation72_spill] sm:$0xff] %v5728_v26  ;;  %v5752_v53 = vsel %vm5209_vm11, %v831_v41, -1e+30  ;;  %vm8683_vm4 = vmmov %vm8674_vm0  ;;  %v5771_v41 = vld [vmem:[#allocation2 + $0x48] sm:$0xff] }
 0x1db   :  { %8668 = vst [vmem:[#allocation65_spill] sm:$0xff] %v5691_v56  ;;  %v5700_v35 = vmax.f32 %v5684_v17, %v1126_v25  ;;  %v5703_v62 = vmax.f32 %v5686_v54, %v1130_v40  ;;  %v5724_v25 = vld [vmem:[#allocation2 + $0x28] sm:$0xff]  ;;  %v769_v40 = vmul.f32 0.2, %v641_v59 }
 0x1dc   :  { %2469 = vst.msk [vmem:[#allocation2 + $0x18] sm:$0xff] %vm8662_vm10, %v5691_v56  ;;  %vm704_vm10 = vcmp.ge.f32.partialorder %v640_v36, 0.0 }
 0x1dd   :  { %8669 = vst [vmem:[#allocation66_spill] sm:$0xff] %v5700_v35  ;;  %1215 = vmax.xlane.f32.xlu2 %v5707_v29  ;;  %v832_v54 = vsel %vm704_vm10, %v640_v36, %v768_v4  ;;  %v771_v36 = vmul.f32 0.2, %v643_v49  ;;  %v645_v4 = vadd.f32 %v5645_v7, %v5544_v21 }
 0x1de   :  { %8670 = vst [vmem:[#allocation67_spill] sm:$0xff] %v5703_v62  ;;  %v5759_v50 = vsel %vm5195_vm8, %v832_v54, -1e+30 }
 0x1df   :  { %2468 = vst.msk [vmem:[#allocation2 + $0x10] sm:$0xff] %vm8672_vm14, %v5700_v35  ;;  %1217 = vmax.xlane.f32.xlu0 %v5716_v43  ;;  %1219 = vmax.xlane.f32.xlu1 %v5722_v57  ;;  %vm705_vm14 = vcmp.ge.f32.partialorder %v641_v59, 0.0 }
 0x1e0   :  { %2470 = vst.msk [vmem:[#allocation2 + $0x20] sm:$0xff] %vm8674_vm0, %v5703_v62  ;;  %v1132_v5 = vpop.xlane.xlu2 %1131 }
 0x1e1   :  { %8675 = vst [vmem:[#allocation70_spill] sm:$0xff] %v5722_v57  ;;  %v5735_v6 = vmax.f32 %v5724_v25, %v1132_v5  ;;  %v644_v57 = vadd.f32 %v5645_v7, %v5553_v28  ;;  %v833_v5 = vsel %vm705_vm14, %v641_v59, %v769_v40  ;;  %v770_v28 = vmul.f32 0.2, %v642_v33 }
 0x1e2   :  { %8676 = vst [vmem:[#allocation71_spill] sm:$0xff] %v5724_v25  ;;  %v1134_v29 = vpop.xlane.xlu0 %1133  ;;  %v1136_v17 = vpop.xlane.xlu1 %1135  ;;  %vm8685_vm14 = vnez %v8564_v34 }
 0x1e3   :  { %8678 = vst [vmem:[#allocation73_spill] sm:$0xff] %v5730_v15  ;;  %v5745_v43 = vmax.f32 %v5728_v26, %v1134_v29  ;;  %v5748_v12 = vmax.f32 %v5730_v15, %v1136_v17  ;;  %v5765_v59 = vsel %vm8685_vm14, %v833_v5, -1e+30  ;;  %v5767_v17 = vld [vmem:[#allocation2 + $0x40] sm:$0xff]  ;;  %v772_v29 = vmul.f32 0.2, %v644_v57 }
 0x1e4   :  { %8679 = vst [vmem:[#allocation74_spill] sm:$0xff] %v5735_v6  ;;  %vm708_vm10 = vcmp.ge.f32.partialorder %v644_v57, 0.0  ;;  %v646_v26 = vadd.f32 %v5645_v7, %v5578_v10  ;;  %vm8692_vm14 = vcmask 7168  }
 0x1e5   :  { %2471 = vst.msk [vmem:[#allocation2 + $0x28] sm:$0xff] %vm8674_vm0, %v5735_v6  ;;  %1221 = vmax.xlane.f32.xlu2 %v5752_v53  ;;  %vm8697_vm8 = vmmov %vm8692_vm14 }
 0x1e6   :  { %8680 = vst [vmem:[#allocation75_spill] sm:$0xff] %v5745_v43 }
 0x1e7   :  { %8681 = vst [vmem:[#allocation76_spill] sm:$0xff] %v5748_v12  ;;  %1223 = vmax.xlane.f32.xlu0 %v5759_v50  ;;  %1225 = vmax.xlane.f32.xlu1 %v5765_v59 }
 0x1e8   :  { %8682 = vst [vmem:[#allocation77_spill] sm:$0xff] %v5752_v53  ;;  %v1138_v54 = vpop.xlane.xlu2 %1137 }
 0x1e9   :  { %2472 = vst.msk [vmem:[#allocation2 + $0x30] sm:$0xff] %vm8683_vm4, %v5745_v43  ;;  %vm707_vm4 = vcmp.ge.f32.partialorder %v643_v49, 0.0  ;;  %v5778_v40 = vmax.f32 %v5767_v17, %v1138_v54  ;;  %v836_v54 = vsel %vm708_vm10, %v644_v57, %v772_v29  ;;  %v5810_v57 = vld [vmem:[#allocation2 + $0x58] sm:$0xff]  ;;  %v648_v29 = vadd.f32 %v5645_v7, %v5576_v19 }
 0x1ea   :  { %8684 = vst [vmem:[#allocation78_spill] sm:$0xff] %v5759_v50  ;;  %v1140_v15 = vpop.xlane.xlu0 %1139  ;;  %v1142_v25 = vpop.xlane.xlu1 %1141  ;;  %v647_v50 = vadd.f32 %v5645_v7, %v5590_v18  ;;  %v773_v18 = vmul.f32 0.2, %v645_v4 }
 0x1eb   :  { %2473 = vst.msk [vmem:[#allocation2 + $0x38] sm:$0xff] %vm8674_vm0, %v5748_v12  ;;  %vm8691_vm0 = vcmp.ge.f32.partialorder %v642_v33, 0.0  ;;  %v5788_v53 = vmax.f32 %v5771_v41, %v1140_v15  ;;  %v5791_v21 = vmax.f32 %v5773_v39, %v1142_v25  ;;  %v774_v25 = vmul.f32 0.2, %v646_v26 }
 0x1ec   :  { %8686 = vst [vmem:[#allocation79_spill] sm:$0xff] %v5765_v59  ;;  %v834_v5 = vsel %vm8691_vm0, %v642_v33, %v770_v28  ;;  %v835_v59 = vsel %vm707_vm4, %v643_v49, %v771_v36  ;;  %vm8695_vm0 = vnez %v8572_v44  ;;  %vm8699_vm4 = vmmov %vm8697_vm8  ;;  %v5808_v49 = vsel %vm5253_vm6, %v836_v54, -1e+30  ;;  %v5816_v36 = vld [vmem:[#allocation2 + $0x68] sm:$0xff] }
 0x1ed   :  { %8687 = vst [vmem:[#allocation80_spill] sm:$0xff] %v5767_v17  ;;  %v5795_v33 = vsel %vm8695_vm0, %v834_v5, -1e+30  ;;  %v5802_v10 = vsel %vm8647_vm5, %v835_v59, -1e+30  ;;  %v5814_v59 = vld [vmem:[#allocation2 + $0x60] sm:$0xff] }
 0x1ee   :  { %8688 = vst [vmem:[#allocation81_spill] sm:$0xff] %v5771_v41  ;;  %1227 = vmax.xlane.f32.xlu2 %v5795_v33  ;;  %v775_v15 = vmul.f32 0.2, %v647_v50  ;;  %vm711_vm10 = vcmp.ge.f32.partialorder %v647_v50, 0.0  ;;  %v649_v41 = vadd.f32 %v5645_v7, %v5615_v38 }
 0x1ef   :  { %8689 = vst [vmem:[#allocation82_spill] sm:$0xff] %v5773_v39  ;;  %1229 = vmax.xlane.f32.xlu0 %v5802_v10  ;;  %1231 = vmax.xlane.f32.xlu1 %v5808_v49 }
 0x1f0   :  { %8690 = vst [vmem:[#allocation83_spill] sm:$0xff] %v5778_v40  ;;  %v1144_v28 = vpop.xlane.xlu2 %1143 }
 0x1f1   :  { %2474 = vst.msk [vmem:[#allocation2 + $0x40] sm:$0xff] %vm8692_vm14, %v5778_v40  ;;  %vm709_vm14 = vcmp.ge.f32.partialorder %v645_v4, 0.0  ;;  %v5821_v5 = vmax.f32 %v5810_v57, %v1144_v28  ;;  %v839_v28 = vsel %vm711_vm10, %v647_v50, %v775_v15  ;;  %vm8710_vm10 = vnez %v8599_v60  ;;  %v5853_v50 = vld [vmem:[#allocation2 + $0x70] sm:$0xff] }
 0x1f2   :  { %8693 = vst [vmem:[#allocation84_spill] sm:$0xff] %v5788_v53  ;;  %v837_v54 = vsel %vm709_vm14, %v645_v4, %v773_v18  ;;  %v1146_v39 = vpop.xlane.xlu0 %1145  ;;  %v1148_v17 = vpop.xlane.xlu1 %1147  ;;  %vm8708_vm14 = vmmov %vm8699_vm4  ;;  %v651_v15 = vadd.f32 %v5645_v7, %v5613_v42 }
 0x1f3   :  { %8694 = vst [vmem:[#allocation85_spill] sm:$0xff] %v5791_v21  ;;  %v5834_v19 = vmax.f32 %v5816_v36, %v1148_v17  ;;  %v5838_v4 = vsel %vm5275_vm9, %v837_v54, -1e+30  ;;  %v777_v17 = vmul.f32 0.2, %v649_v41 }
 0x1f4   :  { %8696 = vst [vmem:[#allocation86_spill] sm:$0xff] %v5795_v33  ;;  %v5831_v33 = vmax.f32 %v5814_v59, %v1146_v39 }
 0x1f5   :  { %2475 = vst.msk [vmem:[#allocation2 + $0x48] sm:$0xff] %vm8697_vm8, %v5788_v53  ;;  %vm710_vm8 = vcmp.ge.f32.partialorder %v646_v26, 0.0 }
 0x1f6   :  { %8698 = vst [vmem:[#allocation87_spill] sm:$0xff] %v5802_v10  ;;  %v650_v10 = vadd.f32 %v5645_v7, %v5621_v9  ;;  %1233 = vmax.xlane.f32.xlu2 %v5838_v4  ;;  %v776_v9 = vmul.f32 0.2, %v648_v29 }
 0x1f7   :  { %2476 = vst.msk [vmem:[#allocation2 + $0x50] sm:$0xff] %vm8699_vm4, %v5791_v21 }
 0x1f8   :  { %8700 = vst [vmem:[#allocation88_spill] sm:$0xff] %v5808_v49  ;;  %v838_v49 = vsel %vm710_vm8, %v646_v26, %v774_v25  ;;  %v5851_v26 = vsel %vm8710_vm10, %v839_v28, -1e+30  ;;  %v778_v39 = vmul.f32 0.2, %v650_v10  ;;  %v1150_v18 = vpop.xlane.xlu2 %1149  ;;  %v5859_v25 = vld [vmem:[#allocation2 + $0x80] sm:$0xff] }
 0x1f9   :  { %8701 = vst [vmem:[#allocation89_spill] sm:$0xff] %v5810_v57  ;;  %v5845_v38 = vsel %vm8651_vm3, %v838_v49, -1e+30  ;;  %1237 = vmax.xlane.f32.xlu1 %v5851_v26  ;;  %v5857_v49 = vld [vmem:[#allocation2 + $0x78] sm:$0xff]  ;;  %vm714_vm8 = vcmp.ge.f32.partialorder %v650_v10, 0.0  ;;  %v5864_v54 = vmax.f32 %v5853_v50, %v1150_v18  ;;  %vm8717_vm10 = vcmask 7168  }
 0x1fa   :  { %8702 = vst [vmem:[#allocation90_spill] sm:$0xff] %v5814_v59  ;;  %1235 = vmax.xlane.f32.xlu0 %v5845_v38  ;;  %v1152_v59 = vpop.xlane.xlu0 %1151  ;;  %v842_v42 = vsel %vm714_vm8, %v650_v10, %v778_v39  ;;  %vm8720_vm3 = vnez %v8604_v32  ;;  %v5894_v10 = vld [vmem:[#allocation2 + $0x88] sm:$0xff] }
 0x1fb   :  { %8703 = vst [vmem:[#allocation91_spill] sm:$0xff] %v5816_v36  ;;  %v1154_v36 = vpop.xlane.xlu1 %1153 }
 0x1fc   :  { %8704 = vst [vmem:[#allocation92_spill] sm:$0xff] %v5821_v5 }
 0x1fd   :  { %2477 = vst.msk [vmem:[#allocation2 + $0x58] sm:$0xff] %vm8699_vm4, %v5821_v5 }
 0x1fe   :  { %8705 = vst [vmem:[#allocation93_spill] sm:$0xff] %v5831_v33 }
 0x1ff   :  { %8706 = vst [vmem:[#allocation94_spill] sm:$0xff] %v5834_v19 }
 0x200   :  { %8707 = vst [vmem:[#allocation95_spill] sm:$0xff] %v5838_v4  ;;  %v5875_v4 = vmax.f32 %v5859_v25, %v1154_v36  ;;  %v1156_v36 = vpop.xlane.xlu2 %1155 }
 0x201   :  { %2478 = vst.msk [vmem:[#allocation2 + $0x60] sm:$0xff] %vm8708_vm14, %v5831_v33  ;;  %vm713_vm14 = vcmp.ge.f32.partialorder %v649_v41, 0.0 }
 0x202   :  { %8709 = vst [vmem:[#allocation96_spill] sm:$0xff] %v5845_v38  ;;  %v841_v57 = vsel %vm713_vm14, %v649_v41, %v777_v17  ;;  %v5872_v38 = vmax.f32 %v5857_v49, %v1152_v59  ;;  %vm715_vm14 = vcmp.ge.f32.partialorder %v651_v15, 0.0  ;;  %v5892_v41 = vsel %vm8637_vm7, %v842_v42, -1e+30  ;;  %v1158_v39 = vpop.xlane.xlu0 %1157 }
 0x203   :  { %2479 = vst.msk [vmem:[#allocation2 + $0x68] sm:$0xff] %vm8699_vm4, %v5834_v19  ;;  %vm8716_vm4 = vcmp.ge.f32.partialorder %v648_v29, 0.0  ;;  %1243 = vmax.xlane.f32.xlu1 %v5892_v41 }
 0x204   :  { %8711 = vst [vmem:[#allocation97_spill] sm:$0xff] %v5851_v26  ;;  %v840_v28 = vsel %vm8716_vm4, %v648_v29, %v776_v9  ;;  %v652_v26 = vadd.f32 %v5645_v7, %v5656_v23  ;;  %vm8722_vm4 = vmmov %vm8717_vm10  ;;  %v779_v23 = vmul.f32 0.2, %v651_v15  ;;  %v5888_v7 = vsel %vm8660_vm12, %v841_v57, -1e+30  ;;  %v5898_v29 = vld [vmem:[#allocation2 + $0x90] sm:$0xff] }
 0x205   :  { %8712 = vst [vmem:[#allocation98_spill] sm:$0xff] %v5853_v50  ;;  %v5879_v18 = vsel %vm8720_vm3, %v840_v28, -1e+30  ;;  %1241 = vmax.xlane.f32.xlu0 %v5888_v7  ;;  %v5900_v9 = vld [vmem:[#allocation2 + $0x98] sm:$0xff]  ;;  %v5903_v57 = vmax.f32 %v5894_v10, %v1156_v36  ;;  %v1160_v28 = vpop.xlane.xlu1 %1159  ;;  %v5908_v42 = vmax.f32 %v5898_v29, %v1158_v39  ;;  %v5931_v36 = vld [vmem:[#allocation2 + $0xb0] sm:$0xff] }
 0x206   :  { %8713 = vst [vmem:[#allocation99_spill] sm:$0xff] %v5857_v49  ;;  %1239 = vmax.xlane.f32.xlu2 %v5879_v18  ;;  %v780_v59 = vmul.f32 0.2, %v652_v26  ;;  %vm716_vm8 = vcmp.ge.f32.partialorder %v652_v26, 0.0  ;;  %v843_v17 = vsel %vm715_vm14, %v651_v15, %v779_v23  ;;  %v5911_v49 = vmax.f32 %v5900_v9, %v1160_v28  ;;  %vm8734_vm14 = vmmov %vm8722_vm4  ;;  %v5926_v23 = vld [vmem:[#allocation2 + $0xa0] sm:$0xff] }
 0x207   :  { %8714 = vst [vmem:[#allocation100_spill] sm:$0xff] %v5859_v25  ;;  %v5915_v25 = vsel %vm5371_vm15, %v843_v17, -1e+30 }
 0x208   :  { %8715 = vst [vmem:[#allocation101_spill] sm:$0xff] %v5864_v54 }
 0x209   :  { %2480 = vst.msk [vmem:[#allocation2 + $0x70] sm:$0xff] %vm8717_vm10, %v5864_v54  ;;  %vm8723_vm10 = vmmov %vm8722_vm4 }
 0x20a   :  { %8718 = vst [vmem:[#allocation102_spill] sm:$0xff] %v5872_v38  ;;  %v1164_v39 = vpop.xlane.xlu0 %1163 }
 0x20b   :  { %8719 = vst [vmem:[#allocation103_spill] sm:$0xff] %v5875_v4 }
 0x20c   :  { %8721 = vst [vmem:[#allocation104_spill] sm:$0xff] %v5879_v18 }
 0x20d   :  { %2481 = vst.msk [vmem:[#allocation2 + $0x78] sm:$0xff] %vm8722_vm4, %v5872_v38  ;;  %v1166_v28 = vpop.xlane.xlu1 %1165 }
 0x20e   :  { %2482 = vst.msk [vmem:[#allocation2 + $0x80] sm:$0xff] %vm8723_vm10, %v5875_v4  ;;  %vm8733_vm10 = vmmov %vm8722_vm4  ;;  %1245 = vmax.xlane.f32.xlu2 %v5915_v25 }
 0x20f   :  { %8724 = vst [vmem:[#allocation105_spill] sm:$0xff] %v5888_v7  ;;  %v5974_v7 = vld [vmem:[#allocation2 + $0xe0] sm:$0xff] }
 0x210   :  { %8725 = vst [vmem:[#allocation106_spill] sm:$0xff] %v5892_v41  ;;  %v844_v41 = vsel %vm716_vm8, %v652_v26, %v780_v59  ;;  %v1162_v26 = vpop.xlane.xlu2 %1161  ;;  %v5929_v59 = vld [vmem:[#allocation2 + $0xa8] sm:$0xff]  ;;  %vm8740_vm8 = vmmov %vm8722_vm4 }
 0x211   :  { %8726 = vst [vmem:[#allocation107_spill] sm:$0xff] %v5894_v10  ;;  %v5924_v15 = vsel %vm5383_vm2, %v844_v41, -1e+30  ;;  %v5934_v17 = vmax.f32 %v5926_v23, %v1162_v26  ;;  %v5939_v41 = vmax.f32 %v5929_v59, %v1164_v39  ;;  %v5969_v10 = vld [vmem:[#allocation2 + $0xd0] sm:$0xff] }
 0x212   :  { %8727 = vst [vmem:[#allocation108_spill] sm:$0xff] %v5898_v29  ;;  %1247 = vmax.xlane.f32.xlu0 %v5924_v15  ;;  %v5950_v29 = vld [vmem:[#allocation2 + $0xc0] sm:$0xff]  ;;  %v1170_v39 = vpop.xlane.xlu0 %1169 }
 0x213   :  { %8728 = vst [vmem:[#allocation109_spill] sm:$0xff] %v5900_v9 }
 0x214   :  { %8729 = vst [vmem:[#allocation110_spill] sm:$0xff] %v5903_v57 }
 0x215   :  { %2483 = vst.msk [vmem:[#allocation2 + $0x88] sm:$0xff] %vm8722_vm4, %v5903_v57 }
 0x216   :  { %8730 = vst [vmem:[#allocation111_spill] sm:$0xff] %v5908_v42 }
 0x217   :  { %8731 = vst [vmem:[#allocation112_spill] sm:$0xff] %v5911_v49 }
 0x218   :  { %8732 = vst [vmem:[#allocation113_spill] sm:$0xff] %v5915_v25  ;;  %v5942_v25 = vmax.f32 %v5931_v36, %v1166_v28  ;;  %v1168_v26 = vpop.xlane.xlu2 %1167  ;;  %v5960_v28 = vmax.f32 %v5950_v29, %v1170_v39 }
 0x219   :  { %2484 = vst.msk [vmem:[#allocation2 + $0x90] sm:$0xff] %vm8733_vm10, %v5908_v42  ;;  %vm8743_vm10 = vmmov %vm8722_vm4 }
 0x21a   :  { %2485 = vst.msk [vmem:[#allocation2 + $0x98] sm:$0xff] %vm8734_vm14, %v5911_v49  ;;  %vm8748_vm14 = vmmov %vm8722_vm4 }
 0x21b   :  { %8735 = vst [vmem:[#allocation114_spill] sm:$0xff] %v5924_v15  ;;  %v5948_v15 = vld [vmem:[#allocation2 + $0xb8] sm:$0xff] }
 0x21c   :  { %8736 = vst [vmem:[#allocation115_spill] sm:$0xff] %v5926_v23  ;;  %v5952_v23 = vld [vmem:[#allocation2 + $0xc8] sm:$0xff]  ;;  %v5955_v9 = vmax.f32 %v5948_v15, %v1168_v26  ;;  %1507 = vperm.xlu1 %4113, %v5663_v61  }
 0x21d   :  { %8737 = vst [vmem:[#allocation116_spill] sm:$0xff] %v5929_v59  ;;  %v1172_v59 = vpop.xlane.xlu1 %1171 }
 0x21e   :  { %8738 = vst [vmem:[#allocation117_spill] sm:$0xff] %v5931_v36  ;;  %v5963_v36 = vmax.f32 %v5952_v23, %v1172_v59  ;;  %v1176_v59 = vpop.xlane.xlu0 %1175 }
 0x21f   :  { %8739 = vst [vmem:[#allocation118_spill] sm:$0xff] %v5934_v17 }
 0x220   :  { %2486 = vst.msk [vmem:[#allocation2 + $0xa0] sm:$0xff] %vm8740_vm8, %v5934_v17  ;;  %vm8751_vm8 = vmmov %vm8722_vm4  ;;  %v1174_v26 = vpop.xlane.xlu2 %1173 }
 0x221   :  { %8741 = vst [vmem:[#allocation119_spill] sm:$0xff] %v5939_v41  ;;  %v5977_v39 = vmax.f32 %v5969_v10, %v1174_v26  ;;  %v5993_v26 = vld [vmem:[#allocation2 + $0xe8] sm:$0xff] }
 0x222   :  { %8742 = vst [vmem:[#allocation120_spill] sm:$0xff] %v5942_v25 }
 0x223   :  { %2487 = vst.msk [vmem:[#allocation2 + $0xa8] sm:$0xff] %vm8722_vm4, %v5939_v41 }
 0x224   :  { %2488 = vst.msk [vmem:[#allocation2 + $0xb0] sm:$0xff] %vm8743_vm10, %v5942_v25  ;;  %vm8756_vm10 = vmmov %vm8722_vm4  ;;  %1522 = vperm.xlu1 %4113, %v5691_v56  }
 0x225   :  { %8744 = vst [vmem:[#allocation121_spill] sm:$0xff] %v5948_v15  ;;  %v5972_v15 = vld [vmem:[#allocation2 + $0xd8] sm:$0xff] }
 0x226   :  { %8745 = vst [vmem:[#allocation122_spill] sm:$0xff] %v5950_v29  ;;  %v1178_v29 = vpop.xlane.xlu1 %1177  ;;  %1517 = vperm.xlu0 %4112, %v5700_v35   ;;  %1512 = vperm.xlu2 %4114, %v5652_v14  }
 0x227   :  { %8746 = vst [vmem:[#allocation123_spill] sm:$0xff] %v5952_v23  ;;  %v5982_v23 = vmax.f32 %v5972_v15, %v1176_v59  ;;  %v5985_v50 = vmax.f32 %v5974_v7, %v1178_v29  ;;  %v5996_v59 = vld [vmem:[#allocation2 + $0xf0] sm:$0xff] }
 0x228   :  { %8747 = vst [vmem:[#allocation124_spill] sm:$0xff] %v5955_v9 }
 0x229   :  { %2489 = vst.msk [vmem:[#allocation2 + $0xb8] sm:$0xff] %vm8748_vm14, %v5955_v9  ;;  %vm8759_vm14 = vmmov %vm8722_vm4 }
 0x22a   :  { %8749 = vst [vmem:[#allocation125_spill] sm:$0xff] %v5960_v28 }
 0x22b   :  { %8750 = vst [vmem:[#allocation126_spill] sm:$0xff] %v5963_v36 }
 0x22c   :  { %2490 = vst.msk [vmem:[#allocation2 + $0xc0] sm:$0xff] %vm8751_vm8, %v5960_v28  ;;  %vm8760_vm8 = vmmov %vm8722_vm4  ;;  %1537 = vperm.xlu1 %4113, %v5745_v43  }
 0x22d   :  { %2491 = vst.msk [vmem:[#allocation2 + $0xc8] sm:$0xff] %vm8722_vm4, %v5963_v36 }
 0x22e   :  { %8752 = vst [vmem:[#allocation127_spill] sm:$0xff] %v5969_v10  ;;  %v1180_v10 = vpop.xlane.xlu2 %1179  ;;  %v1184_v18 = vpop.xlane.xlu1 %1183  ;;  %1527 = vperm.xlu0 %4112, %v5703_v62   ;;  %1532 = vperm.xlu2 %4114, %v5735_v6  }
 0x22f   :  { %8753 = vst [vmem:[#allocation128_spill] sm:$0xff] %v5972_v15  ;;  %v5998_v15 = vld [vmem:[#allocation2 + $0xf8] sm:$0xff]  ;;  %v6001_v29 = vmax.f32 %v5993_v26, %v1180_v10  ;;  %v6017_v10 = vld [vmem:[#allocation2 + $0x100] sm:$0xff] }
 0x230   :  { %8754 = vst [vmem:[#allocation129_spill] sm:$0xff] %v5974_v7  ;;  %v1182_v7 = vpop.xlane.xlu0 %1181  ;;  %v6009_v61 = vmax.f32 %v5998_v15, %v1184_v18 }
 0x231   :  { %8755 = vst [vmem:[#allocation130_spill] sm:$0xff] %v5977_v39  ;;  %v6006_v35 = vmax.f32 %v5996_v59, %v1182_v7  ;;  %v6020_v7 = vld [vmem:[#allocation2 + $0x108] sm:$0xff] }
 0x232   :  { %2492 = vst.msk [vmem:[#allocation2 + $0xd0] sm:$0xff] %vm8756_vm10, %v5977_v39  ;;  %vm8767_vm10 = vmmov %vm8722_vm4 }
 0x233   :  { %8757 = vst [vmem:[#allocation131_spill] sm:$0xff] %v5982_v23 }
 0x234   :  { %8758 = vst [vmem:[#allocation132_spill] sm:$0xff] %v5985_v50  ;;  %1552 = vperm.xlu1 %4113, %v5788_v53  }
 0x235   :  { %2493 = vst.msk [vmem:[#allocation2 + $0xd8] sm:$0xff] %vm8759_vm14, %v5982_v23  ;;  %vm8768_vm14 = vmmov %vm8722_vm4 }
 0x236   :  { %2494 = vst.msk [vmem:[#allocation2 + $0xe0] sm:$0xff] %vm8760_vm8, %v5985_v50  ;;  %v1190_v56 = vpop.xlane.xlu1 %1189  ;;  %vm8773_vm8 = vmmov %vm8722_vm4  ;;  %1542 = vperm.xlu0 %4112, %v5748_v12   ;;  %1547 = vperm.xlu2 %4114, %v5778_v40  }
 0x237   :  { %8761 = vst [vmem:[#allocation133_spill] sm:$0xff] %v5993_v26  ;;  %v1186_v26 = vpop.xlane.xlu2 %1185 }
 0x238   :  { %8762 = vst [vmem:[#allocation134_spill] sm:$0xff] %v5996_v59  ;;  %v6022_v59 = vld [vmem:[#allocation2 + $0x110] sm:$0xff]  ;;  %v6025_v18 = vmax.f32 %v6017_v10, %v1186_v26  ;;  %v6041_v26 = vld [vmem:[#allocation2 + $0x118] sm:$0xff] }
 0x239   :  { %8763 = vst [vmem:[#allocation135_spill] sm:$0xff] %v5998_v15  ;;  %v1188_v15 = vpop.xlane.xlu0 %1187  ;;  %v6033_v62 = vmax.f32 %v6022_v59, %v1190_v56 }
 0x23a   :  { %8764 = vst [vmem:[#allocation136_spill] sm:$0xff] %v6001_v29  ;;  %v6030_v6 = vmax.f32 %v6020_v7, %v1188_v15  ;;  %v6044_v15 = vld [vmem:[#allocation2 + $0x120] sm:$0xff] }
 0x23b   :  { %2495 = vst.msk [vmem:[#allocation2 + $0xe8] sm:$0xff] %vm8722_vm4, %v6001_v29 }
 0x23c   :  { %8765 = vst [vmem:[#allocation137_spill] sm:$0xff] %v6006_v35  ;;  %1567 = vperm.xlu1 %4113, %v5831_v33  }
 0x23d   :  { %8766 = vst [vmem:[#allocation138_spill] sm:$0xff] %v6009_v61 }
 0x23e   :  { %2496 = vst.msk [vmem:[#allocation2 + $0xf0] sm:$0xff] %vm8767_vm10, %v6006_v35  ;;  %vm8776_vm10 = vmmov %vm8722_vm4  ;;  %v1196_v43 = vpop.xlane.xlu1 %1195  ;;  %1557 = vperm.xlu0 %4112, %v5791_v21   ;;  %1562 = vperm.xlu2 %4114, %v5821_v5  }
 0x23f   :  { %2497 = vst.msk [vmem:[#allocation2 + $0xf8] sm:$0xff] %vm8768_vm14, %v6009_v61  ;;  %vm8781_vm14 = vmmov %vm8722_vm4 }
 0x240   :  { %8769 = vst [vmem:[#allocation139_spill] sm:$0xff] %v6017_v10  ;;  %v1192_v10 = vpop.xlane.xlu2 %1191 }
 0x241   :  { %8770 = vst [vmem:[#allocation140_spill] sm:$0xff] %v6020_v7  ;;  %v6046_v7 = vld [vmem:[#allocation2 + $0x128] sm:$0xff]  ;;  %v6049_v56 = vmax.f32 %v6041_v26, %v1192_v10  ;;  %v6065_v10 = vld [vmem:[#allocation2 + $0x130] sm:$0xff] }
 0x242   :  { %8771 = vst [vmem:[#allocation141_spill] sm:$0xff] %v6022_v59  ;;  %v1194_v59 = vpop.xlane.xlu0 %1193  ;;  %v6057_v12 = vmax.f32 %v6046_v7, %v1196_v43 }
 0x243   :  { %8772 = vst [vmem:[#allocation142_spill] sm:$0xff] %v6025_v18  ;;  %v6054_v40 = vmax.f32 %v6044_v15, %v1194_v59  ;;  %v6068_v59 = vld [vmem:[#allocation2 + $0x138] sm:$0xff] }
 0x244   :  { %2498 = vst.msk [vmem:[#allocation2 + $0x100] sm:$0xff] %vm8773_vm8, %v6025_v18  ;;  %vm8784_vm8 = vmmov %vm8722_vm4  ;;  %1582 = vperm.xlu1 %4113, %v5872_v38  }
 0x245   :  { %8774 = vst [vmem:[#allocation143_spill] sm:$0xff] %v6030_v6 }
 0x246   :  { %8775 = vst [vmem:[#allocation144_spill] sm:$0xff] %v6033_v62  ;;  %v1202_v53 = vpop.xlane.xlu1 %1201  ;;  %1572 = vperm.xlu0 %4112, %v5834_v19   ;;  %1577 = vperm.xlu2 %4114, %v5864_v54  }
 0x247   :  { %2499 = vst.msk [vmem:[#allocation2 + $0x108] sm:$0xff] %vm8722_vm4, %v6030_v6 }
 0x248   :  { %2500 = vst.msk [vmem:[#allocation2 + $0x110] sm:$0xff] %vm8776_vm10, %v6033_v62  ;;  %vm8789_vm10 = vmmov %vm8722_vm4 }
 0x249   :  { %8777 = vst [vmem:[#allocation145_spill] sm:$0xff] %v6041_v26  ;;  %v1198_v26 = vpop.xlane.xlu2 %1197 }
 0x24a   :  { %8778 = vst [vmem:[#allocation146_spill] sm:$0xff] %v6044_v15  ;;  %v6070_v15 = vld [vmem:[#allocation2 + $0x140] sm:$0xff]  ;;  %v6073_v43 = vmax.f32 %v6065_v10, %v1198_v26  ;;  %v6089_v26 = vld [vmem:[#allocation2 + $0x148] sm:$0xff] }
 0x24b   :  { %8779 = vst [vmem:[#allocation147_spill] sm:$0xff] %v6046_v7  ;;  %v1200_v7 = vpop.xlane.xlu0 %1199  ;;  %v6081_v21 = vmax.f32 %v6070_v15, %v1202_v53 }
 0x24c   :  { %8780 = vst [vmem:[#allocation148_spill] sm:$0xff] %v6049_v56  ;;  %v6078_v5 = vmax.f32 %v6068_v59, %v1200_v7  ;;  %v6092_v7 = vld [vmem:[#allocation2 + $0x150] sm:$0xff]  ;;  %1597 = vperm.xlu1 %4113, %v5908_v42  }
 0x24d   :  { %2501 = vst.msk [vmem:[#allocation2 + $0x118] sm:$0xff] %vm8781_vm14, %v6049_v56  ;;  %vm8792_vm14 = vmmov %vm8722_vm4 }
 0x24e   :  { %8782 = vst [vmem:[#allocation149_spill] sm:$0xff] %v6054_v40  ;;  %v1208_v33 = vpop.xlane.xlu1 %1207  ;;  %1587 = vperm.xlu0 %4112, %v5875_v4   ;;  %1592 = vperm.xlu2 %4114, %v5903_v57  }
 0x24f   :  { %8783 = vst [vmem:[#allocation150_spill] sm:$0xff] %v6057_v12 }
 0x250   :  { %2502 = vst.msk [vmem:[#allocation2 + $0x120] sm:$0xff] %vm8784_vm8, %v6054_v40  ;;  %vm8793_vm8 = vmmov %vm8722_vm4 }
 0x251   :  { %2503 = vst.msk [vmem:[#allocation2 + $0x128] sm:$0xff] %vm8722_vm4, %v6057_v12 }
 0x252   :  { %8785 = vst [vmem:[#allocation151_spill] sm:$0xff] %v6065_v10  ;;  %v1204_v10 = vpop.xlane.xlu2 %1203 }
 0x253   :  { %8786 = vst [vmem:[#allocation152_spill] sm:$0xff] %v6068_v59  ;;  %v6094_v59 = vld [vmem:[#allocation2 + $0x158] sm:$0xff]  ;;  %v6097_v53 = vmax.f32 %v6089_v26, %v1204_v10  ;;  %v6113_v10 = vld [vmem:[#allocation2 + $0x160] sm:$0xff] }
 0x254   :  { %8787 = vst [vmem:[#allocation153_spill] sm:$0xff] %v6070_v15  ;;  %v1206_v15 = vpop.xlane.xlu0 %1205  ;;  %v6105_v19 = vmax.f32 %v6094_v59, %v1208_v33  ;;  %1612 = vperm.xlu1 %4113, %v5939_v41  }
 0x255   :  { %8788 = vst [vmem:[#allocation154_spill] sm:$0xff] %v6073_v43  ;;  %v6102_v54 = vmax.f32 %v6092_v7, %v1206_v15  ;;  %v6116_v15 = vld [vmem:[#allocation2 + $0x168] sm:$0xff] }
 0x256   :  { %2504 = vst.msk [vmem:[#allocation2 + $0x130] sm:$0xff] %vm8789_vm10, %v6073_v43  ;;  %vm8800_vm10 = vmmov %vm8722_vm4  ;;  %v1214_v38 = vpop.xlane.xlu1 %1213  ;;  %1602 = vperm.xlu0 %4112, %v5911_v49   ;;  %1607 = vperm.xlu2 %4114, %v5934_v17  }
 0x257   :  { %8790 = vst [vmem:[#allocation155_spill] sm:$0xff] %v6078_v5 }
 0x258   :  { %8791 = vst [vmem:[#allocation156_spill] sm:$0xff] %v6081_v21 }
 0x259   :  { %2505 = vst.msk [vmem:[#allocation2 + $0x138] sm:$0xff] %vm8792_vm14, %v6078_v5  ;;  %vm8801_vm14 = vmmov %vm8722_vm4 }
 0x25a   :  { %2506 = vst.msk [vmem:[#allocation2 + $0x140] sm:$0xff] %vm8793_vm8, %v6081_v21  ;;  %vm8806_vm8 = vmmov %vm8722_vm4 }
 0x25b   :  { %8794 = vst [vmem:[#allocation157_spill] sm:$0xff] %v6089_v26  ;;  %v1210_v26 = vpop.xlane.xlu2 %1209 }
 0x25c   :  { %8795 = vst [vmem:[#allocation158_spill] sm:$0xff] %v6092_v7  ;;  %v6118_v7 = vld [vmem:[#allocation2 + $0x170] sm:$0xff]  ;;  %v6121_v33 = vmax.f32 %v6113_v10, %v1210_v26  ;;  %v6137_v26 = vld [vmem:[#allocation2 + $0x178] sm:$0xff]  ;;  %1627 = vperm.xlu1 %4113, %v5960_v28  }
 0x25d   :  { %8796 = vst [vmem:[#allocation159_spill] sm:$0xff] %v6094_v59  ;;  %v1212_v59 = vpop.xlane.xlu0 %1211  ;;  %v6129_v4 = vmax.f32 %v6118_v7, %v1214_v38  ;;  %v6180_v28 = vld [vmem:[%s8309_s4 + $0x70] sm:$0xff] }
 0x25e   :  { %8797 = vst [vmem:[#allocation160_spill] sm:$0xff] %v6097_v53  ;;  %v6126_v57 = vmax.f32 %v6116_v15, %v1212_v59  ;;  %v6140_v59 = vld [vmem:[#allocation2 + $0x180] sm:$0xff]  ;;  %v1220_v42 = vpop.xlane.xlu1 %1219  ;;  %1617 = vperm.xlu0 %4112, %v5942_v25   ;;  %1622 = vperm.xlu2 %4114, %v5955_v9   ;;  %v6174_v9 = vld [vmem:[%s8309_s4 + $0x78] sm:$0xff] }
 0x25f   :  { %2507 = vst.msk [vmem:[#allocation2 + $0x148] sm:$0xff] %vm8722_vm4, %v6097_v53  ;;  %v6220_v25 = vld [vmem:[%s8309_s4 + $0x60] sm:$0xff] }
 0x260   :  { %8798 = vst [vmem:[#allocation161_spill] sm:$0xff] %v6102_v54 }
 0x261   :  { %8799 = vst [vmem:[#allocation162_spill] sm:$0xff] %v6105_v19 }
 0x262   :  { %2508 = vst.msk [vmem:[#allocation2 + $0x150] sm:$0xff] %vm8800_vm10, %v6102_v54  ;;  %vm8809_vm10 = vmmov %vm8722_vm4 }
 0x263   :  { %2509 = vst.msk [vmem:[#allocation2 + $0x158] sm:$0xff] %vm8801_vm14, %v6105_v19  ;;  %vm8814_vm14 = vmmov %vm8722_vm4 }
 0x264   :  { %8802 = vst [vmem:[#allocation163_spill] sm:$0xff] %v6113_v10  ;;  %v1216_v10 = vpop.xlane.xlu2 %1215  ;;  %1642 = vperm.xlu1 %4113, %v5982_v23  }
 0x265   :  { %8803 = vst [vmem:[#allocation164_spill] sm:$0xff] %v6116_v15  ;;  %v6142_v15 = vld [vmem:[#allocation2 + $0x188] sm:$0xff]  ;;  %v6145_v38 = vmax.f32 %v6137_v26, %v1216_v10  ;;  %v6161_v10 = vld [vmem:[#allocation2 + $0x190] sm:$0xff] }
 0x266   :  { %8804 = vst [vmem:[#allocation165_spill] sm:$0xff] %v6118_v7  ;;  %v1218_v7 = vpop.xlane.xlu0 %1217  ;;  %v6153_v49 = vmax.f32 %v6142_v15, %v1220_v42  ;;  %v1226_v41 = vpop.xlane.xlu1 %1225  ;;  %1632 = vperm.xlu0 %4112, %v5963_v36   ;;  %1637 = vperm.xlu2 %4114, %v5977_v39   ;;  %v6215_v39 = vld [vmem:[%s8309_s4 + $0x68] sm:$0xff] }
 0x267   :  { %8805 = vst [vmem:[#allocation166_spill] sm:$0xff] %v6121_v33  ;;  %v6150_v17 = vmax.f32 %v6140_v59, %v1218_v7  ;;  %v6164_v7 = vld [vmem:[#allocation2 + $0x198] sm:$0xff] }
 0x268   :  { %2510 = vst.msk [vmem:[#allocation2 + $0x160] sm:$0xff] %vm8806_vm8, %v6121_v33  ;;  %vm8817_vm8 = vmmov %vm8722_vm4 }
 0x269   :  { %8807 = vst [vmem:[#allocation167_spill] sm:$0xff] %v6126_v57 }
 0x26a   :  { %8808 = vst [vmem:[#allocation168_spill] sm:$0xff] %v6129_v4 }
 0x26b   :  { %2511 = vst.msk [vmem:[#allocation2 + $0x168] sm:$0xff] %vm8722_vm4, %v6126_v57 }
 0x26c   :  { %2512 = vst.msk [vmem:[#allocation2 + $0x170] sm:$0xff] %vm8809_vm10, %v6129_v4  ;;  %vm8540_vm10 = vcmp.lt.s32.totalorder %v4571_v2, 8  ;;  %1657 = vperm.xlu1 %4113, %v6006_v35  }
 0x26d   :  { %8810 = vst [vmem:[#allocation169_spill] sm:$0xff] %v6137_v26  ;;  %v1222_v26 = vpop.xlane.xlu2 %1221  ;;  %4009 = vmatpush.msk.msra.mxu1 %vm8540_vm10, %v6174_v9 }
 0x26e   :  { %8811 = vst [vmem:[#allocation170_spill] sm:$0xff] %v6140_v59  ;;  %v6166_v59 = vld [vmem:[#allocation2 + $0x1a0] sm:$0xff]  ;;  %v6169_v42 = vmax.f32 %v6161_v10, %v1222_v26  ;;  %v1232_v23 = vpop.xlane.xlu1 %1231  ;;  %1647 = vperm.xlu0 %4112, %v5985_v50   ;;  %1652 = vperm.xlu2 %4114, %v6001_v29   ;;  %v6263_v29 = vld [vmem:[#allocation2 + $0x1c8] sm:$0xff]  ;;  %v6265_v50 = vld [vmem:[#allocation2 + $0x1d0] sm:$0xff] }
 0x26f   :  { %8812 = vst [vmem:[#allocation171_spill] sm:$0xff] %v6142_v15  ;;  %v1224_v15 = vpop.xlane.xlu0 %1223  ;;  %4010 = vmatpush.msk.msra.mxu1 %vm8540_vm10, %v6180_v28 }
 0x270   :  { %8813 = vst [vmem:[#allocation172_spill] sm:$0xff] %v6145_v38  ;;  %v6185_v26 = vmax.f32 %v6164_v7, %v1224_v15 }
 0x271   :  { %2513 = vst.msk [vmem:[#allocation2 + $0x178] sm:$0xff] %vm8814_vm14, %v6145_v38  ;;  %vm8822_vm14 = vmmov %vm8722_vm4  ;;  %4011 = vmatpush.msk.msra.mxu1 %vm8540_vm10, %v6215_v39 }
 0x272   :  { %8815 = vst [vmem:[#allocation173_spill] sm:$0xff] %v6150_v17 }
 0x273   :  { %8816 = vst [vmem:[#allocation174_spill] sm:$0xff] %v6153_v49  ;;  %4012 = vmatpush.msk.msra.mxu1 %vm8540_vm10, %v6220_v25 }
 0x274   :  { %2514 = vst.msk [vmem:[#allocation2 + $0x180] sm:$0xff] %vm8817_vm8, %v6150_v17  ;;  %vm8825_vm8 = vmmov %vm8722_vm4  ;;  %1672 = vperm.xlu1 %4113, %v6030_v6  }
 0x275   :  { %2515 = vst.msk [vmem:[#allocation2 + $0x188] sm:$0xff] %vm8722_vm4, %v6153_v49  ;;  %v1228_v15 = vpop.xlane.xlu2 %1227  ;;  %4013 = vmatpush.msk.msra.mxu1 %vm8540_vm10, %v6237_v13 }
 0x276   :  { %8818 = vst [vmem:[#allocation175_spill] sm:$0xff] %v6161_v10  ;;  %v6188_v10 = vmax.f32 %v6166_v59, %v1226_v41  ;;  %v6202_v41 = vld [vmem:[#allocation2 + $0x1a8] sm:$0xff]  ;;  %v1238_v32 = vpop.xlane.xlu1 %1237  ;;  %1662 = vperm.xlu0 %4112, %v6009_v61   ;;  %1667 = vperm.xlu2 %4114, %v6025_v18   ;;  %v6319_v18 = vld [vmem:[#allocation2 + $0x1e0] sm:$0xff] }
 0x277   :  { %8819 = vst [vmem:[#allocation176_spill] sm:$0xff] %v6164_v7  ;;  %v6205_v7 = vld [vmem:[#allocation2 + $0x1b0] sm:$0xff]  ;;  %v6210_v36 = vmax.f32 %v6202_v41, %v1228_v15  ;;  %v1230_v14 = vpop.xlane.xlu0 %1229  ;;  %v6321_v61 = vld [vmem:[#allocation2 + $0x1e8] sm:$0xff] }
 0x278   :  { %8820 = vst [vmem:[#allocation177_spill] sm:$0xff] %v6166_v59  ;;  %v6207_v59 = vld [vmem:[#allocation2 + $0x1b8] sm:$0xff]  ;;  %v6228_v15 = vmax.f32 %v6205_v7, %v1230_v14  ;;  %v6248_v14 = vld [vmem:[%s8309_s4 + $0x50] sm:$0xff] }
 0x279   :  { %8821 = vst [vmem:[#allocation178_spill] sm:$0xff] %v6169_v42  ;;  %4014 = vmatpush.msk.msra.mxu1 %vm8540_vm10, %v6248_v14 }
 0x27a   :  { %2516 = vst.msk [vmem:[#allocation2 + $0x190] sm:$0xff] %vm8822_vm14, %v6169_v42  ;;  %vm8830_vm14 = vmmov %vm8722_vm4 }
 0x27b   :  { %8823 = vst [vmem:[#allocation179_spill] sm:$0xff] %v6185_v26 }
 0x27c   :  { %8824 = vst [vmem:[#allocation180_spill] sm:$0xff] %v6188_v10  ;;  %1687 = vperm.xlu1 %4113, %v6054_v40  }
 0x27d   :  { %2517 = vst.msk [vmem:[#allocation2 + $0x198] sm:$0xff] %vm8825_vm8, %v6185_v26  ;;  %vm8833_vm8 = vmmov %vm8722_vm4 }
 0x27e   :  { %2518 = vst.msk [vmem:[#allocation2 + $0x1a0] sm:$0xff] %vm8722_vm4, %v6188_v10  ;;  %v1244_v30 = vpop.xlane.xlu1 %1243  ;;  %1677 = vperm.xlu0 %4112, %v6033_v62   ;;  %1682 = vperm.xlu2 %4114, %v6049_v56   ;;  %v6375_v56 = vld [vmem:[#allocation2 + $0x1f8] sm:$0xff] }
 0x27f   :  { %8826 = vst [vmem:[#allocation181_spill] sm:$0xff] %v6202_v41  ;;  %v6231_v41 = vmax.f32 %v6207_v59, %v1232_v23  ;;  %v6252_v23 = vld [vmem:[#allocation2 + $0x1c0] sm:$0xff]  ;;  %v1236_v16 = vpop.xlane.xlu0 %1235 }
 0x280   :  { %8827 = vst [vmem:[#allocation182_spill] sm:$0xff] %v6205_v7  ;;  %v6260_v7 = vld [vmem:[%s8309_s4 + $0x48] sm:$0xff]  ;;  %v6284_v35 = vmax.f32 %v6263_v29, %v1236_v16  ;;  %v6304_v16 = vld [vmem:[%s8309_s4 + $0x30] sm:$0xff] }
 0x281   :  { %8828 = vst [vmem:[#allocation183_spill] sm:$0xff] %v6207_v59  ;;  %v1234_v59 = vpop.xlane.xlu2 %1233  ;;  %4015 = vmatpush.msk.msra.mxu1 %vm8540_vm10, %v6260_v7 }
 0x282   :  { %8829 = vst [vmem:[#allocation184_spill] sm:$0xff] %v6210_v36  ;;  %v6271_v31 = vmax.f32 %v6252_v23, %v1234_v59  ;;  %v6287_v59 = vmax.f32 %v6265_v50, %v1238_v32  ;;  %v6308_v32 = vld [vmem:[#allocation2 + $0x1d8] sm:$0xff] }
 0x283   :  { %2519 = vst.msk [vmem:[#allocation2 + $0x1a8] sm:$0xff] %vm8830_vm14, %v6210_v36  ;;  %vm8838_vm14 = vmmov %vm8722_vm4  ;;  %4016 = vmatpush.msk.msra.mxu1 %vm8540_vm10, %v6276_v20 }
 0x284   :  { %8831 = vst [vmem:[#allocation185_spill] sm:$0xff] %v6228_v15  ;;  %1702 = vperm.xlu1 %4113, %v6078_v5  }
 0x285   :  { %8832 = vst [vmem:[#allocation186_spill] sm:$0xff] %v6231_v41 }
 0x286   :  { %2520 = vst.msk [vmem:[#allocation2 + $0x1b0] sm:$0xff] %vm8833_vm8, %v6228_v15  ;;  %vm8841_vm8 = vmmov %vm8722_vm4  ;;  %1692 = vperm.xlu0 %4112, %v6057_v12   ;;  %1697 = vperm.xlu2 %4114, %v6073_v43  }
 0x287   :  { %2521 = vst.msk [vmem:[#allocation2 + $0x1b8] sm:$0xff] %vm8722_vm4, %v6231_v41  ;;  %v1242_v24 = vpop.xlane.xlu0 %1241 }
 0x288   :  { %8834 = vst [vmem:[#allocation187_spill] sm:$0xff] %v6252_v23  ;;  %v6293_v23 = vld [vmem:[%s8309_s4 + $0x38] sm:$0xff]  ;;  %v6340_v6 = vmax.f32 %v6319_v18, %v1242_v24  ;;  %v6364_v24 = vld [vmem:[#allocation2 + $0x1f0] sm:$0xff] }
 0x289   :  { %8835 = vst [vmem:[#allocation188_spill] sm:$0xff] %v6263_v29  ;;  %4017 = vmatpush.msk.msra.mxu1 %vm8540_vm10, %v6293_v23  ;;  %v6316_v29 = vld [vmem:[%s8309_s4 + $0x28] sm:$0xff] }
 0x28a   :  { %8836 = vst [vmem:[#allocation189_spill] sm:$0xff] %v6265_v50  ;;  %v1240_v50 = vpop.xlane.xlu2 %1239 }
 0x28b   :  { %8837 = vst [vmem:[#allocation190_spill] sm:$0xff] %v6271_v31  ;;  %4018 = vmatpush.msk.msra.mxu1 %vm8540_vm10, %v6304_v16  ;;  %v6327_v60 = vmax.f32 %v6308_v32, %v1240_v50  ;;  %v6343_v50 = vmax.f32 %v6321_v61, %v1244_v30  ;;  %v6360_v30 = vld [vmem:[%s8309_s4 + $0x10] sm:$0xff] }
 0x28c   :  { %2522 = vst.msk [vmem:[#allocation2 + $0x1c0] sm:$0xff] %vm8838_vm14, %v6271_v31  ;;  %vm8846_vm14 = vmmov %vm8722_vm4  ;;  %1717 = vperm.xlu1 %4113, %v6102_v54  }
 0x28d   :  { %8839 = vst [vmem:[#allocation191_spill] sm:$0xff] %v6284_v35  ;;  %4019 = vmatpush.msk.msra.mxu1 %vm8540_vm10, %v6316_v29 }
 0x28e   :  { %8840 = vst [vmem:[#allocation192_spill] sm:$0xff] %v6287_v59  ;;  %1707 = vperm.xlu0 %4112, %v6081_v21   ;;  %1712 = vperm.xlu2 %4114, %v6097_v53  }
 0x28f   :  { %2523 = vst.msk [vmem:[#allocation2 + $0x1c8] sm:$0xff] %vm8841_vm8, %v6284_v35  ;;  %4020 = vmatpush.msk.msra.mxu1 %vm8540_vm10, %v6332_v37  ;;  %vm8849_vm8 = vmmov %vm8722_vm4  ;;  %v1248_v52 = vpop.xlane.xlu0 %1247 }
 0x290   :  { %2524 = vst.msk [vmem:[#allocation2 + $0x1d0] sm:$0xff] %vm8722_vm4, %v6287_v59  ;;  %v6394_v40 = vmax.f32 %v6375_v56, %v1248_v52  ;;  %v8856_v52 = vmov 0 }
 0x291   :  { %8842 = vst [vmem:[#allocation193_spill] sm:$0xff] %v6308_v32  ;;  %v6349_v32 = vld [vmem:[%s8309_s4 + $0x18] sm:$0xff] }
 0x292   :  { %8843 = vst [vmem:[#allocation194_spill] sm:$0xff] %v6319_v18  ;;  %4021 = vmatpush.msk.msra.mxu1 %vm8540_vm10, %v6349_v32  ;;  %v6372_v18 = vld [vmem:[%s8309_s4 + $0x8] sm:$0xff] }
 0x293   :  { %8844 = vst [vmem:[#allocation195_spill] sm:$0xff] %v6321_v61  ;;  %v1246_v61 = vpop.xlane.xlu2 %1245 }
 0x294   :  { %8845 = vst [vmem:[#allocation196_spill] sm:$0xff] %v6327_v60  ;;  %4022 = vmatpush.msk.msra.mxu1 %vm8540_vm10, %v6360_v30  ;;  %v6381_v62 = vmax.f32 %v6364_v24, %v1246_v61  ;;  %1732 = vperm.xlu1 %4113, %v6126_v57  }
 0x295   :  { %2525 = vst.msk [vmem:[#allocation2 + $0x1d8] sm:$0xff] %vm8846_vm14, %v6327_v60  ;;  %vm8853_vm14 = vmmov %vm8722_vm4 }
 0x296   :  { %8847 = vst [vmem:[#allocation197_spill] sm:$0xff] %v6340_v6  ;;  %4023 = vmatpush.msk.msra.mxu1 %vm8540_vm10, %v6372_v18  ;;  %1722 = vperm.xlu0 %4112, %v6105_v19  }
 0x297   :  { %8848 = vst [vmem:[#allocation198_spill] sm:$0xff] %v6343_v50  ;;  %1727 = vperm.xlu2 %4114, %v6121_v33  }
 0x298   :  { %2526 = vst.msk [vmem:[#allocation2 + $0x1e0] sm:$0xff] %vm8849_vm8, %v6340_v6  ;;  %4024 = vmatpush.msk.msra.mxu1 %vm8540_vm10, %v6386_v46  ;;  %vm8855_vm8 = vmmov %vm8722_vm4  ;;  %v1518_v53 = vpop.permute.xlu0 %1517  ;;  %vm3110_vm10 = vcmp.ge.s32.totalorder %v4571_v2, 24 }
 0x299   :  { %2527 = vst.msk [vmem:[#allocation2 + $0x1e8] sm:$0xff] %vm8722_vm4, %v6343_v50  ;;  %vm2665_vm4 = vcmp.ge.s32.totalorder %v4571_v2, 8 }
 0x29a   :  { %8850 = vst [vmem:[#allocation199_spill] sm:$0xff] %v6364_v24 }
 0x29b   :  { %8851 = vst [vmem:[#allocation200_spill] sm:$0xff] %v6375_v56  ;;  %v1513_v61 = vpop.permute.xlu2 %1512  ;;  %v1508_v56 = vpop.permute.xlu1 %1507 }
 0x29c   :  { %8852 = vst [vmem:[#allocation201_spill] sm:$0xff] %v6381_v62  ;;  %v1826_v54 = vsub.f32 %v5150_v55, %v1513_v61  ;;  %1747 = vperm.xlu1 %4113, %v6150_v17  }
 0x29d   :  { %2528 = vst.msk [vmem:[#allocation2 + $0x1f0] sm:$0xff] %vm8853_vm14, %v6381_v62  ;;  %vm2666_vm14 = vcmp.lt.s32.totalorder %v4571_v2, 16 }
 0x29e   :  { %8854 = vst [vmem:[#allocation202_spill] sm:$0xff] %v6394_v40  ;;  %vm6408_vm2 = vmand %vm2665_vm4, %vm2666_vm14  ;;  %1737 = vperm.xlu0 %4112, %v6129_v4   ;;  %vm2913_vm4 = vcmp.lt.s32.totalorder %v4571_v2, 24 }
 0x29f   :  { %2529 = vst.msk [vmem:[#allocation2 + $0x1f8] sm:$0xff] %vm8855_vm8, %v6394_v40  ;;  %v8857_v52 = vsel %vm6408_vm2, 4294967295, %v8856_v52  ;;  %3977 = vmatpush.msk.msra.mxu0 %vm6408_vm2, %v6174_v9  ;;  %v1825_v40 = vsub.f32 %v5164_v11, %v1508_v56  ;;  %v1891_v56 = vmul.f32 1.442695, %v1826_v54  ;;  %1742 = vperm.xlu2 %4114, %v6145_v38   ;;  %v1827_v54 = vsub.f32 %v5218_v51, %v1518_v53 }
 0x2a0   :  { %8858 = vst [vmem:[#allocation203_spill] sm:$0xff] %v8857_v52  ;;  %vm2912_vm8 = vcmp.ge.s32.totalorder %v4571_v2, 16 }
 0x2a1   :  { %3978 = vmatpush.msk.msra.mxu0 %vm6408_vm2, %v6180_v28  ;;  %v1889_v5 = vmul.f32 1.442695, %v1825_v40  ;;  %v1893_v38 = vmul.f32 1.442695, %v1827_v54  ;;  %vm6498_vm14 = vmand %vm2912_vm8, %vm2913_vm4  ;;  %vm8862_vm8 = vnez %v8576_v47  ;;  %vm8863_vm4 = vnez %v8564_v34 }
 0x2a2   :  { %4041 = vmatpush.msk.msra.mxu2 %vm6498_vm14, %v6174_v9 }
 0x2a3   :  { %v6416_v24 = vpop.permute.xlu2 %1532  ;;  %3979 = vmatpush.msk.msra.mxu0 %vm6408_vm2, %v6215_v39  ;;  %4119 = vpow2.f32 %v1889_v5  ;;  %v1523_v40 = vpop.permute.xlu1 %1522 }
 0x2a4   :  { %v1528_v5 = vpop.permute.xlu0 %1527  ;;  %4121 = vpow2.f32 %v1891_v56  ;;  %v1828_v56 = vsub.f32 %v5205_v45, %v1523_v40  ;;  %1762 = vperm.xlu1 %4113, %v6185_v26   ;;  %v8859_v45 = vmov 0  ;;  %4042 = vmatpush.msk.msra.mxu2 %vm6498_vm14, %v6180_v28 }
 0x2a5   :  { %3980 = vmatpush.msk.msra.mxu0 %vm6408_vm2, %v6220_v25  ;;  %4123 = vpow2.f32 %v1893_v38  ;;  %v8860_v45 = vsel %vm6498_vm14, 4294967295, %v8859_v45 }
 0x2a6   :  { %1752 = vperm.xlu0 %4112, %v6153_v49   ;;  %v1895_v38 = vmul.f32 1.442695, %v1828_v56  ;;  %8861 = vst [vmem:[#allocation204_spill] sm:$0xff] %v8860_v45  ;;  %v1829_v56 = vsub.f32 %v5182_v22, %v1528_v5  ;;  %4043 = vmatpush.msk.msra.mxu2 %vm6498_vm14, %v6215_v39 }
 0x2a7   :  { %3981 = vmatpush.msk.msra.mxu0 %vm6408_vm2, %v6237_v13  ;;  %1757 = vperm.xlu2 %4114, %v6169_v42   ;;  %v8867_v42 = vld [vmem:[#allocation15_spill] sm:$0xff] }
 0x2a8   :  { %4125 = vpow2.f32 %v1895_v38  ;;  %4044 = vmatpush.msk.msra.mxu2 %vm6498_vm14, %v6220_v25  ;;  %v1830_v38 = vsub.f32 %v5249_v8, %v6416_v24 }
 0x2a9   :  { %3982 = vmatpush.msk.msra.mxu0 %vm6408_vm2, %v6248_v14  ;;  %v6444_v55 = vpop.eup %4119 }
 0x2aa   :  { %4025 = vmatmul.msk.f32.vlgmr.msra.gmra.mxu1 %vm5157_vm1, %v6444_v55  ;;  %v6469_v51 = vpop.eup %4121  ;;  %4045 = vmatpush.msk.msra.mxu2 %vm6498_vm14, %v6237_v13 }
 0x2ab   :  { %v6435_v11 = vpop.permute.xlu2 %1547  ;;  %3983 = vmatpush.msk.msra.mxu0 %vm6408_vm2, %v6260_v7  ;;  %v6463_v57 = vpop.permute.xlu1 %1537 }
 0x2ac   :  { %v6471_v53 = vpop.permute.xlu0 %1542  ;;  %v6505_v40 = vpop.eup %4123  ;;  %1777 = vperm.xlu1 %4113, %v6228_v15   ;;  %4046 = vmatpush.msk.msra.mxu2 %vm6498_vm14, %v6248_v14 }
 0x2ad   :  { %3984 = vmatpush.msk.msra.mxu0 %vm6408_vm2, %v6276_v20 }
 0x2ae   :  { %1767 = vperm.xlu0 %4112, %v6188_v10   ;;  %v6533_v22 = vpop.eup %4125  ;;  %4047 = vmatpush.msk.msra.mxu2 %vm6498_vm14, %v6260_v7 }
 0x2af   :  { %3985 = vmatpush.msk.msra.mxu0 %vm6408_vm2, %v6293_v23  ;;  %1772 = vperm.xlu2 %4114, %v6210_v36   ;;  %v1897_v36 = vmul.f32 1.442695, %v1829_v56 }
 0x2b0   :  { %4048 = vmatpush.msk.msra.mxu2 %vm6498_vm14, %v6276_v20 }
 0x2b1   :  { %3986 = vmatpush.msk.msra.mxu0 %vm6408_vm2, %v6304_v16  ;;  %4127 = vpow2.f32 %v1897_v36 }
 0x2b2   :  { %4026 = vmatmul.msk.f32.gmra.mxu1 %vm5142_vm13, %v6469_v51  ;;  %4049 = vmatpush.msk.msra.mxu2 %vm6498_vm14, %v6293_v23 }
 0x2b3   :  { %v6458_v61 = vpop.permute.xlu2 %1562  ;;  %3987 = vmatpush.msk.msra.mxu0 %vm6408_vm2, %v6316_v29  ;;  %v6490_v17 = vpop.permute.xlu1 %1552 }
 0x2b4   :  { %v6507_v26 = vpop.permute.xlu0 %1557  ;;  %1792 = vperm.xlu1 %4113, %v6284_v35   ;;  %4050 = vmatpush.msk.msra.mxu2 %vm6498_vm14, %v6304_v16 }
 0x2b5   :  { %3988 = vmatpush.msk.msra.mxu0 %vm6408_vm2, %v6332_v37 }
 0x2b6   :  { %1782 = vperm.xlu0 %4112, %v6231_v41   ;;  %4051 = vmatpush.msk.msra.mxu2 %vm6498_vm14, %v6316_v29 }
 0x2b7   :  { %3989 = vmatpush.msk.msra.mxu0 %vm6408_vm2, %v6349_v32  ;;  %1787 = vperm.xlu2 %4114, %v6271_v31   ;;  %v1899_v31 = vmul.f32 1.442695, %v1830_v38  ;;  %v6561_v8 = vpop.eup %4127  ;;  %v8864_v38 = vld [vmem:[#allocation11_spill] sm:$0xff] }
 0x2b8   :  { %v1831_v35 = vsub.f32 %v8864_v38, %v6463_v57  ;;  %4052 = vmatpush.msk.msra.mxu2 %vm6498_vm14, %v6332_v37 }
 0x2b9   :  { %3990 = vmatpush.msk.msra.mxu0 %vm6408_vm2, %v6360_v30  ;;  %4129 = vpow2.f32 %v1899_v31 }
 0x2ba   :  { %4027 = vmatmul.msk.f32.gmra.mxu1 %vm5209_vm11, %v6505_v40  ;;  %v1901_v31 = vmul.f32 1.442695, %v1831_v35  ;;  %4053 = vmatpush.msk.msra.mxu2 %vm6498_vm14, %v6349_v32 }
 0x2bb   :  { %v6485_v54 = vpop.permute.xlu2 %1577  ;;  %3991 = vmatpush.msk.msra.mxu0 %vm6408_vm2, %v6372_v18  ;;  %v6524_v52 = vpop.permute.xlu1 %1567 }
 0x2bc   :  { %v6535_v5 = vpop.permute.xlu0 %1572  ;;  %1807 = vperm.xlu1 %4113, %v6340_v6   ;;  %4054 = vmatpush.msk.msra.mxu2 %vm6498_vm14, %v6360_v30 }
 0x2bd   :  { %3992 = vmatpush.msk.msra.mxu0 %vm6408_vm2, %v6386_v46 }
 0x2be   :  { %1797 = vperm.xlu0 %4112, %v6287_v59   ;;  %4055 = vmatpush.msk.msra.mxu2 %vm6498_vm14, %v6372_v18 }
 0x2bf   :  { %1802 = vperm.xlu2 %4114, %v6327_v60   ;;  %v6587_v57 = vpop.eup %4129 }
 0x2c0   :  { %4056 = vmatpush.msk.msra.mxu2 %vm6498_vm14, %v6386_v46  ;;  %vm3111_vm14 = vcmp.lt.s32.totalorder %v4571_v2, 32 }
 0x2c1   :  { %vm6670_vm2 = vmand %vm3110_vm10, %vm3111_vm14 }
 0x2c2   :  { %4028 = vmatmul.msk.f32.gmra.mxu1 %vm8862_vm8, %v6533_v22  ;;  %4073 = vmatpush.msk.msra.mxu3 %vm6670_vm2, %v6174_v9 }
 0x2c3   :  { %v1593_v10 = vpop.permute.xlu2 %1592  ;;  %v6552_v15 = vpop.permute.xlu1 %1582 }
 0x2c4   :  { %v1588_v36 = vpop.permute.xlu0 %1587  ;;  %4074 = vmatpush.msk.msra.mxu3 %vm6670_vm2, %v6180_v28 }
 0x2c5   :  { %v1841_v24 = vsub.f32 %v5400_v27, %v1588_v36  ;;  %v1842_v27 = vsub.f32 %v5416_v63, %v1593_v10  ;;  %v8865_v63 = vld [vmem:[#allocation12_spill] sm:$0xff] }
 0x2c6   :  { %1812 = vperm.xlu0 %4112, %v6343_v50   ;;  %v1832_v35 = vsub.f32 %v8865_v63, %v6471_v53  ;;  %4075 = vmatpush.msk.msra.mxu3 %vm6670_vm2, %v6215_v39 }
 0x2c7   :  { %v1921_v59 = vmul.f32 1.442695, %v1841_v24  ;;  %v1923_v38 = vmul.f32 1.442695, %v1842_v27  ;;  %v8866_v27 = vld [vmem:[#allocation29_spill] sm:$0xff] }
 0x2c8   :  { %v1903_v53 = vmul.f32 1.442695, %v1832_v35  ;;  %v8868_v35 = vld [vmem:[#allocation30_spill] sm:$0xff]  ;;  %4076 = vmatpush.msk.msra.mxu3 %vm6670_vm2, %v6220_v25  ;;  %v8884_v25 = vld [vmem:[#allocation23_spill] sm:$0xff] }
 0x2c9   :  { %4131 = vpow2.f32 %v1921_v59 }
 0x2ca   :  { %4029 = vmatmul.msk.f32.gmra.mxu1 %vm8863_vm4, %v6561_v8  ;;  %4133 = vpow2.f32 %v1901_v31  ;;  %4077 = vmatpush.msk.msra.mxu3 %vm6670_vm2, %v6237_v13  ;;  %v2022_v13 = vsel %vm8695_vm0, %v6587_v57, 0.0 }
 0x2cb   :  { %v6547_v56 = vpop.permute.xlu2 %1607  ;;  %v1598_v36 = vpop.permute.xlu1 %1597  ;;  %4135 = vpow2.f32 %v1923_v38  ;;  %v1833_v38 = vsub.f32 %v8867_v42, %v6435_v11  ;;  %v8869_v11 = vld [vmem:[#allocation17_spill] sm:$0xff] }
 0x2cc   :  { %v1603_v24 = vpop.permute.xlu0 %1602  ;;  %v1843_v6 = vsub.f32 %v8866_v27, %v1598_v36  ;;  %4137 = vpow2.f32 %v1903_v53  ;;  %v1834_v53 = vsub.f32 %v8869_v11, %v6490_v17  ;;  %4078 = vmatpush.msk.msra.mxu3 %vm6670_vm2, %v6248_v14 }
 0x2cd   :  { %v1844_v45 = vsub.f32 %v8868_v35, %v1603_v24  ;;  %v1905_v49 = vmul.f32 1.442695, %v1833_v38  ;;  %v8870_v24 = vld [vmem:[#allocation43_spill] sm:$0xff] }
 0x2ce   :  { %v1925_v60 = vmul.f32 1.442695, %v1843_v6  ;;  %v8871_v38 = vld [vmem:[#allocation31_spill] sm:$0xff]  ;;  %v1907_v43 = vmul.f32 1.442695, %v1834_v53  ;;  %4079 = vmatpush.msk.msra.mxu3 %vm6670_vm2, %v6260_v7 }
 0x2cf   :  { %v6597_v10 = vpop.eup %4131  ;;  %v1927_v42 = vmul.f32 1.442695, %v1844_v45  ;;  %v1845_v45 = vsub.f32 %v8871_v38, %v6547_v56 }
 0x2d0   :  { %3993 = vmatmul.msk.f32.vlgmr.msra.gmra.mxu0 %vm5157_vm1, %v6597_v10  ;;  %v6611_v31 = vpop.eup %4133  ;;  %4139 = vpow2.f32 %v1925_v60  ;;  %4080 = vmatpush.msk.msra.mxu3 %vm6670_vm2, %v6276_v20 }
 0x2d1   :  { %v6620_v36 = vpop.eup %4135  ;;  %4141 = vpow2.f32 %v1905_v49  ;;  %v1929_v11 = vmul.f32 1.442695, %v1845_v45 }
 0x2d2   :  { %4030 = vmatmul.msk.f32.gmra.mxu1 %vm8695_vm0, %v6587_v57  ;;  %v6630_v4 = vpop.eup %4137  ;;  %4143 = vpow2.f32 %v1927_v42  ;;  %v8874_v42 = vld [vmem:[#allocation32_spill] sm:$0xff]  ;;  %v2020_v57 = vsel %vm8862_vm8, %v6533_v22, 0.0  ;;  %4081 = vmatpush.msk.msra.mxu3 %vm6670_vm2, %v6293_v23 }
 0x2d3   :  { %v6574_v41 = vpop.permute.xlu2 %1622  ;;  %v1613_v50 = vpop.permute.xlu1 %1612  ;;  %v2024_v22 = vsel %vm5253_vm6, %v6630_v4, 0.0 }
 0x2d4   :  { %v6613_v63 = vpop.permute.xlu0 %1617  ;;  %v1846_v53 = vsub.f32 %v8874_v42, %v1613_v50  ;;  %v8880_v42 = vld [vmem:[#allocation14_spill] sm:$0xff]  ;;  %4082 = vmatpush.msk.msra.mxu3 %vm6670_vm2, %v6304_v16  ;;  %v8893_v16 = vld [vmem:[#allocation35_spill] sm:$0xff] }
 0x2d5   :  { %vm8881_vm10 = vnez %v8880_v42 }
 0x2d6   :  { %v6639_v19 = vpop.eup %4139  ;;  %4083 = vmatpush.msk.msra.mxu3 %vm6670_vm2, %v6316_v29 }
 0x2d7   :  { %v6649_v12 = vpop.eup %4141 }
 0x2d8   :  { %3994 = vmatmul.msk.f32.gmra.mxu0 %vm5142_vm13, %v6620_v36  ;;  %v6658_v56 = vpop.eup %4143  ;;  %4084 = vmatpush.msk.msra.mxu3 %vm6670_vm2, %v6332_v37 }
 0x2da   :  { %4031 = vmatmul.msk.f32.gmra.mxu1 %vm8647_vm5, %v6611_v31  ;;  %4085 = vmatpush.msk.msra.mxu3 %vm6670_vm2, %v6349_v32 }
 0x2db   :  { %v6599_v59 = vpop.permute.xlu2 %1637  ;;  %v6628_v6 = vpop.permute.xlu1 %1627 }
 0x2dc   :  { %v6632_v33 = vpop.permute.xlu0 %1632  ;;  %4086 = vmatpush.msk.msra.mxu3 %vm6670_vm2, %v6360_v30 }
 0x2de   :  { %4087 = vmatpush.msk.msra.mxu3 %vm6670_vm2, %v6372_v18 }
 0x2e0   :  { %3995 = vmatmul.msk.f32.gmra.mxu0 %vm5209_vm11, %v6639_v19  ;;  %4088 = vmatpush.msk.msra.mxu3 %vm6670_vm2, %v6386_v46 }
 0x2e2   :  { %4032 = vmatmul.msk.f32.gmra.mxu1 %vm5253_vm6, %v6630_v4  ;;  %v2025_v4 = vsel %vm5275_vm9, %v6649_v12, 0.0 }
 0x2e3   :  { %v6622_v27 = vpop.permute.xlu2 %1652  ;;  %v6647_v21 = vpop.permute.xlu1 %1642 }
 0x2e4   :  { %v6651_v17 = vpop.permute.xlu0 %1647 }
 0x2e8   :  { %3996 = vmatmul.msk.f32.gmra.mxu0 %vm8862_vm8, %v6658_v56 }
 0x2ea   :  { %4033 = vmatmul.msk.f32.gmra.mxu1 %vm5275_vm9, %v6649_v12  ;;  %v2023_v12 = vsel %vm8647_vm5, %v6611_v31, 0.0 }
 0x2eb   :  { %v1668_v60 = vpop.permute.xlu2 %1667 }
 0x2ec   :  { %v1857_v35 = vsub.f32 %v8870_v24, %v1668_v60  ;;  %v8873_v24 = vld [vmem:[#allocation18_spill] sm:$0xff]  ;;  %v6682_v45 = vpop.permute.xlu0 %1662 }
 0x2ed   :  { %v1835_v62 = vsub.f32 %v8873_v24, %v6507_v26  ;;  %v8876_v26 = vmov 0  ;;  %v1931_v24 = vmul.f32 1.442695, %v1846_v53  ;;  %v8882_v53 = vld [vmem:[#allocation33_spill] sm:$0xff] }
 0x2ee   :  { %v1953_v49 = vmul.f32 1.442695, %v1857_v35  ;;  %v6664_v35 = vpop.permute.xlu1 %1657  ;;  %v8877_v26 = vsel %vm6670_vm2, 4294967295, %v8876_v26 }
 0x2ef   :  { %8878 = vst [vmem:[#allocation12_spill] sm:$0xff] %v8877_v26 }
 0x2f0   :  { %4145 = vpow2.f32 %v1953_v49  ;;  %v8879_v49 = vld [vmem:[#allocation21_spill] sm:$0xff] }
 0x2f1   :  { %4147 = vpow2.f32 %v1907_v43  ;;  %v1909_v43 = vmul.f32 1.442695, %v1835_v62  ;;  %v2018_v62 = vsel %vm5142_vm13, %v6469_v51, 0.0 }
 0x2f2   :  { %4149 = vpow2.f32 %v1929_v11  ;;  %v1836_v11 = vsub.f32 %v8879_v49, %v6458_v61  ;;  %2211 = vadd.xlane.f32.xlu2 %v2018_v62  ;;  %v2019_v61 = vsel %vm5209_vm11, %v6505_v40, 0.0  ;;  %v8883_v49 = vld [vmem:[#allocation44_spill] sm:$0xff]  ;;  %v2017_v40 = vsel %vm5157_vm1, %v6444_v55, 0.0 }
 0x2f3   :  { %4151 = vpow2.f32 %v1909_v43  ;;  %v1847_v43 = vsub.f32 %v8882_v53, %v6613_v63  ;;  %v1683_v28 = vpop.permute.xlu2 %1682  ;;  %2213 = vadd.xlane.f32.xlu1 %v2019_v61  ;;  %2209 = vadd.xlane.f32.xlu0 %v2017_v40  ;;  %v2021_v63 = vsel %vm8863_vm4, %v6561_v8, 0.0  ;;  %v8885_v55 = vld [vmem:[#allocation16_spill] sm:$0xff] }
 0x2f4   :  { %v1911_v51 = vmul.f32 1.442695, %v1836_v11  ;;  %4153 = vpow2.f32 %v1931_v24  ;;  %v1678_v11 = vpop.permute.xlu0 %1677  ;;  %v1837_v24 = vsub.f32 %v8884_v25, %v6524_v52  ;;  %vm8886_vm14 = vnez %v8885_v55 }
 0x2f5   :  { %v1933_v61 = vmul.f32 1.442695, %v1847_v43 }
 0x2f6   :  { %v6668_v38 = vpop.eup %4145  ;;  %v1673_v62 = vpop.permute.xlu1 %1672  ;;  %4155 = vpow2.f32 %v1911_v51  ;;  %v1913_v52 = vmul.f32 1.442695, %v1837_v24  ;;  %v8888_v51 = vld [vmem:[#allocation34_spill] sm:$0xff]  ;;  %v8892_v24 = vld [vmem:[#allocation27_spill] sm:$0xff] }
 0x2f7   :  { %8875 = vst [vmem:[#allocation11_spill] sm:$0xff] %v6668_v38  ;;  %4057 = vmatmul.msk.f32.vlgmr.msra.gmra.mxu2 %vm5157_vm1, %v6668_v38  ;;  %v6680_v50 = vpop.eup %4147  ;;  %v1858_v2 = vsub.f32 %v8883_v49, %v1673_v62  ;;  %v1848_v43 = vsub.f32 %v8888_v51, %v6574_v41 }
 0x2f8   :  { %4034 = vmatmul.msk.f32.gmra.mxu1 %vm8881_vm10, %v6680_v50  ;;  %v6695_v9 = vpop.eup %4149  ;;  %v2026_v18 = vsel %vm8881_vm10, %v6680_v50, 0.0  ;;  %v8899_v50 = vld [vmem:[#allocation48_spill] sm:$0xff] }
 0x2f9   :  { %3997 = vmatmul.msk.f32.gmra.mxu0 %vm8863_vm4, %v6695_v9  ;;  %v6715_v38 = vpop.eup %4151  ;;  %v1955_v39 = vmul.f32 1.442695, %v1858_v2  ;;  %v8887_v2 = vld [vmem:[#allocation45_spill] sm:$0xff]  ;;  %v1935_v20 = vmul.f32 1.442695, %v1848_v43 }
 0x2fa   :  { %2217 = vadd.xlane.f32.xlu2 %v2021_v63  ;;  %v1859_v53 = vsub.f32 %v8887_v2, %v1678_v11  ;;  %v6732_v8 = vpop.eup %4153  ;;  %v2027_v31 = vsel %vm8886_vm14, %v6715_v38, 0.0 }
 0x2fb   :  { %4157 = vpow2.f32 %v1955_v39  ;;  %2219 = vadd.xlane.f32.xlu1 %v2022_v13  ;;  %v6748_v40 = vpop.permute.xlu2 %1697  ;;  %v8889_v39 = vld [vmem:[#allocation24_spill] sm:$0xff]  ;;  %2215 = vadd.xlane.f32.xlu0 %v2020_v57 }
 0x2fc   :  { %4159 = vpow2.f32 %v1933_v61  ;;  %v1957_v62 = vmul.f32 1.442695, %v1859_v53  ;;  %v4156_v49 = vpop.eup %4155  ;;  %v1838_v41 = vsub.f32 %v8889_v39, %v6535_v5  ;;  %v6757_v11 = vpop.permute.xlu0 %1692  ;;  %v8891_v5 = vld [vmem:[#allocation46_spill] sm:$0xff]  ;;  %v1839_v61 = vsub.f32 %v8892_v24, %v6485_v54 }
 0x2fd   :  { %4161 = vpow2.f32 %v1913_v52  ;;  %v1860_v25 = vsub.f32 %v8891_v5, %v1683_v28  ;;  %v1849_v28 = vsub.f32 %v8893_v16, %v6628_v6  ;;  %v2028_v39 = vsel %vm8720_vm3, %v4156_v49, 0.0 }
 0x2fe   :  { %v1688_v14 = vpop.permute.xlu1 %1687  ;;  %4163 = vpow2.f32 %v1957_v62  ;;  %v1915_v2 = vmul.f32 1.442695, %v1838_v41  ;;  %v1917_v52 = vmul.f32 1.442695, %v1839_v61  ;;  %v8895_v62 = vld [vmem:[#allocation47_spill] sm:$0xff] }
 0x2ff   :  { %4165 = vpow2.f32 %v1935_v20  ;;  %v1959_v54 = vmul.f32 1.442695, %v1860_v25  ;;  %v1937_v6 = vmul.f32 1.442695, %v1849_v28  ;;  %v1861_v57 = vsub.f32 %v8895_v62, %v1688_v14  ;;  %v8897_v20 = vld [vmem:[#allocation28_spill] sm:$0xff]  ;;  %v8900_v28 = vld [vmem:[#allocation25_spill] sm:$0xff] }
 0x300   :  { %4035 = vmatmul.msk.f32.gmra.mxu1 %vm8886_vm14, %v6715_v38  ;;  %4167 = vpow2.f32 %v1915_v2  ;;  %v8896_v38 = vld [vmem:[#allocation36_spill] sm:$0xff]  ;;  %v1862_v2 = vsub.f32 %v8899_v50, %v6757_v11 }
 0x301   :  { %3998 = vmatmul.msk.f32.gmra.mxu0 %vm8695_vm0, %v6732_v8  ;;  %v6753_v7 = vpop.eup %4157  ;;  %4169 = vpow2.f32 %v1959_v54  ;;  %v1850_v14 = vsub.f32 %v8896_v38, %v6632_v33  ;;  %v1961_v5 = vmul.f32 1.442695, %v1861_v57  ;;  %v8902_v38 = vld [vmem:[#allocation49_spill] sm:$0xff] }
 0x302   :  { %4058 = vmatmul.msk.f32.gmra.mxu2 %vm5142_vm13, %v6753_v7  ;;  %2223 = vadd.xlane.f32.xlu2 %v2024_v22  ;;  %v6774_v23 = vpop.eup %4159  ;;  %4171 = vpow2.f32 %v1917_v52  ;;  %v1840_v22 = vsub.f32 %v8897_v20, %v6552_v15  ;;  %v8901_v52 = vld [vmem:[#allocation37_spill] sm:$0xff]  ;;  %v1963_v11 = vmul.f32 1.442695, %v1862_v2  ;;  %v8903_v20 = vld [vmem:[#allocation38_spill] sm:$0xff] }
 0x303   :  { %2225 = vadd.xlane.f32.xlu1 %v2025_v4  ;;  %v4162_v13 = vpop.eup %4161  ;;  %2221 = vadd.xlane.f32.xlu0 %v2023_v12  ;;  %v6804_v43 = vpop.permute.xlu2 %1712  ;;  %4173 = vpow2.f32 %v1937_v6  ;;  %v1939_v24 = vmul.f32 1.442695, %v1850_v14  ;;  %v1851_v12 = vsub.f32 %v8901_v52, %v6599_v59  ;;  %v1863_v14 = vsub.f32 %v8902_v38, %v6748_v40  ;;  %v8907_v52 = vld [vmem:[#allocation50_spill] sm:$0xff]  ;;  %v8909_v38 = vld [vmem:[#allocation39_spill] sm:$0xff] }
 0x304   :  { %v6797_v51 = vpop.eup %4163  ;;  %v6799_v29 = vpop.permute.xlu0 %1707  ;;  %v1919_v15 = vmul.f32 1.442695, %v1840_v22  ;;  %4175 = vpow2.f32 %v1961_v5  ;;  %v2033_v59 = vsel %vm5157_vm1, %v6597_v10, 0.0  ;;  %v2034_v40 = vsel %vm5142_vm13, %v6620_v36, 0.0 }
 0x305   :  { %v6818_v32 = vpop.eup %4165  ;;  %4177 = vpow2.f32 %v1939_v24  ;;  %v1852_v22 = vsub.f32 %v8903_v20, %v6647_v21  ;;  %v1965_v5 = vmul.f32 1.442695, %v1863_v14  ;;  %v1853_v14 = vsub.f32 %v8909_v38, %v6651_v17  ;;  %v8911_v17 = vld [vmem:[#allocation77_spill] sm:$0xff]  ;;  %v8915_v38 = vld [vmem:[#allocation78_spill] sm:$0xff] }
 0x306   :  { %v6789_v53 = vpop.permute.xlu1 %1702  ;;  %v4168_v41 = vpop.eup %4167  ;;  %4179 = vpow2.f32 %v1919_v15  ;;  %v2035_v20 = vsel %vm5209_vm11, %v6639_v19, 0.0  ;;  %v2039_v19 = vsel %vm8647_vm5, %v6774_v23, 0.0 }
 0x307   :  { %v2030_v46 = vsel %vm8637_vm7, %v4168_v41, 0.0  ;;  %4181 = vpow2.f32 %v1963_v11  ;;  %v1943_v36 = vmul.f32 1.442695, %v1852_v22  ;;  %v1864_v21 = vsub.f32 %v8907_v52, %v6789_v53  ;;  %v8908_v11 = vld [vmem:[#allocation70_spill] sm:$0xff] }
 0x308   :  { %4036 = vmatmul.msk.f32.gmra.mxu1 %vm8720_vm3, %v4156_v49  ;;  %v6840_v49 = vpop.eup %4169  ;;  %v2037_v53 = vsel %vm8863_vm4, %v6695_v9, 0.0  ;;  %v8910_v9 = vld [vmem:[#allocation51_spill] sm:$0xff] }
 0x309   :  { %3999 = vmatmul.msk.f32.gmra.mxu0 %vm8647_vm5, %v6774_v23  ;;  %v4172_v33 = vpop.eup %4171 }
 0x30a   :  { %4059 = vmatmul.msk.f32.gmra.mxu2 %vm5209_vm11, %v6797_v51  ;;  %2229 = vadd.xlane.f32.xlu2 %v2027_v31  ;;  %v6853_v4 = vpop.eup %4173  ;;  %v2031_v54 = vsel %vm5371_vm15, %v4172_v33, 0.0  ;;  %v2029_v31 = vsel %vm8660_vm12, %v4162_v13, 0.0 }
 0x30b   :  { %2231 = vadd.xlane.f32.xlu1 %v2028_v39  ;;  %2227 = vadd.xlane.f32.xlu0 %v2026_v18  ;;  %v6855_v16 = vpop.permute.xlu2 %1727  ;;  %v6868_v62 = vpop.eup %4175  ;;  %v1941_v39 = vmul.f32 1.442695, %v1851_v12  ;;  %v2036_v12 = vsel %vm8862_vm8, %v6658_v56, 0.0 }
 0x30c   :  { %v6842_v25 = vpop.permute.xlu0 %1722 }
 0x30d   :  { %4183 = vpow2.f32 %v1941_v39 }
 0x30e   :  { %v6830_v30 = vpop.permute.xlu1 %1717  ;;  %4185 = vpow2.f32 %v1965_v5  ;;  %v1945_v5 = vmul.f32 1.442695, %v1853_v14 }
 0x310   :  { %4037 = vmatmul.msk.f32.gmra.mxu1 %vm8660_vm12, %v4162_v13  ;;  %v6882_v13 = vpop.eup %4177 }
 0x311   :  { %4000 = vmatmul.msk.f32.gmra.mxu0 %vm5253_vm6, %v6818_v32 }
 0x312   :  { %4060 = vmatmul.msk.f32.gmra.mxu2 %vm8862_vm8, %v6840_v49  ;;  %2235 = vadd.xlane.f32.xlu2 %v2030_v46  ;;  %v8905_v46 = vld [vmem:[#allocation26_spill] sm:$0xff] }
 0x313   :  { %2237 = vadd.xlane.f32.xlu1 %v2031_v54  ;;  %2233 = vadd.xlane.f32.xlu0 %v2029_v31  ;;  %v6892_v18 = vpop.permute.xlu2 %1742  ;;  %vm8906_vm2 = vnez %v8905_v46 }
 0x314   :  { %v6870_v57 = vpop.permute.xlu0 %1737 }
 0x316   :  { %v6864_v6 = vpop.permute.xlu1 %1732 }
 0x318   :  { %4038 = vmatmul.msk.f32.gmra.mxu1 %vm8637_vm7, %v4168_v41  ;;  %v4180_v41 = vpop.eup %4179 }
 0x319   :  { %4001 = vmatmul.msk.f32.gmra.mxu0 %vm5275_vm9, %v6853_v4  ;;  %v2032_v15 = vsel %vm8906_vm2, %v4180_v41, 0.0  ;;  %v6897_v50 = vpop.eup %4181 }
 0x31a   :  { %4061 = vmatmul.msk.f32.gmra.mxu2 %vm8863_vm4, %v6868_v62  ;;  %2241 = vadd.xlane.f32.xlu2 %v2033_v59  ;;  %v4184_v39 = vpop.eup %4183  ;;  %v1967_v59 = vmul.f32 1.442695, %v1864_v21 }
 0x31b   :  { %2243 = vadd.xlane.f32.xlu1 %v2034_v40  ;;  %2239 = vadd.xlane.f32.xlu0 %v2032_v15  ;;  %v6917_v56 = vpop.eup %4185  ;;  %v1758_v40 = vpop.permute.xlu2 %1757  ;;  %v8912_v15 = vld [vmem:[#allocation40_spill] sm:$0xff] }
 0x31c   :  { %v1753_v54 = vpop.permute.xlu0 %1752 }
 0x31d   :  { %v1874_v31 = vsub.f32 %v8908_v11, %v1753_v54  ;;  %v8913_v11 = vld [vmem:[#allocation42_spill] sm:$0xff] }
 0x31e   :  { %v1748_v10 = vpop.permute.xlu1 %1747 }
 0x320   :  { %4039 = vmatmul.msk.f32.gmra.mxu1 %vm5371_vm15, %v4172_v33  ;;  %v8904_v33 = vld [vmem:[#allocation69_spill] sm:$0xff] }
 0x321   :  { %4002 = vmatmul.msk.f32.gmra.mxu0 %vm8881_vm10, %v6882_v13  ;;  %v1873_v24 = vsub.f32 %v8904_v33, %v1748_v10  ;;  %v1865_v10 = vsub.f32 %v8910_v9, %v6799_v29  ;;  %v1875_v33 = vsub.f32 %v8911_v17, %v1758_v40  ;;  %v1854_v29 = vsub.f32 %v8912_v15, %v6622_v27 }
 0x322   :  { %4062 = vmatmul.msk.f32.gmra.mxu2 %vm8695_vm0, %v6897_v50  ;;  %2247 = vadd.xlane.f32.xlu2 %v2036_v12  ;;  %v2038_v12 = vsel %vm8695_vm0, %v6732_v8, 0.0  ;;  %v2042_v8 = vsel %vm8881_vm10, %v6882_v13, 0.0 }
 0x323   :  { %v1985_v2 = vmul.f32 1.442695, %v1873_v24  ;;  %2249 = vadd.xlane.f32.xlu1 %v2037_v53  ;;  %2245 = vadd.xlane.f32.xlu0 %v2035_v20  ;;  %v1969_v54 = vmul.f32 1.442695, %v1865_v10  ;;  %v1947_v52 = vmul.f32 1.442695, %v1854_v29 }
 0x324   :  { %v1768_v10 = vpop.permute.xlu0 %1767  ;;  %v8918_v29 = vld [vmem:[#allocation79_spill] sm:$0xff] }
 0x325   :  { %4187 = vpow2.f32 %v1985_v2  ;;  %v2040_v2 = vsel %vm5253_vm6, %v6818_v32, 0.0  ;;  %v8914_v32 = vld [vmem:[#allocation52_spill] sm:$0xff] }
 0x326   :  { %4189 = vpow2.f32 %v1943_v36  ;;  %v1989_v36 = vmul.f32 1.442695, %v1875_v33  ;;  %v1763_v21 = vpop.permute.xlu1 %1762  ;;  %v1866_v53 = vsub.f32 %v8914_v32, %v6804_v43  ;;  %v8919_v32 = vld [vmem:[#allocation54_spill] sm:$0xff] }
 0x327   :  { %4191 = vpow2.f32 %v1967_v59  ;;  %v2043_v59 = vsel %vm8886_vm14, %v4184_v39, 0.0  ;;  %v6972_v9 = vpop.f32.mrf.mxu1 }
 0x328   :  { %4040 = vmatmul.msk.f32.gmra.mxu1 %vm8906_vm2, %v4180_v41  ;;  %v1987_v41 = vmul.f32 1.442695, %v1874_v31  ;;  %v1856_v31 = vsub.f32 %v8913_v11, %v6682_v45  ;;  %v1876_v45 = vsub.f32 %v8915_v38, %v1763_v21  ;;  %v1971_v20 = vmul.f32 1.442695, %v1866_v53  ;;  %v8920_v38 = vld [vmem:[#allocation86_spill] sm:$0xff] }
 0x329   :  { %4003 = vmatmul.msk.f32.gmra.mxu0 %vm8886_vm14, %v4184_v39  ;;  %v1868_v53 = vsub.f32 %v8919_v32, %v6842_v25  ;;  %v8921_v25 = vld [vmem:[#allocation11_spill] sm:$0xff] }
 0x32a   :  { %4063 = vmatmul.msk.f32.gmra.mxu2 %vm8647_vm5, %v6917_v56  ;;  %4193 = vpow2.f32 %v1987_v41  ;;  %2253 = vadd.xlane.f32.xlu2 %v2039_v19  ;;  %v1951_v43 = vmul.f32 1.442695, %v1856_v31  ;;  %v8916_v41 = vld [vmem:[#allocation41_spill] sm:$0xff]  ;;  %v2041_v19 = vsel %vm5275_vm9, %v6853_v4, 0.0 }
 0x32b   :  { %v6922_v22 = vpop.eup %4187  ;;  %4195 = vpow2.f32 %v1945_v5  ;;  %2255 = vadd.xlane.f32.xlu1 %v2040_v2  ;;  %2251 = vadd.xlane.f32.xlu0 %v2038_v12  ;;  %v1855_v40 = vsub.f32 %v8916_v41, %v6664_v35  ;;  %v1991_v5 = vmul.f32 1.442695, %v1876_v45  ;;  %v8917_v35 = vld [vmem:[#allocation53_spill] sm:$0xff]  ;;  %v1877_v2 = vsub.f32 %v8918_v29, %v1768_v10  ;;  %v1773_v12 = vpop.permute.xlu2 %1772 }
 0x32c   :  { %4089 = vmatmul.msk.f32.vlgmr.msra.gmra.mxu3 %vm5157_vm1, %v6922_v22  ;;  %v4190_v24 = vpop.eup %4189  ;;  %4197 = vpow2.f32 %v1969_v54  ;;  %v1867_v15 = vsub.f32 %v8917_v35, %v6830_v30  ;;  %v1878_v45 = vsub.f32 %v8920_v38, %v1773_v12  ;;  %v8923_v35 = vld [vmem:[#allocation87_spill] sm:$0xff]  ;;  %v8924_v12 = vld [vmem:[#allocation57_spill] sm:$0xff]  ;;  %v8927_v38 = vld [vmem:[#allocation88_spill] sm:$0xff]  ;;  %v2065_v0 = vsel %vm5157_vm1, %v6922_v22, 0.0 }
 0x32d   :  { %v6943_v23 = vpop.eup %4191  ;;  %4199 = vpow2.f32 %v1989_v36  ;;  %v1949_v33 = vmul.f32 1.442695, %v1855_v40  ;;  %v2044_v11 = vsel %vm8720_vm3, %v4190_v24, 0.0  ;;  %v2091_v22 = vld [vmem:[#allocation3 + $0x50] sm:$0xff] }
 0x32e   :  { %4201 = vpow2.f32 %v1947_v52  ;;  %v1973_v54 = vmul.f32 1.442695, %v1867_v15  ;;  %v1993_v52 = vmul.f32 1.442695, %v1877_v2  ;;  %v1995_v41 = vmul.f32 1.442695, %v1878_v45 }
 0x32f   :  { %4203 = vpow2.f32 %v1951_v43  ;;  %v2049_v43 = vsel %vm5157_vm1, %v8921_v25, 0.0  ;;  %v2055_v25 = vsel %vm8647_vm5, %v6917_v56, 0.0  ;;  %v8930_v56 = vld [vmem:[#allocation61_spill] sm:$0xff] }
 0x330   :  { %v6948_v27 = vpop.eup %4193  ;;  %4205 = vpow2.f32 %v1971_v20  ;;  %v1778_v20 = vpop.permute.xlu1 %1777 }
 0x331   :  { %4004 = vmatmul.msk.f32.gmra.mxu0 %vm8720_vm3, %v4190_v24  ;;  %v4196_v14 = vpop.eup %4195  ;;  %4207 = vpow2.f32 %v1991_v5  ;;  %v1879_v15 = vsub.f32 %v8923_v35, %v1778_v20  ;;  %v1871_v35 = vsub.f32 %v8930_v56, %v6870_v57  ;;  %v8933_v57 = vld [vmem:[#allocation63_spill] sm:$0xff]  ;;  %v8940_v56 = vld [vmem:[#allocation65_spill] sm:$0xff] }
 0x332   :  { %4064 = vmatmul.msk.f32.gmra.mxu2 %vm5253_vm6, %v6943_v23  ;;  %2259 = vadd.xlane.f32.xlu2 %v2042_v8  ;;  %v6970_v13 = vpop.eup %4197  ;;  %v2045_v4 = vsel %vm8660_vm12, %v4196_v14, 0.0  ;;  %4209 = vpow2.f32 %v1949_v33  ;;  %v7002_v8 = vpop.f32.mrf.mxu1  ;;  %v2051_v33 = vsel %vm5209_vm11, %v6797_v51, 0.0  ;;  %v2050_v51 = vsel %vm5142_vm13, %v6753_v7, 0.0 }
 0x333   :  { %2261 = vadd.xlane.f32.xlu1 %v2043_v59  ;;  %v6977_v17 = vpop.eup %4199  ;;  %2257 = vadd.xlane.f32.xlu0 %v2041_v19  ;;  %4211 = vpow2.f32 %v1973_v54  ;;  %v1975_v59 = vmul.f32 1.442695, %v1868_v53  ;;  %v8922_v19 = vld [vmem:[#allocation59_spill] sm:$0xff]  ;;  %v1997_v2 = vmul.f32 1.442695, %v1879_v15  ;;  %v1783_v54 = vpop.permute.xlu0 %1782  ;;  %v2054_v7 = vsel %vm8695_vm0, %v6897_v50, 0.0 }
 0x334   :  { %4090 = vmatmul.msk.f32.gmra.mxu3 %vm5142_vm13, %v6948_v27  ;;  %v4202_v39 = vpop.eup %4201  ;;  %4213 = vpow2.f32 %v1993_v52  ;;  %v1880_v45 = vsub.f32 %v8927_v38, %v1783_v54  ;;  %v8931_v15 = vld [vmem:[#allocation67_spill] sm:$0xff] }
 0x335   :  { %v2046_v30 = vsel %vm8637_vm7, %v4202_v39, 0.0  ;;  %v4204_v36 = vpop.eup %4203  ;;  %4215 = vpow2.f32 %v1975_v59 }
 0x336   :  { %v6994_v21 = vpop.eup %4205  ;;  %v2048_v24 = vsel %vm8906_vm2, %v4204_v36, 0.0  ;;  %4217 = vpow2.f32 %v1995_v41  ;;  %v1999_v41 = vmul.f32 1.442695, %v1880_v45  ;;  %v1981_v45 = vmul.f32 1.442695, %v1871_v35  ;;  %v8941_v35 = vld [vmem:[#allocation62_spill] sm:$0xff] }
 0x337   :  { %v6998_v31 = vpop.eup %4207 }
 0x338   :  { %v7072_v20 = vpop.permute.xlu1 %1792  ;;  %v2068_v44 = vsel %vm8862_vm8, %v6998_v31, 0.0 }
 0x339   :  { %4005 = vmatmul.msk.f32.gmra.mxu0 %vm8660_vm12, %v4196_v14  ;;  %v4210_v14 = vpop.eup %4209 }
 0x33a   :  { %4065 = vmatmul.msk.f32.gmra.mxu2 %vm5275_vm9, %v6970_v13  ;;  %2265 = vadd.xlane.f32.xlu2 %v2045_v4  ;;  %v7018_v40 = vpop.eup %4211  ;;  %v2047_v5 = vsel %vm5371_vm15, %v4210_v14, 0.0  ;;  %v7036_v4 = vpop.f32.mrf.mxu1 }
 0x33b   :  { %2267 = vadd.xlane.f32.xlu1 %v2046_v30  ;;  %2263 = vadd.xlane.f32.xlu0 %v2044_v11  ;;  %v7022_v10 = vpop.eup %4213  ;;  %v8925_v11 = vld [vmem:[#allocation55_spill] sm:$0xff] }
 0x33c   :  { %4091 = vmatmul.msk.f32.gmra.mxu3 %vm5209_vm11, %v6977_v17  ;;  %v7043_v30 = vpop.eup %4215  ;;  %v1314_v32 = vsub.f32 %v8925_v11, %v8924_v12  ;;  %v2069_v1 = vsel %vm8863_vm4, %v7022_v10, 0.0 }
 0x33d   :  { %v7048_v52 = vpop.eup %4217 }
 0x341   :  { %4006 = vmatmul.msk.f32.gmra.mxu0 %vm8637_vm7, %v4202_v39  ;;  %v1869_v39 = vsub.f32 %v8922_v19, %v6855_v16  ;;  %v2052_v16 = vsel %vm8862_vm8, %v6840_v49, 0.0  ;;  %v8929_v19 = vld [vmem:[#allocation56_spill] sm:$0xff] }
 0x342   :  { %4066 = vmatmul.msk.f32.gmra.mxu2 %vm8881_vm10, %v6994_v21  ;;  %2271 = vadd.xlane.f32.xlu2 %v2048_v24  ;;  %v1788_v24 = vpop.permute.xlu2 %1787  ;;  %v7070_v59 = vpop.f32.mrf.mxu1 }
 0x343   :  { %2273 = vadd.xlane.f32.xlu1 %v2049_v43  ;;  %2269 = vadd.xlane.f32.xlu0 %v2047_v5  ;;  %v1977_v29 = vmul.f32 1.442695, %v1869_v39  ;;  %v8928_v5 = vld [vmem:[#allocation58_spill] sm:$0xff] }
 0x344   :  { %4092 = vmatmul.msk.f32.gmra.mxu3 %vm8862_vm8, %v6998_v31  ;;  %v1313_v39 = vsub.f32 %v8929_v19, %v8928_v5 }
 0x345   :  { %4219 = vpow2.f32 %v1977_v29 }
 0x346   :  { %4221 = vpow2.f32 %v1997_v2  ;;  %v7085_v2 = vpop.permute.xlu0 %1797 }
 0x349   :  { %4007 = vmatmul.msk.f32.gmra.mxu0 %vm5371_vm15, %v4210_v14 }
 0x34a   :  { %4067 = vmatmul.msk.f32.gmra.mxu2 %vm8886_vm14, %v7018_v40  ;;  %2277 = vadd.xlane.f32.xlu2 %v2051_v33 }
 0x34b   :  { %2279 = vadd.xlane.f32.xlu1 %v2052_v16  ;;  %2275 = vadd.xlane.f32.xlu0 %v2050_v51  ;;  %v4220_v50 = vpop.eup %4219  ;;  %v8932_v16 = vld [vmem:[#allocation64_spill] sm:$0xff]  ;;  %v8934_v51 = vld [vmem:[#allocation66_spill] sm:$0xff] }
 0x34c   :  { %4093 = vmatmul.msk.f32.gmra.mxu3 %vm8863_vm4, %v7022_v10  ;;  %v7079_v33 = vpop.eup %4221  ;;  %v1317_v29 = vsub.f32 %v8932_v16, %v8931_v15  ;;  %v8935_v12 = vsub.f32 %v8933_v57, %v8934_v51  ;;  %v1316_v15 = vsub.f32 %v8941_v35, %v8940_v56  ;;  %v7124_v16 = vpop.permute.xlu1 %1807  ;;  %v8942_v57 = vld [vmem:[#allocation96_spill] sm:$0xff]  ;;  %v8947_v35 = vld [vmem:[#allocation75_spill] sm:$0xff] }
 0x34d   :  { %v2799_v53 = vpop.f32.mrf.mxu0  ;;  %v1882_v51 = vsub.f32 %v8942_v57, %v7072_v20  ;;  %v2083_v20 = vld [vmem:[#allocation3 + $0x10] sm:$0xff] }
 0x34e   :  { %v7065_v14 = vadd.f32 %v6972_v9, %v2799_v53  ;;  %v2053_v9 = vsel %vm8863_vm4, %v6868_v62, 0.0  ;;  %v2057_v62 = vsel %vm5275_vm9, %v6970_v13, 0.0  ;;  %v1381_v11 = vmul.f32 1.442695, %v8935_v12 }
 0x34f   :  { %v1377_v53 = vmul.f32 1.442695, %v1313_v39  ;;  %v2058_v13 = vsel %vm8881_vm10, %v6994_v21, 0.0  ;;  %v7115_v39 = vpop.f32.mrf.mxu1 }
 0x351   :  { %4008 = vmatmul.msk.f32.gmra.mxu0 %vm8906_vm2, %v4204_v36  ;;  %v8926_v36 = vld [vmem:[#allocation60_spill] sm:$0xff] }
 0x352   :  { %v1870_v49 = vsub.f32 %v8926_v36, %v6864_v6  ;;  %4068 = vmatmul.msk.f32.gmra.mxu2 %vm8720_vm3, %v7043_v30  ;;  %2283 = vadd.xlane.f32.xlu2 %v2054_v7  ;;  %v1379_v6 = vmul.f32 1.442695, %v1314_v32  ;;  %v8936_v32 = vld [vmem:[#allocation95_spill] sm:$0xff]  ;;  %v8937_v7 = vld [vmem:[#allocation68_spill] sm:$0xff] }
 0x353   :  { %2285 = vadd.xlane.f32.xlu1 %v2055_v25  ;;  %2281 = vadd.xlane.f32.xlu0 %v2053_v9  ;;  %v1881_v36 = vsub.f32 %v8936_v32, %v1788_v24  ;;  %v1872_v38 = vsub.f32 %v8937_v7, %v6892_v18  ;;  %v1385_v25 = vmul.f32 1.442695, %v1317_v29  ;;  %v8938_v24 = vld [vmem:[#allocation74_spill] sm:$0xff]  ;;  %v2056_v9 = vsel %vm5253_vm6, %v6943_v23, 0.0  ;;  %v2082_v29 = vld [vmem:[#allocation3 + $0x8] sm:$0xff]  ;;  %v8944_v32 = vld [vmem:[#allocation73_spill] sm:$0xff] }
 0x354   :  { %4094 = vmatmul.msk.f32.gmra.mxu3 %vm8695_vm0, %v7048_v52  ;;  %v1979_v43 = vmul.f32 1.442695, %v1870_v49  ;;  %4223 = vpow2.f32 %v1379_v6  ;;  %v7104_v6 = vpop.permute.xlu2 %1802  ;;  %v2060_v23 = vsel %vm8720_vm3, %v7043_v30, 0.0  ;;  %v1383_v30 = vmul.f32 1.442695, %v1316_v15  ;;  %v8948_v15 = vld [vmem:[#allocation72_spill] sm:$0xff] }
 0x355   :  { %v2802_v54 = vpop.f32.mrf.mxu0  ;;  %v2001_v5 = vmul.f32 1.442695, %v1881_v36  ;;  %v1983_v18 = vmul.f32 1.442695, %v1872_v38 }
 0x356   :  { %4225 = vpow2.f32 %v1979_v43  ;;  %v7100_v49 = vadd.f32 %v7002_v8, %v2802_v54  ;;  %v8939_v8 = vld [vmem:[#allocation71_spill] sm:$0xff] }
 0x357   :  { %4227 = vpow2.f32 %v1999_v41  ;;  %v1318_v41 = vsub.f32 %v8939_v8, %v8938_v24  ;;  %v8945_v8 = vld [vmem:[#allocation83_spill] sm:$0xff] }
 0x358   :  { %4229 = vpow2.f32 %v1381_v11  ;;  %v8943_v11 = vld [vmem:[#allocation76_spill] sm:$0xff] }
 0x359   :  { %4231 = vpow2.f32 %v1377_v53  ;;  %v1320_v36 = vsub.f32 %v8944_v32, %v8943_v11  ;;  %v7142_v53 = vpop.permute.xlu0 %1812  ;;  %v7164_v32 = vpop.f32.mrf.mxu1 }
 0x35a   :  { %4069 = vmatmul.msk.f32.gmra.mxu2 %vm8660_vm12, %v4220_v50  ;;  %2289 = vadd.xlane.f32.xlu2 %v2057_v62  ;;  %v7109_v43 = vpop.eup %4223  ;;  %4233 = vpow2.f32 %v1981_v45  ;;  %v1387_v62 = vmul.f32 1.442695, %v1318_v41  ;;  %v8946_v41 = vld [vmem:[#allocation80_spill] sm:$0xff] }
 0x35b   :  { %2291 = vadd.xlane.f32.xlu1 %v2058_v13  ;;  %2287 = vadd.xlane.f32.xlu0 %v2056_v9  ;;  %4235 = vpow2.f32 %v1385_v25  ;;  %v2146_v7 = vmul.f32 %v7109_v43, %v2082_v29  ;;  %v2061_v13 = vsel %vm8660_vm12, %v4220_v50, 0.0  ;;  %v2081_v9 = vld [vmem:[#allocation3] sm:$0xff]  ;;  %v1319_v29 = vsub.f32 %v8948_v15, %v8947_v35 }
 0x35c   :  { %4095 = vmatmul.msk.f32.gmra.mxu3 %vm8647_vm5, %v7079_v33  ;;  %v7113_v19 = vpop.eup %4225  ;;  %4237 = vpow2.f32 %v2001_v5  ;;  %v1321_v5 = vsub.f32 %v8946_v41, %v8945_v8  ;;  %vm8949_vm5 = vcmask 7168   ;;  %v2059_v50 = vsel %vm8886_vm14, %v7018_v40, 0.0  ;;  %v8951_v41 = vld [vmem:[#allocation85_spill] sm:$0xff]  ;;  %v8952_v35 = vld [vmem:[#allocation82_spill] sm:$0xff] }
 0x35d   :  { %v7120_v21 = vpop.eup %4227  ;;  %v2805_v54 = vpop.f32.mrf.mxu0  ;;  %4239 = vpow2.f32 %v1983_v18  ;;  %v2003_v18 = vmul.f32 1.442695, %v1882_v51  ;;  %v2085_v51 = vld [vmem:[#allocation3 + $0x20] sm:$0xff]  ;;  %v1389_v8 = vmul.f32 1.442695, %v1319_v29  ;;  %v1323_v15 = vsub.f32 %v8952_v35, %v8951_v41  ;;  %vm8972_vm1 = vmmov %vm8949_vm5 }
 0x35e   :  { %v7138_v12 = vadd.f32 %v7036_v4, %v2805_v54  ;;  %v7145_v38 = vpop.eup %4229  ;;  %4241 = vpow2.f32 %v1387_v62  ;;  %v1391_v54 = vmul.f32 1.442695, %v1320_v36  ;;  %vm8975_vm4 = vmmov %vm8972_vm1 }
 0x35f   :  { %v7149_v25 = vpop.eup %4231  ;;  %4243 = vpow2.f32 %v1383_v30  ;;  %v1393_v30 = vmul.f32 1.442695, %v1321_v5 }
 0x360   :  { %v4234_v24 = vpop.eup %4233  ;;  %v2145_v36 = vmul.f32 %v7149_v25, %v2081_v9  ;;  %4245 = vpow2.f32 %v2003_v18 }
 0x361   :  { %v7153_v56 = vpop.eup %4235  ;;  %v2063_v40 = vsel %vm5371_vm15, %v4234_v24, 0.0  ;;  %4247 = vpow2.f32 %v1391_v54  ;;  %v8953_v54 = vld [vmem:[#allocation92_spill] sm:$0xff] }
 0x362   :  { %4070 = vmatmul.msk.f32.gmra.mxu2 %vm8637_vm7, %v7113_v19  ;;  %2295 = vadd.xlane.f32.xlu2 %v2060_v23  ;;  %v2147_v23 = vmul.f32 %v7145_v38, %v2083_v20  ;;  %v7162_v62 = vpop.eup %4237  ;;  %4249 = vpow2.f32 %v1393_v30 }
 0x363   :  { %2297 = vadd.xlane.f32.xlu1 %v2061_v13  ;;  %2293 = vadd.xlane.f32.xlu0 %v2059_v50  ;;  %v4240_v11 = vpop.eup %4239  ;;  %v8950_v13 = vld [vmem:[#allocation97_spill] sm:$0xff]  ;;  %4251 = vpow2.f32 %v1389_v8 }
 0x364   :  { %4096 = vmatmul.msk.f32.gmra.mxu3 %vm5253_vm6, %v7120_v21  ;;  %v1883_v20 = vsub.f32 %v8950_v13, %v7085_v2  ;;  %v7183_v9 = vpop.eup %4241  ;;  %v2064_v2 = vsel %vm8906_vm2, %v4240_v11, 0.0 }
 0x365   :  { %v2212_v45 = vpop.xlane.xlu2 %2211  ;;  %v7187_v29 = vpop.eup %4243 }
 0x366   :  { %v2338_v4 = vadd.f32 %v2212_v45, %v2146_v7  ;;  %v2214_v57 = vpop.xlane.xlu1 %2213  ;;  %v2808_v45 = vpop.f32.mrf.mxu0 }
 0x367   :  { %v2339_v7 = vadd.f32 %v2214_v57, %v2147_v23  ;;  %v2210_v50 = vpop.xlane.xlu0 %2209  ;;  %v8954_v57 = vld [vmem:[#allocation89_spill] sm:$0xff]  ;;  %v7197_v41 = vpop.eup %4245 }
 0x368   :  { %2403 = vst.msk [vmem:[#allocation3 + $0x8] sm:$0xff] %vm8949_vm5, %v2338_v4  ;;  %v7177_v4 = vadd.f32 %v7070_v59, %v2808_v45  ;;  %v2337_v5 = vadd.f32 %v2210_v50, %v2145_v36  ;;  %v2086_v59 = vld [vmem:[#allocation3 + $0x28] sm:$0xff]  ;;  %v1324_v45 = vsub.f32 %v8954_v57, %v8953_v54  ;;  %v2062_v36 = vsel %vm8637_vm7, %v7113_v19, 0.0  ;;  %v7199_v35 = vpop.eup %4247  ;;  %v8957_v50 = vld [vmem:[#allocation81_spill] sm:$0xff]  ;;  %v8959_v57 = vld [vmem:[#allocation94_spill] sm:$0xff] }
 0x369   :  { %2404 = vst.msk [vmem:[#allocation3 + $0x10] sm:$0xff] %vm8949_vm5, %v2339_v7  ;;  %v2005_v7 = vmul.f32 1.442695, %v1883_v20  ;;  %v2150_v13 = vmul.f32 %v7183_v9, %v2086_v59  ;;  %v8956_v20 = vld [vmem:[#allocation84_spill] sm:$0xff]  ;;  %v2066_v19 = vsel %vm5142_vm13, %v6948_v27, 0.0  ;;  %vm8962_vm13 = vmmov %vm8949_vm5  ;;  %v2074_v63 = vsel %vm8881_vm10, %v7197_v41, 0.0 }
 0x36a   :  { %4071 = vmatmul.msk.f32.gmra.mxu2 %vm5371_vm15, %v4234_v24  ;;  %2301 = vadd.xlane.f32.xlu2 %v2063_v40  ;;  %v2149_v24 = vmul.f32 %v7153_v56, %v2085_v51  ;;  %2402 = vst.msk [vmem:[#allocation3] sm:$0xff] %vm8949_vm5, %v2337_v5  ;;  %v2084_v51 = vld [vmem:[#allocation3 + $0x18] sm:$0xff]  ;;  %v1397_v40 = vmul.f32 1.442695, %v1323_v15  ;;  %vm8955_vm15 = vmmov %vm8949_vm5  ;;  %v8958_v59 = vld [vmem:[#allocation104_spill] sm:$0xff] }
 0x36b   :  { %2303 = vadd.xlane.f32.xlu1 %v2064_v2  ;;  %2299 = vadd.xlane.f32.xlu0 %v2062_v36  ;;  %v2148_v15 = vmul.f32 %v7187_v29, %v2084_v51  ;;  %v1399_v2 = vmul.f32 1.442695, %v1324_v45  ;;  %4253 = vpow2.f32 %v2005_v7  ;;  %v8960_v36 = vld [vmem:[#allocation91_spill] sm:$0xff]  ;;  %v7225_v45 = vpop.eup %4249  ;;  %v2067_v7 = vsel %vm5209_vm11, %v6977_v17, 0.0  ;;  %v2089_v51 = vld [vmem:[#allocation3 + $0x40] sm:$0xff]  ;;  %vm8966_vm11 = vmmov %vm8949_vm5 }
 0x36c   :  { %4097 = vmatmul.msk.f32.gmra.mxu3 %vm5275_vm9, %v7162_v62  ;;  %4255 = vpow2.f32 %v1397_v40  ;;  %v7231_v40 = vpop.eup %4251  ;;  %v2153_v17 = vmul.f32 %v7225_v45, %v2089_v51 }
 0x36d   :  { %v2218_v18 = vpop.xlane.xlu2 %2217  ;;  %4257 = vpow2.f32 %v1399_v2 }
 0x36e   :  { %v2341_v23 = vadd.f32 %v2218_v18, %v2149_v24  ;;  %v2220_v30 = vpop.xlane.xlu1 %2219  ;;  %v1322_v24 = vsub.f32 %v8957_v50, %v8956_v20  ;;  %v2088_v18 = vld [vmem:[#allocation3 + $0x38] sm:$0xff] }
 0x36f   :  { %v2342_v5 = vadd.f32 %v2220_v30, %v2150_v13  ;;  %v1326_v13 = vsub.f32 %v8960_v36, %v8959_v57  ;;  %v7219_v30 = vpop.f32.mrf.mxu1  ;;  %v2216_v27 = vpop.xlane.xlu0 %2215  ;;  %v8968_v36 = vld [vmem:[#allocation90_spill] sm:$0xff] }
 0x370   :  { %2406 = vst.msk [vmem:[#allocation3 + $0x20] sm:$0xff] %vm8955_vm15, %v2341_v23  ;;  %v1884_v23 = vsub.f32 %v8958_v59, %v7104_v6  ;;  %v2340_v6 = vadd.f32 %v2216_v27, %v2148_v15  ;;  %v1395_v20 = vmul.f32 1.442695, %v1322_v24  ;;  %vm8965_vm15 = vmmov %vm8949_vm5 }
 0x371   :  { %8961 = vst [vmem:[#allocation29_spill] sm:$0xff] %v7219_v30 }
 0x372   :  { %4072 = vmatmul.msk.f32.gmra.mxu2 %vm8906_vm2, %v4240_v11  ;;  %2307 = vadd.xlane.f32.xlu2 %v2066_v19  ;;  %2407 = vst.msk [vmem:[#allocation3 + $0x28] sm:$0xff] %vm8962_vm13, %v2342_v5  ;;  %v2087_v5 = vld [vmem:[#allocation3 + $0x30] sm:$0xff]  ;;  %v2007_v59 = vmul.f32 1.442695, %v1884_v23  ;;  %4259 = vpow2.f32 %v1395_v20  ;;  %v8967_v23 = vld [vmem:[#allocation93_spill] sm:$0xff] }
 0x373   :  { %2309 = vadd.xlane.f32.xlu1 %v2067_v7  ;;  %2405 = vst.msk [vmem:[#allocation3 + $0x18] sm:$0xff] %vm8965_vm15, %v2340_v6  ;;  %2305 = vadd.xlane.f32.xlu0 %v2065_v0  ;;  %v2151_v2 = vmul.f32 %v7231_v40, %v2087_v5  ;;  %v8969_v7 = vld [vmem:[#allocation105_spill] sm:$0xff]  ;;  %v8971_v5 = vld [vmem:[#allocation100_spill] sm:$0xff]  ;;  %v8973_v0 = vld [vmem:[#allocation110_spill] sm:$0xff] }
 0x374   :  { %4098 = vmatmul.msk.f32.gmra.mxu3 %vm8881_vm10, %v7197_v41  ;;  %4261 = vpow2.f32 %v2007_v59  ;;  %v1885_v51 = vsub.f32 %v8969_v7, %v7124_v16  ;;  %v2070_v16 = vsel %vm8695_vm0, %v7048_v52, 0.0  ;;  %vm8977_vm0 = vmmov %vm8972_vm1  ;;  %v2100_v41 = vld [vmem:[#allocation3 + $0x98] sm:$0xff] }
 0x375   :  { %v2224_v50 = vpop.xlane.xlu2 %2223  ;;  %vm8983_vm8 = vmmov %vm8977_vm0 }
 0x376   :  { %v2811_v8 = vpop.f32.mrf.mxu0  ;;  %v2226_v24 = vpop.xlane.xlu1 %2225  ;;  %vm8988_vm5 = vmmov %vm8977_vm0 }
 0x377   :  { %v7215_v54 = vadd.f32 %v7115_v39, %v2811_v8  ;;  %v2152_v39 = vmul.f32 %v7199_v35, %v2088_v18  ;;  %v8964_v8 = vld [vmem:[#allocation98_spill] sm:$0xff]  ;;  %v1403_v18 = vmul.f32 1.442695, %v1326_v13  ;;  %v1325_v13 = vsub.f32 %v8968_v36, %v8967_v23  ;;  %v7268_v59 = vpop.f32.mrf.mxu1  ;;  %vm8993_vm13 = vmmov %vm8977_vm0 }
 0x378   :  { %v2345_v27 = vadd.f32 %v2226_v24, %v2153_v17  ;;  %v8974_v17 = vld [vmem:[#allocation107_spill] sm:$0xff]  ;;  %v2009_v23 = vmul.f32 1.442695, %v1885_v51  ;;  %v8978_v51 = vld [vmem:[#allocation102_spill] sm:$0xff]  ;;  %vm9003_vm10 = vmmov %vm8977_vm0 }
 0x379   :  { %v2344_v15 = vadd.f32 %v2224_v50, %v2152_v39  ;;  %4263 = vpow2.f32 %v1403_v18  ;;  %v8970_v50 = vld [vmem:[#allocation103_spill] sm:$0xff]  ;;  %v1330_v24 = vsub.f32 %v8974_v17, %v8973_v0  ;;  %vm9007_vm15 = vmmov %vm8977_vm0 }
 0x37a   :  { %v3046_v11 = vpop.f32.mrf.mxu2  ;;  %2313 = vadd.xlane.f32.xlu2 %v2069_v1  ;;  %2410 = vst.msk [vmem:[#allocation3 + $0x40] sm:$0xff] %vm8972_vm1, %v2345_v27  ;;  %v8976_v1 = vld [vmem:[#allocation106_spill] sm:$0xff]  ;;  %vm9017_vm1 = vmmov %vm8977_vm0 }
 0x37b   :  { %v7223_v48 = vadd.f32 %v3046_v11, %v7065_v14  ;;  %v8963_v14 = vld [vmem:[#allocation101_spill] sm:$0xff]  ;;  %v7240_v11 = vpop.eup %4253  ;;  %2409 = vst.msk [vmem:[#allocation3 + $0x38] sm:$0xff] %vm8966_vm11, %v2344_v15  ;;  %2315 = vadd.xlane.f32.xlu1 %v2070_v16  ;;  %2311 = vadd.xlane.f32.xlu0 %v2068_v44  ;;  %vm9016_vm11 = vmmov %vm8977_vm0 }
 0x37c   :  { %v1327_v19 = vsub.f32 %v8964_v8, %v8963_v14  ;;  %v7244_v57 = vpop.eup %4255  ;;  %4099 = vmatmul.msk.f32.gmra.mxu3 %vm8886_vm14, %v7240_v11  ;;  %v1329_v14 = vsub.f32 %v8971_v5, %v8970_v50  ;;  %v2222_v8 = vpop.xlane.xlu0 %2221  ;;  %v8979_v50 = vld [vmem:[#allocation99_spill] sm:$0xff]  ;;  %v8982_v16 = vld [vmem:[#allocation109_spill] sm:$0xff] }
 0x37d   :  { %v7262_v15 = vpop.eup %4257  ;;  %v2343_v34 = vadd.f32 %v2222_v8, %v2151_v2  ;;  %v2155_v10 = vmul.f32 %v7244_v57, %v2091_v22  ;;  %v2230_v18 = vpop.xlane.xlu2 %2229  ;;  %v1886_v22 = vsub.f32 %v8976_v1, %v7142_v53  ;;  %v1328_v5 = vsub.f32 %v8979_v50, %v8978_v51 }
 0x37e   :  { %v2814_v6 = vpop.f32.mrf.mxu0  ;;  %v1405_v39 = vmul.f32 1.442695, %v1327_v19  ;;  %v2092_v19 = vld [vmem:[#allocation3 + $0x58] sm:$0xff]  ;;  %v7273_v36 = vpop.eup %4259  ;;  %v1409_v27 = vmul.f32 1.442695, %v1329_v14  ;;  %v2072_v53 = vsel %vm5253_vm6, %v7120_v21, 0.0  ;;  %vm8986_vm6 = vmmov %vm8977_vm0 }
 0x37f   :  { %v7257_v20 = vadd.f32 %v7164_v32, %v2814_v6  ;;  %v1401_v32 = vmul.f32 1.442695, %v1325_v13  ;;  %2408 = vst.msk [vmem:[#allocation3 + $0x30] sm:$0xff] %vm8975_vm4, %v2343_v34  ;;  %v2347_v2 = vadd.f32 %v2230_v18, %v2155_v10  ;;  %v2156_v52 = vmul.f32 %v7262_v15, %v2092_v19  ;;  %v2090_v13 = vld [vmem:[#allocation3 + $0x48] sm:$0xff]  ;;  %v7279_v6 = vpop.eup %4261  ;;  %v8981_v10 = vld [vmem:[#allocation112_spill] sm:$0xff]  ;;  %v2888_v50 = vpop.f32.mrf.mxu1  ;;  %vm9022_vm4 = vmmov %vm8977_vm0 }
 0x380   :  { %4265 = vpow2.f32 %v1405_v39  ;;  %v2232_v39 = vpop.xlane.xlu1 %2231  ;;  %v7284_v7 = vpop.eup %4263  ;;  %v2094_v14 = vld [vmem:[#allocation3 + $0x68] sm:$0xff]  ;;  %v1411_v8 = vmul.f32 1.442695, %v1330_v24  ;;  %v2154_v34 = vmul.f32 %v7273_v36, %v2090_v13  ;;  %v1332_v19 = vsub.f32 %v8982_v16, %v8981_v10  ;;  %v2095_v24 = vld [vmem:[#allocation3 + $0x70] sm:$0xff] }
 0x381   :  { %2412 = vst.msk [vmem:[#allocation3 + $0x50] sm:$0xff] %vm8977_vm0, %v2347_v2  ;;  %4267 = vpow2.f32 %v1401_v32  ;;  %v2348_v47 = vadd.f32 %v2232_v39, %v2156_v52  ;;  %v2011_v0 = vmul.f32 1.442695, %v1886_v22  ;;  %v2158_v3 = vmul.f32 %v7284_v7, %v2094_v14  ;;  %v8984_v52 = vld [vmem:[#allocation118_spill] sm:$0xff]  ;;  %v8985_v13 = vld [vmem:[#allocation115_spill] sm:$0xff] }
 0x382   :  { %4269 = vpow2.f32 %v2009_v23  ;;  %2319 = vadd.xlane.f32.xlu2 %v2072_v53  ;;  %v2073_v21 = vsel %vm5275_vm9, %v7162_v62, 0.0  ;;  %v1407_v23 = vmul.f32 1.442695, %v1328_v5  ;;  %v1333_v1 = vsub.f32 %v8985_v13, %v8984_v52  ;;  %v2093_v62 = vld [vmem:[#allocation3 + $0x60] sm:$0xff]  ;;  %v8989_v14 = vld [vmem:[#allocation111_spill] sm:$0xff] }
 0x383   :  { %4271 = vpow2.f32 %v1409_v27  ;;  %2413 = vst.msk [vmem:[#allocation3 + $0x58] sm:$0xff] %vm8983_vm8, %v2348_v47  ;;  %2321 = vadd.xlane.f32.xlu1 %v2073_v21  ;;  %v1415_v51 = vmul.f32 1.442695, %v1332_v19  ;;  %vm8987_vm9 = vnez %v8584_v58  ;;  %v2075_v58 = vsel %vm8886_vm14, %v7240_v11, 0.0  ;;  %vm8996_vm14 = vmmov %vm8977_vm0 }
 0x384   :  { %4100 = vmatmul.msk.f32.gmra.mxu3 %vm8720_vm3, %v7279_v6  ;;  %v2228_v32 = vpop.xlane.xlu0 %2227  ;;  %4273 = vpow2.f32 %v1411_v8  ;;  %v2071_v60 = vsel %vm8987_vm9, %v7079_v33, 0.0  ;;  %v8990_v8 = vld [vmem:[#allocation108_spill] sm:$0xff]  ;;  %v2097_v33 = vld [vmem:[#allocation3 + $0x80] sm:$0xff]  ;;  %v1417_v19 = vmul.f32 1.442695, %v1333_v1  ;;  %vm9026_vm8 = vmmov %vm8977_vm0 }
 0x385   :  { %v2346_v17 = vadd.f32 %v2228_v32, %v2154_v34  ;;  %v3049_v2 = vpop.f32.mrf.mxu2  ;;  %v2236_v44 = vpop.xlane.xlu2 %2235  ;;  %4275 = vpow2.f32 %v2011_v0  ;;  %2317 = vadd.xlane.f32.xlu0 %v2071_v60  ;;  %v1331_v34 = vsub.f32 %v8990_v8, %v8989_v14  ;;  %v8995_v60 = vld [vmem:[#allocation121_spill] sm:$0xff]  ;;  %vm9038_vm9 = vmmov %vm8977_vm0 }
 0x386   :  { %v7288_v31 = vpop.f32.mrf.mxu0  ;;  %v7300_v18 = vpop.eup %4265  ;;  %v7307_v27 = vadd.f32 %v3049_v2, %v7100_v49  ;;  %v2350_v22 = vadd.f32 %v2236_v44, %v2158_v3  ;;  %4277 = vpow2.f32 %v1407_v23  ;;  %v8992_v2 = vld [vmem:[#allocation117_spill] sm:$0xff]  ;;  %v2098_v44 = vld [vmem:[#allocation3 + $0x88] sm:$0xff] }
 0x387   :  { %8980 = vst [vmem:[#allocation15_spill] sm:$0xff] %v7288_v31  ;;  %v7312_v39 = vpop.eup %4267  ;;  %v2159_v49 = vmul.f32 %v7300_v18, %v2095_v24  ;;  %4279 = vpow2.f32 %v1415_v51  ;;  %v1413_v52 = vmul.f32 1.442695, %v1331_v34  ;;  %v8994_v51 = vld [vmem:[#allocation124_spill] sm:$0xff] }
 0x388   :  { %2411 = vst.msk [vmem:[#allocation3 + $0x48] sm:$0xff] %vm8986_vm6, %v2346_v17  ;;  %v7318_v5 = vpop.eup %4269  ;;  %v2238_v47 = vpop.xlane.xlu1 %2237  ;;  %v2157_v0 = vmul.f32 %v7312_v39, %v2093_v62  ;;  %v8991_v17 = vld [vmem:[#allocation120_spill] sm:$0xff]  ;;  %4281 = vpow2.f32 %v1417_v19  ;;  %vm9033_vm6 = vmmov %vm8977_vm0 }
 0x389   :  { %2415 = vst.msk [vmem:[#allocation3 + $0x68] sm:$0xff] %vm8988_vm5, %v2350_v22  ;;  %v7321_v53 = vpop.eup %4271  ;;  %v2351_v10 = vadd.f32 %v2238_v47, %v2159_v49  ;;  %v1335_v3 = vsub.f32 %v8992_v2, %v8991_v17  ;;  %v1336_v49 = vsub.f32 %v8995_v60, %v8994_v51  ;;  %4283 = vpow2.f32 %v1413_v52  ;;  %v9004_v60 = vld [vmem:[#allocation130_spill] sm:$0xff]  ;;  %vm9040_vm5 = vmmov %vm8977_vm0 }
 0x38a   :  { %2325 = vadd.xlane.f32.xlu2 %v2075_v58  ;;  %v7338_v24 = vpop.eup %4273  ;;  %v2161_v11 = vmul.f32 %v7321_v53, %v2097_v33  ;;  %v7361_v33 = vpop.f32.mrf.mxu1 }
 0x38b   :  { %2416 = vst.msk [vmem:[#allocation3 + $0x70] sm:$0xff] %vm8993_vm13, %v2351_v10  ;;  %v4276_v22 = vpop.eup %4275  ;;  %v1421_v14 = vmul.f32 1.442695, %v1335_v3  ;;  %v8998_v10 = vld [vmem:[#allocation119_spill] sm:$0xff]  ;;  %v1423_v17 = vmul.f32 1.442695, %v1336_v49  ;;  %vm9047_vm13 = vmmov %vm8977_vm0 }
 0x38c   :  { %4101 = vmatmul.msk.f32.gmra.mxu3 %vm8660_vm12, %v7318_v5  ;;  %v2234_v21 = vpop.xlane.xlu0 %2233  ;;  %v7350_v47 = vpop.eup %4277  ;;  %9000 = vst [vmem:[#allocation30_spill] sm:$0xff] %v7361_v33  ;;  %v2078_v42 = vsel %vm8637_vm7, %v4276_v22, 0.0  ;;  %v9005_v49 = vld [vmem:[#allocation127_spill] sm:$0xff] }
 0x38d   :  { %v2349_v23 = vadd.f32 %v2234_v21, %v2157_v0  ;;  %v3052_v55 = vpop.f32.mrf.mxu2  ;;  %v2242_v1 = vpop.xlane.xlu2 %2241  ;;  %2323 = vadd.xlane.f32.xlu0 %v2074_v63  ;;  %4285 = vpow2.f32 %v1421_v14  ;;  %v9001_v21 = vld [vmem:[#allocation126_spill] sm:$0xff] }
 0x38e   :  { %v2820_v16 = vpop.f32.mrf.mxu0  ;;  %v7345_v13 = vadd.f32 %v3052_v55, %v7138_v12  ;;  %v2353_v62 = vadd.f32 %v2242_v1, %v2161_v11  ;;  %v2162_v12 = vmul.f32 %v7338_v24, %v2098_v44  ;;  %v7357_v34 = vpop.eup %4279  ;;  %v2101_v1 = vld [vmem:[#allocation3 + $0xa0] sm:$0xff]  ;;  %4287 = vpow2.f32 %v1423_v17  ;;  %v2103_v17 = vld [vmem:[#allocation3 + $0xb0] sm:$0xff] }
 0x38f   :  { %v7332_v32 = vadd.f32 %v7268_v59, %v2820_v16  ;;  %v2076_v59 = vsel %vm8720_vm3, %v7279_v6, 0.0  ;;  %2414 = vst.msk [vmem:[#allocation3 + $0x60] sm:$0xff] %vm8996_vm14, %v2349_v23  ;;  %v2096_v6 = vld [vmem:[#allocation3 + $0x78] sm:$0xff]  ;;  %vm8997_vm3 = vmmov %vm8977_vm0  ;;  %v8999_v16 = vld [vmem:[#allocation116_spill] sm:$0xff]  ;;  %v2164_v61 = vmul.f32 %v7357_v34, %v2100_v41 }
 0x390   :  { %2327 = vadd.xlane.f32.xlu1 %v2076_v59  ;;  %2418 = vst.msk [vmem:[#allocation3 + $0x80] sm:$0xff] %vm8997_vm3, %v2353_v62  ;;  %v2244_v8 = vpop.xlane.xlu1 %2243  ;;  %v1334_v58 = vsub.f32 %v8999_v16, %v8998_v10  ;;  %v2160_v3 = vmul.f32 %v7350_v47, %v2096_v6  ;;  %v9002_v23 = vld [vmem:[#allocation123_spill] sm:$0xff]  ;;  %v7373_v59 = vpop.eup %4281  ;;  %v1339_v62 = vsub.f32 %v9005_v49, %v9004_v60  ;;  %v2077_v6 = vsel %vm8660_vm12, %v7318_v5, 0.0  ;;  %v2099_v10 = vld [vmem:[#allocation3 + $0x90] sm:$0xff]  ;;  %vm9013_vm12 = vmmov %vm8977_vm0 }
 0x391   :  { %v2354_v19 = vadd.f32 %v2244_v8, %v2162_v12  ;;  %v1338_v55 = vsub.f32 %v9002_v23, %v9001_v21  ;;  %v7382_v63 = vpop.eup %4283  ;;  %v2165_v8 = vmul.f32 %v7373_v59, %v2101_v1  ;;  %v9011_v5 = vld [vmem:[#allocation132_spill] sm:$0xff]  ;;  %v9012_v21 = vld [vmem:[#allocation129_spill] sm:$0xff]  ;;  %vm9051_vm14 = vmmov %vm8977_vm0 }
 0x392   :  { %2331 = vadd.xlane.f32.xlu2 %v2078_v42  ;;  %v2163_v37 = vmul.f32 %v7382_v63, %v2099_v10  ;;  %v1341_v23 = vsub.f32 %v9012_v21, %v9011_v5  ;;  %v2106_v5 = vld [vmem:[#allocation3 + $0xc8] sm:$0xff]  ;;  %vm9052_vm3 = vmmov %vm8977_vm0 }
 0x393   :  { %2419 = vst.msk [vmem:[#allocation3 + $0x88] sm:$0xff] %vm9003_vm10, %v2354_v19  ;;  %v1427_v12 = vmul.f32 1.442695, %v1338_v55  ;;  %v7389_v16 = vpop.eup %4285  ;;  %v9009_v19 = vld [vmem:[#allocation122_spill] sm:$0xff]  ;;  %v2894_v55 = vpop.f32.mrf.mxu1  ;;  %vm9058_vm10 = vmmov %vm8977_vm0 }
 0x394   :  { %4102 = vmatmul.msk.f32.gmra.mxu3 %vm8637_vm7, %v4276_v22  ;;  %v2240_v11 = vpop.xlane.xlu0 %2239  ;;  %v1419_v22 = vmul.f32 1.442695, %v1334_v58  ;;  %vm9006_vm7 = vmmov %vm8977_vm0  ;;  %v9008_v58 = vld [vmem:[#allocation125_spill] sm:$0xff]  ;;  %v2167_v1 = vmul.f32 %v7389_v16, %v2103_v17  ;;  %v1433_v10 = vmul.f32 1.442695, %v1341_v23 }
 0x395   :  { %v2352_v44 = vadd.f32 %v2240_v11, %v2160_v3  ;;  %v3055_v52 = vpop.f32.mrf.mxu2  ;;  %v2248_v51 = vpop.xlane.xlu2 %2247  ;;  %2329 = vadd.xlane.f32.xlu0 %v2077_v6  ;;  %v1429_v3 = vmul.f32 1.442695, %v1339_v62  ;;  %v9014_v62 = vld [vmem:[#allocation136_spill] sm:$0xff] }
 0x396   :  { %v2823_v0 = vpop.f32.mrf.mxu0  ;;  %v2356_v14 = vadd.f32 %v2248_v51, %v2164_v61  ;;  %4289 = vpow2.f32 %v1419_v22  ;;  %v2104_v22 = vld [vmem:[#allocation3 + $0xb8] sm:$0xff] }
 0x397   :  { %v7367_v2 = vadd.f32 %v2888_v50, %v2823_v0  ;;  %v7377_v50 = vadd.f32 %v3055_v52, %v7177_v4  ;;  %2417 = vst.msk [vmem:[#allocation3 + $0x78] sm:$0xff] %vm9006_vm7, %v2352_v44  ;;  %v1337_v0 = vsub.f32 %v9009_v19, %v9008_v58  ;;  %4291 = vpow2.f32 %v1427_v12  ;;  %v7399_v44 = vpop.eup %4287  ;;  %v2102_v58 = vld [vmem:[#allocation3 + $0xa8] sm:$0xff]  ;;  %vm9062_vm7 = vmmov %vm8977_vm0 }
 0x398   :  { %2421 = vst.msk [vmem:[#allocation3 + $0x98] sm:$0xff] %vm9007_vm15, %v2356_v14  ;;  %v2250_v4 = vpop.xlane.xlu1 %2249  ;;  %4293 = vpow2.f32 %v1429_v3  ;;  %v9015_v14 = vld [vmem:[#allocation133_spill] sm:$0xff]  ;;  %vm9063_vm15 = vmmov %vm8977_vm0 }
 0x399   :  { %v2357_v42 = vadd.f32 %v2250_v4, %v2165_v8  ;;  %v1425_v51 = vmul.f32 1.442695, %v1337_v0  ;;  %v1342_v12 = vsub.f32 %v9015_v14, %v9014_v62  ;;  %v2168_v4 = vmul.f32 %v7399_v44, %v2104_v22 }
 0x39b   :  { %2422 = vst.msk [vmem:[#allocation3 + $0xa0] sm:$0xff] %vm9013_vm12, %v2357_v42  ;;  %4295 = vpow2.f32 %v1425_v51  ;;  %v9019_v42 = vld [vmem:[#allocation128_spill] sm:$0xff]  ;;  %v1435_v21 = vmul.f32 1.442695, %v1342_v12  ;;  %v7425_v12 = vpop.f32.mrf.mxu1  ;;  %vm9069_vm12 = vmmov %vm8977_vm0 }
 0x39c   :  { %v2246_v11 = vpop.xlane.xlu0 %2245  ;;  %v7408_v8 = vpop.eup %4289  ;;  %4297 = vpow2.f32 %v1433_v10  ;;  %9023 = vst [vmem:[#allocation43_spill] sm:$0xff] %v7425_v12 }
 0x39d   :  { %v2355_v52 = vadd.f32 %v2246_v11, %v2163_v37  ;;  %v3058_v61 = vpop.f32.mrf.mxu2  ;;  %v2254_v49 = vpop.xlane.xlu2 %2253  ;;  %v2166_v23 = vmul.f32 %v7408_v8, %v2102_v58  ;;  %4299 = vpow2.f32 %v1435_v21  ;;  %v9024_v58 = vld [vmem:[#allocation142_spill] sm:$0xff] }
 0x39e   :  { %v7393_v41 = vpop.f32.mrf.mxu0  ;;  %v7403_v60 = vadd.f32 %v3058_v61, %v7215_v54  ;;  %v2359_v6 = vadd.f32 %v2254_v49, %v2167_v1  ;;  %v7412_v0 = vpop.eup %4291  ;;  %v9018_v54 = vld [vmem:[#allocation131_spill] sm:$0xff]  ;;  %v9028_v21 = vld [vmem:[#allocation134_spill] sm:$0xff] }
 0x39f   :  { %9010 = vst [vmem:[#allocation17_spill] sm:$0xff] %v7393_v41  ;;  %v1340_v17 = vsub.f32 %v9019_v42, %v9018_v54  ;;  %v9021_v61 = vld [vmem:[#allocation135_spill] sm:$0xff]  ;;  %v7422_v49 = vpop.eup %4293  ;;  %v2170_v14 = vmul.f32 %v7412_v0, %v2106_v5  ;;  %v2108_v41 = vld [vmem:[#allocation3 + $0xd8] sm:$0xff] }
 0x3a0   :  { %2420 = vst.msk [vmem:[#allocation3 + $0x90] sm:$0xff] %vm9016_vm11, %v2355_v52  ;;  %v2256_v19 = vpop.xlane.xlu1 %2255  ;;  %v9020_v52 = vld [vmem:[#allocation138_spill] sm:$0xff]  ;;  %vm9074_vm11 = vmmov %vm8977_vm0 }
 0x3a1   :  { %2424 = vst.msk [vmem:[#allocation3 + $0xb0] sm:$0xff] %vm9017_vm1, %v2359_v6  ;;  %v2360_v3 = vadd.f32 %v2256_v19, %v2168_v4  ;;  %v1344_v1 = vsub.f32 %v9021_v61, %v9020_v52  ;;  %v2107_v6 = vld [vmem:[#allocation3 + $0xd0] sm:$0xff]  ;;  %v1431_v4 = vmul.f32 1.442695, %v1340_v17  ;;  %v9025_v19 = vld [vmem:[#allocation139_spill] sm:$0xff]  ;;  %vm9075_vm1 = vmmov %vm8977_vm0 }
 0x3a2   :  { %v1345_v54 = vsub.f32 %v9025_v19, %v9024_v58  ;;  %v2171_v5 = vmul.f32 %v7422_v49, %v2107_v6  ;;  %v9031_v6 = vld [vmem:[#allocation144_spill] sm:$0xff]  ;;  %v9032_v58 = vld [vmem:[#allocation141_spill] sm:$0xff] }
 0x3a3   :  { %2425 = vst.msk [vmem:[#allocation3 + $0xb8] sm:$0xff] %vm9022_vm4, %v2360_v3  ;;  %v7433_v3 = vpop.eup %4295  ;;  %4301 = vpow2.f32 %v1431_v4  ;;  %v1347_v19 = vsub.f32 %v9032_v58, %v9031_v6  ;;  %v9037_v6 = vld [vmem:[#allocation145_spill] sm:$0xff]  ;;  %vm9081_vm4 = vmmov %vm8977_vm0 }
 0x3a4   :  { %v2252_v22 = vpop.xlane.xlu0 %2251  ;;  %v7437_v52 = vpop.eup %4297 }
 0x3a5   :  { %v2358_v51 = vadd.f32 %v2252_v22, %v2166_v23  ;;  %v3061_v62 = vpop.f32.mrf.mxu2  ;;  %v2260_v10 = vpop.xlane.xlu2 %2259  ;;  %v2105_v23 = vld [vmem:[#allocation3 + $0xc0] sm:$0xff] }
 0x3a6   :  { %v2829_v37 = vpop.f32.mrf.mxu0  ;;  %v2362_v42 = vadd.f32 %v2260_v10, %v2170_v14  ;;  %v1441_v14 = vmul.f32 1.442695, %v1345_v54  ;;  %v9030_v10 = vld [vmem:[#allocation201_spill] sm:$0xff]  ;;  %v7448_v4 = vpop.eup %4299  ;;  %v2110_v54 = vld [vmem:[#allocation3 + $0xe8] sm:$0xff] }
 0x3a7   :  { %v7416_v11 = vadd.f32 %v2894_v55, %v2829_v37  ;;  %v7428_v55 = vadd.f32 %v3061_v62, %v7257_v20  ;;  %2423 = vst.msk [vmem:[#allocation3 + $0xa8] sm:$0xff] %vm8977_vm0, %v2358_v51  ;;  %v1439_v37 = vmul.f32 1.442695, %v1344_v1  ;;  %v9027_v20 = vld [vmem:[#allocation137_spill] sm:$0xff]  ;;  %v2109_v51 = vld [vmem:[#allocation3 + $0xe0] sm:$0xff]  ;;  %v2169_v1 = vmul.f32 %v7433_v3, %v2105_v23  ;;  %v9036_v23 = vld [vmem:[#allocation148_spill] sm:$0xff] }
 0x3a8   :  { %2427 = vst.msk [vmem:[#allocation3 + $0xc8] sm:$0xff] %vm9026_vm8, %v2362_v42  ;;  %v2262_v17 = vpop.xlane.xlu1 %2261  ;;  %v1343_v61 = vsub.f32 %v9028_v21, %v9027_v20  ;;  %v1348_v58 = vsub.f32 %v9037_v6, %v9036_v23  ;;  %vm9085_vm8 = vmmov %vm8977_vm0 }
 0x3a9   :  { %v2363_v22 = vadd.f32 %v2262_v17, %v2171_v5  ;;  %4303 = vpow2.f32 %v1439_v37  ;;  %v2173_v17 = vmul.f32 %v7437_v52, %v2109_v51  ;;  %v7459_v33 = vpop.eup %4301  ;;  %v2174_v51 = vmul.f32 %v7448_v4, %v2110_v54  ;;  %v9045_v54 = vld [vmem:[#allocation150_spill] sm:$0xff] }
 0x3aa   :  { %1817 = vperm.xlu2 %4114, %v9030_v10   ;;  %v1437_v21 = vmul.f32 1.442695, %v1343_v61  ;;  %4305 = vpow2.f32 %v1441_v14  ;;  %v9042_v14 = vld [vmem:[#allocation143_spill] sm:$0xff] }
 0x3ab   :  { %2428 = vst.msk [vmem:[#allocation3 + $0xd0] sm:$0xff] %vm9033_vm6, %v2363_v22  ;;  %vm9091_vm6 = vmmov %vm8977_vm0 }
 0x3ac   :  { %v2258_v42 = vpop.xlane.xlu0 %2257  ;;  %4307 = vpow2.f32 %v1437_v21 }
 0x3ad   :  { %v2361_v12 = vadd.f32 %v2258_v42, %v2169_v1  ;;  %v7450_v20 = vpop.f32.mrf.mxu2  ;;  %v2266_v37 = vpop.xlane.xlu2 %2265  ;;  %v1445_v1 = vmul.f32 1.442695, %v1347_v19  ;;  %v2172_v19 = vmul.f32 %v7459_v33, %v2108_v41 }
 0x3ae   :  { %v7441_v62 = vpop.f32.mrf.mxu0  ;;  %9034 = vst [vmem:[#allocation13_spill] sm:$0xff] %v7450_v20  ;;  %v2365_v22 = vadd.f32 %v2266_v37, %v2173_v17  ;;  %v7461_v42 = vpop.f32.mrf.mxu1  ;;  %v2112_v17 = vld [vmem:[#allocation3 + $0xf8] sm:$0xff]  ;;  %v1447_v37 = vmul.f32 1.442695, %v1348_v58 }
 0x3af   :  { %9029 = vst [vmem:[#allocation31_spill] sm:$0xff] %v7441_v62  ;;  %v3244_v5 = vpop.f32.mrf.mxu3  ;;  %v7465_v61 = vpop.eup %4303  ;;  %4309 = vpow2.f32 %v1445_v1 }
 0x3b0   :  { %v7454_v62 = vadd.f32 %v3244_v5, %v7223_v48  ;;  %2426 = vst.msk [vmem:[#allocation3 + $0xc0] sm:$0xff] %vm9038_vm9, %v2361_v12  ;;  %v2268_v48 = vpop.xlane.xlu1 %2267  ;;  %v9043_v5 = vld [vmem:[#allocation140_spill] sm:$0xff]  ;;  %v7476_v21 = vpop.eup %4305  ;;  %4311 = vpow2.f32 %v1447_v37  ;;  %v9055_v37 = vld [vmem:[#allocation146_spill] sm:$0xff]  ;;  %vm9096_vm9 = vmmov %vm8977_vm0 }
 0x3b1   :  { %9039 = vst [vmem:[#allocation32_spill] sm:$0xff] %v7461_v42  ;;  %v1346_v23 = vsub.f32 %v9043_v5, %v9042_v14  ;;  %v2366_v6 = vadd.f32 %v2268_v48, %v2174_v51  ;;  %v9046_v42 = vld [vmem:[#allocation147_spill] sm:$0xff]  ;;  %v2176_v48 = vmul.f32 %v7465_v61, %v2112_v17  ;;  %v2113_v5 = vld [vmem:[#allocation3 + $0x100] sm:$0xff] }
 0x3b2   :  { %9035 = vst [vmem:[#allocation18_spill] sm:$0xff] %v7454_v62  ;;  %2555 = vperm.xlu2 %4114, %v7149_v25   ;;  %v2177_v17 = vmul.f32 %v7476_v21, %v2113_v5  ;;  %v9056_v5 = vld [vmem:[#allocation156_spill] sm:$0xff] }
 0x3b3   :  { %2430 = vst.msk [vmem:[#allocation3 + $0xe0] sm:$0xff] %vm9040_vm5, %v2365_v22  ;;  %v1350_v22 = vsub.f32 %v9046_v42, %v9045_v54  ;;  %v1443_v58 = vmul.f32 1.442695, %v1346_v23  ;;  %v9049_v42 = vld [vmem:[#allocation154_spill] sm:$0xff]  ;;  %v2111_v23 = vld [vmem:[#allocation3 + $0xf0] sm:$0xff]  ;;  %vm9097_vm5 = vmmov %vm8977_vm0 }
 0x3b4   :  { %9041 = vst [vmem:[#allocation21_spill] sm:$0xff] %v7465_v61  ;;  %v2264_v20 = vpop.xlane.xlu0 %2263 }
 0x3b5   :  { %2431 = vst.msk [vmem:[#allocation3 + $0xe8] sm:$0xff] %vm9047_vm13, %v2366_v6  ;;  %v2364_v30 = vadd.f32 %v2264_v20, %v2172_v19  ;;  %v3067_v14 = vpop.f32.mrf.mxu2  ;;  %v2272_v1 = vpop.xlane.xlu2 %2271  ;;  %v9050_v6 = vld [vmem:[#allocation151_spill] sm:$0xff]  ;;  %4313 = vpow2.f32 %v1443_v58  ;;  %vm9103_vm13 = vmmov %vm8977_vm0 }
 0x3b6   :  { %v7469_v12 = vpop.f32.mrf.mxu0  ;;  %v7480_v25 = vadd.f32 %v3067_v14, %v7332_v32  ;;  %v1351_v54 = vsub.f32 %v9050_v6, %v9049_v42  ;;  %v2368_v20 = vadd.f32 %v2272_v1, %v2176_v48  ;;  %v7488_v19 = vpop.eup %4307 }
 0x3b7   :  { %9044 = vst [vmem:[#allocation14_spill] sm:$0xff] %v7469_v12  ;;  %v3247_v51 = vpop.f32.mrf.mxu3  ;;  %v1451_v12 = vmul.f32 1.442695, %v1350_v22  ;;  %v7492_v14 = vpop.eup %4309  ;;  %v2175_v22 = vmul.f32 %v7488_v19, %v2111_v23 }
 0x3b8   :  { %v7483_v41 = vadd.f32 %v3247_v51, %v7307_v27  ;;  %2429 = vst.msk [vmem:[#allocation3 + $0xd8] sm:$0xff] %vm9051_vm14, %v2364_v30  ;;  %v2274_v32 = vpop.xlane.xlu1 %2273  ;;  %v9054_v27 = vld [vmem:[#allocation149_spill] sm:$0xff]  ;;  %v2115_v30 = vld [vmem:[#allocation3 + $0x110] sm:$0xff]  ;;  %v1453_v48 = vmul.f32 1.442695, %v1351_v54  ;;  %v7503_v62 = vpop.eup %4311  ;;  %vm9108_vm14 = vmmov %vm8977_vm0 }
 0x3b9   :  { %2433 = vst.msk [vmem:[#allocation3 + $0xf8] sm:$0xff] %vm9052_vm3, %v2368_v20  ;;  %v1349_v51 = vsub.f32 %v9055_v37, %v9054_v27  ;;  %v2369_v42 = vadd.f32 %v2274_v32, %v2177_v17  ;;  %4315 = vpow2.f32 %v1451_v12  ;;  %v9057_v20 = vld [vmem:[#allocation153_spill] sm:$0xff]  ;;  %v2179_v54 = vmul.f32 %v7492_v14, %v2115_v30  ;;  %vm9109_vm3 = vmmov %vm8977_vm0 }
 0x3ba   :  { %9048 = vst [vmem:[#allocation33_spill] sm:$0xff] %v7483_v41  ;;  %v2903_v41 = vpop.f32.mrf.mxu1  ;;  %2570 = vperm.xlu2 %4114, %v7187_v29   ;;  %v1353_v31 = vsub.f32 %v9057_v20, %v9056_v5  ;;  %4317 = vpow2.f32 %v1453_v48  ;;  %v9066_v48 = vld [vmem:[#allocation152_spill] sm:$0xff] }
 0x3bb   :  { %9053 = vst [vmem:[#allocation44_spill] sm:$0xff] %v7492_v14  ;;  %v1449_v37 = vmul.f32 1.442695, %v1349_v51  ;;  %v7515_v20 = vpop.eup %4313  ;;  %v2114_v51 = vld [vmem:[#allocation3 + $0x108] sm:$0xff] }
 0x3bc   :  { %2434 = vst.msk [vmem:[#allocation3 + $0x100] sm:$0xff] %vm9058_vm10, %v2369_v42  ;;  %v2270_v58 = vpop.xlane.xlu0 %2269  ;;  %v9061_v42 = vld [vmem:[#allocation157_spill] sm:$0xff]  ;;  %vm9114_vm10 = vmmov %vm8977_vm0 }
 0x3bd   :  { %v2367_v27 = vadd.f32 %v2270_v58, %v2175_v22  ;;  %v3070_v17 = vpop.f32.mrf.mxu2  ;;  %v2278_v23 = vpop.xlane.xlu2 %2277  ;;  %v1457_v58 = vmul.f32 1.442695, %v1353_v31  ;;  %4319 = vpow2.f32 %v1449_v37  ;;  %v9067_v31 = vld [vmem:[#allocation162_spill] sm:$0xff] }
 0x3be   :  { %v2838_v6 = vpop.f32.mrf.mxu0  ;;  %v7507_v29 = vadd.f32 %v3070_v17, %v7367_v2  ;;  %v2371_v22 = vadd.f32 %v2278_v23, %v2179_v54  ;;  %v9068_v54 = vld [vmem:[#allocation159_spill] sm:$0xff] }
 0x3bf   :  { %v7496_v1 = vadd.f32 %v2903_v41, %v2838_v6  ;;  %v3250_v32 = vpop.f32.mrf.mxu3  ;;  %v2116_v41 = vld [vmem:[#allocation3 + $0x118] sm:$0xff]  ;;  %v9060_v6 = vld [vmem:[#allocation160_spill] sm:$0xff]  ;;  %2432 = vst.msk [vmem:[#allocation3 + $0xf0] sm:$0xff] %vm9062_vm7, %v2367_v27  ;;  %v7519_v17 = vpop.eup %4315  ;;  %v2178_v27 = vmul.f32 %v7515_v20, %v2114_v51  ;;  %4321 = vpow2.f32 %v1457_v58  ;;  %v9072_v51 = vld [vmem:[#allocation166_spill] sm:$0xff] }
 0x3c0   :  { %v7510_v12 = vadd.f32 %v3250_v32, %v7345_v13  ;;  %v1354_v5 = vsub.f32 %v9061_v42, %v9060_v6  ;;  %v2180_v30 = vmul.f32 %v7503_v62, %v2116_v41  ;;  %2436 = vst.msk [vmem:[#allocation3 + $0x110] sm:$0xff] %vm9063_vm15, %v2371_v22  ;;  %v2280_v2 = vpop.xlane.xlu1 %2279  ;;  %v9065_v13 = vld [vmem:[#allocation155_spill] sm:$0xff]  ;;  %v1356_v41 = vsub.f32 %v9068_v54, %v9067_v31  ;;  %v7528_v22 = vpop.eup %4317  ;;  %vm9119_vm7 = vmmov %vm8977_vm0 }
 0x3c1   :  { %9064 = vst [vmem:[#allocation16_spill] sm:$0xff] %v7519_v17  ;;  %v1352_v32 = vsub.f32 %v9066_v48, %v9065_v13  ;;  %v2118_v6 = vld [vmem:[#allocation3 + $0x128] sm:$0xff]  ;;  %vm9120_vm15 = vmmov %vm8977_vm0 }
 0x3c2   :  { %9059 = vst [vmem:[#allocation23_spill] sm:$0xff] %v7510_v12  ;;  %v2372_v12 = vadd.f32 %v2280_v2, %v2180_v30  ;;  %v1459_v42 = vmul.f32 1.442695, %v1354_v5  ;;  %2585 = vperm.xlu2 %4114, %v7231_v40   ;;  %v2182_v30 = vmul.f32 %v7519_v17, %v2118_v6  ;;  %v2119_v5 = vld [vmem:[#allocation3 + $0x130] sm:$0xff]  ;;  %v9073_v48 = vld [vmem:[#allocation163_spill] sm:$0xff] }
 0x3c3   :  { %v1455_v2 = vmul.f32 1.442695, %v1352_v32  ;;  %v1357_v31 = vsub.f32 %v9073_v48, %v9072_v51  ;;  %v7539_v54 = vpop.eup %4319  ;;  %v2121_v51 = vld [vmem:[#allocation3 + $0x140] sm:$0xff] }
 0x3c4   :  { %2437 = vst.msk [vmem:[#allocation3 + $0x118] sm:$0xff] %vm9069_vm12, %v2372_v12  ;;  %v2276_v23 = vpop.xlane.xlu0 %2275  ;;  %4323 = vpow2.f32 %v1459_v42  ;;  %v9078_v42 = vld [vmem:[#allocation158_spill] sm:$0xff]  ;;  %vm9125_vm12 = vmmov %vm8977_vm0 }
 0x3c5   :  { %v2370_v37 = vadd.f32 %v2276_v23, %v2178_v27  ;;  %v7530_v26 = vpop.f32.mrf.mxu2  ;;  %v2284_v58 = vpop.xlane.xlu2 %2283  ;;  %v1463_v27 = vmul.f32 1.442695, %v1356_v41  ;;  %v2183_v23 = vmul.f32 %v7528_v22, %v2119_v5  ;;  %4325 = vpow2.f32 %v1455_v2  ;;  %v9079_v41 = vld [vmem:[#allocation168_spill] sm:$0xff] }
 0x3c6   :  { %9070 = vst [vmem:[#allocation45_spill] sm:$0xff] %v7530_v26  ;;  %v2374_v12 = vadd.f32 %v2284_v58, %v2182_v30  ;;  %v2117_v26 = vld [vmem:[#allocation3 + $0x120] sm:$0xff]  ;;  %v7543_v6 = vpop.eup %4321  ;;  %v1465_v48 = vmul.f32 1.442695, %v1357_v31  ;;  %v9080_v30 = vld [vmem:[#allocation165_spill] sm:$0xff] }
 0x3c7   :  { %v3253_v13 = vpop.f32.mrf.mxu3  ;;  %2435 = vst.msk [vmem:[#allocation3 + $0x108] sm:$0xff] %vm9074_vm11, %v2370_v37  ;;  %v2181_v37 = vmul.f32 %v7539_v54, %v2117_v26  ;;  %4327 = vpow2.f32 %v1463_v27  ;;  %v1359_v5 = vsub.f32 %v9080_v30, %v9079_v41  ;;  %vm9129_vm11 = vmmov %vm8977_vm0 }
 0x3c8   :  { %v7534_v40 = vadd.f32 %v3253_v13, %v7377_v50  ;;  %2439 = vst.msk [vmem:[#allocation3 + $0x128] sm:$0xff] %vm9075_vm1, %v2374_v12  ;;  %v2286_v32 = vpop.xlane.xlu1 %2285  ;;  %v9077_v50 = vld [vmem:[#allocation161_spill] sm:$0xff]  ;;  %4329 = vpow2.f32 %v1465_v48  ;;  %vm9130_vm1 = vmmov %vm8977_vm0 }
 0x3c9   :  { %9076 = vst [vmem:[#allocation24_spill] sm:$0xff] %v7543_v6  ;;  %v1355_v13 = vsub.f32 %v9078_v42, %v9077_v50  ;;  %v9083_v50 = vld [vmem:[#allocation172_spill] sm:$0xff]  ;;  %v1469_v30 = vmul.f32 1.442695, %v1359_v5  ;;  %v9089_v5 = vld [vmem:[#allocation174_spill] sm:$0xff] }
 0x3ca   :  { %9071 = vst [vmem:[#allocation34_spill] sm:$0xff] %v7534_v40  ;;  %v2375_v40 = vadd.f32 %v2286_v32, %v2183_v23  ;;  %2600 = vperm.xlu2 %4114, %v7273_v36   ;;  %v7552_v12 = vpop.eup %4323  ;;  %v2185_v23 = vmul.f32 %v7543_v6, %v2121_v51  ;;  %v2122_v32 = vld [vmem:[#allocation3 + $0x148] sm:$0xff] }
 0x3cb   :  { %v1461_v31 = vmul.f32 1.442695, %v1355_v13  ;;  %v7564_v41 = vpop.eup %4325  ;;  %v2186_v51 = vmul.f32 %v7552_v12, %v2122_v32  ;;  %v2120_v13 = vld [vmem:[#allocation3 + $0x138] sm:$0xff] }
 0x3cc   :  { %2440 = vst.msk [vmem:[#allocation3 + $0x130] sm:$0xff] %vm9081_vm4, %v2375_v40  ;;  %v2282_v58 = vpop.xlane.xlu0 %2281  ;;  %v9084_v40 = vld [vmem:[#allocation169_spill] sm:$0xff]  ;;  %vm9135_vm4 = vmmov %vm8977_vm0 }
 0x3cd   :  { %v2373_v2 = vadd.f32 %v2282_v58, %v2181_v37  ;;  %v3076_v17 = vpop.f32.mrf.mxu2  ;;  %v2290_v27 = vpop.xlane.xlu2 %2289  ;;  %v1360_v42 = vsub.f32 %v9084_v40, %v9083_v50  ;;  %4331 = vpow2.f32 %v1461_v31  ;;  %v2124_v50 = vld [vmem:[#allocation3 + $0x158] sm:$0xff] }
 0x3ce   :  { %v7556_v36 = vadd.f32 %v3076_v17, %v7416_v11  ;;  %v2377_v37 = vadd.f32 %v2290_v27, %v2185_v23  ;;  %v7568_v17 = vpop.eup %4327  ;;  %4333 = vpow2.f32 %v1469_v30  ;;  %v9090_v23 = vld [vmem:[#allocation171_spill] sm:$0xff] }
 0x3cf   :  { %v3256_v14 = vpop.f32.mrf.mxu3  ;;  %2438 = vst.msk [vmem:[#allocation3 + $0x120] sm:$0xff] %vm8977_vm0, %v2373_v2  ;;  %v1471_v40 = vmul.f32 1.442695, %v1360_v42  ;;  %v2184_v2 = vmul.f32 %v7564_v41, %v2120_v13  ;;  %v1362_v32 = vsub.f32 %v9090_v23, %v9089_v5  ;;  %v2125_v42 = vld [vmem:[#allocation3 + $0x160] sm:$0xff] }
 0x3d0   :  { %v7559_v26 = vadd.f32 %v3256_v14, %v7403_v60  ;;  %2442 = vst.msk [vmem:[#allocation3 + $0x140] sm:$0xff] %vm9085_vm8, %v2377_v37  ;;  %v2292_v11 = vpop.xlane.xlu1 %2291  ;;  %v9087_v60 = vld [vmem:[#allocation167_spill] sm:$0xff]  ;;  %v9088_v14 = vld [vmem:[#allocation164_spill] sm:$0xff]  ;;  %v7577_v37 = vpop.eup %4329  ;;  %v9094_v13 = vld [vmem:[#allocation178_spill] sm:$0xff] }
 0x3d1   :  { %9086 = vst [vmem:[#allocation46_spill] sm:$0xff] %v7568_v17  ;;  %v1358_v48 = vsub.f32 %v9088_v14, %v9087_v60  ;;  %v2378_v58 = vadd.f32 %v2292_v11, %v2186_v51  ;;  %v2188_v51 = vmul.f32 %v7568_v17, %v2124_v50  ;;  %4335 = vpow2.f32 %v1471_v40  ;;  %v9095_v14 = vld [vmem:[#allocation175_spill] sm:$0xff]  ;;  %v9100_v40 = vld [vmem:[#allocation170_spill] sm:$0xff]  ;;  %vm9137_vm8 = vmmov %vm8977_vm0 }
 0x3d2   :  { %9082 = vst [vmem:[#allocation19_spill] sm:$0xff] %v7559_v26  ;;  %2615 = vperm.xlu2 %4114, %v7312_v39   ;;  %v1363_v5 = vsub.f32 %v9095_v14, %v9094_v13  ;;  %v2127_v13 = vld [vmem:[#allocation3 + $0x170] sm:$0xff] }
 0x3d3   :  { %2443 = vst.msk [vmem:[#allocation3 + $0x148] sm:$0xff] %vm9091_vm6, %v2378_v58  ;;  %v1467_v11 = vmul.f32 1.442695, %v1358_v48  ;;  %v7588_v23 = vpop.eup %4331  ;;  %vm9140_vm6 = vmmov %vm8977_vm0 }
 0x3d4   :  { %v2288_v27 = vpop.xlane.xlu0 %2287  ;;  %v7592_v50 = vpop.eup %4333  ;;  %v1477_v14 = vmul.f32 1.442695, %v1363_v5 }
 0x3d5   :  { %v2376_v31 = vadd.f32 %v2288_v27, %v2184_v2  ;;  %v7579_v26 = vpop.f32.mrf.mxu2  ;;  %v2296_v30 = vpop.xlane.xlu2 %2295  ;;  %v1475_v2 = vmul.f32 1.442695, %v1362_v32  ;;  %v2189_v27 = vmul.f32 %v7577_v37, %v2125_v42  ;;  %9098 = vst [vmem:[#allocation20_spill] sm:$0xff] %v7592_v50  ;;  %4337 = vpow2.f32 %v1467_v11  ;;  %v9101_v32 = vld [vmem:[#allocation180_spill] sm:$0xff] }
 0x3d6   :  { %9092 = vst [vmem:[#allocation27_spill] sm:$0xff] %v7579_v26  ;;  %v2380_v58 = vadd.f32 %v2296_v30, %v2188_v51  ;;  %v2123_v26 = vld [vmem:[#allocation3 + $0x150] sm:$0xff]  ;;  %v9102_v51 = vld [vmem:[#allocation177_spill] sm:$0xff]  ;;  %v2191_v5 = vmul.f32 %v7592_v50, %v2127_v13 }
 0x3d7   :  { %v3259_v60 = vpop.f32.mrf.mxu3  ;;  %2441 = vst.msk [vmem:[#allocation3 + $0x138] sm:$0xff] %vm9096_vm9, %v2376_v31  ;;  %v2187_v31 = vmul.f32 %v7588_v23, %v2123_v26  ;;  %4339 = vpow2.f32 %v1475_v2  ;;  %v1365_v42 = vsub.f32 %v9102_v51, %v9101_v32  ;;  %v9106_v26 = vld [vmem:[#allocation184_spill] sm:$0xff]  ;;  %v9107_v2 = vld [vmem:[#allocation181_spill] sm:$0xff]  ;;  %vm9141_vm9 = vmmov %vm8977_vm0 }
 0x3d8   :  { %v7583_v39 = vadd.f32 %v3259_v60, %v7428_v55  ;;  %2445 = vst.msk [vmem:[#allocation3 + $0x158] sm:$0xff] %vm9097_vm5, %v2380_v58  ;;  %v2298_v48 = vpop.xlane.xlu1 %2297  ;;  %v9099_v55 = vld [vmem:[#allocation173_spill] sm:$0xff]  ;;  %v7601_v58 = vpop.eup %4335  ;;  %4341 = vpow2.f32 %v1477_v14  ;;  %v9111_v14 = vld [vmem:[#allocation176_spill] sm:$0xff]  ;;  %vm9142_vm5 = vmmov %vm8977_vm0 }
 0x3d9   :  { %v1361_v60 = vsub.f32 %v9100_v40, %v9099_v55  ;;  %v1366_v40 = vsub.f32 %v9107_v2, %v9106_v26  ;;  %v1481_v51 = vmul.f32 1.442695, %v1365_v42  ;;  %v2130_v26 = vld [vmem:[#allocation3 + $0x188] sm:$0xff]  ;;  %v9112_v42 = vld [vmem:[#allocation186_spill] sm:$0xff] }
 0x3da   :  { %9093 = vst [vmem:[#allocation35_spill] sm:$0xff] %v7583_v39  ;;  %v2381_v39 = vadd.f32 %v2298_v48, %v2189_v27  ;;  %2630 = vperm.xlu2 %4114, %v7350_v47   ;;  %v2128_v27 = vld [vmem:[#allocation3 + $0x178] sm:$0xff] }
 0x3db   :  { %v1473_v47 = vmul.f32 1.442695, %v1361_v60  ;;  %v7611_v32 = vpop.eup %4337  ;;  %v9110_v60 = vld [vmem:[#allocation179_spill] sm:$0xff]  ;;  %v1483_v2 = vmul.f32 1.442695, %v1366_v40 }
 0x3dc   :  { %2446 = vst.msk [vmem:[#allocation3 + $0x160] sm:$0xff] %vm9103_vm13, %v2381_v39  ;;  %v2294_v30 = vpop.xlane.xlu0 %2293  ;;  %vm9143_vm13 = vmmov %vm8977_vm0 }
 0x3dd   :  { %v2379_v11 = vadd.f32 %v2294_v30, %v2187_v31  ;;  %v7603_v17 = vpop.f32.mrf.mxu2  ;;  %v2302_v48 = vpop.xlane.xlu2 %2301  ;;  %v2192_v31 = vmul.f32 %v7601_v58, %v2128_v27  ;;  %v2126_v30 = vld [vmem:[#allocation3 + $0x168] sm:$0xff]  ;;  %4343 = vpow2.f32 %v1473_v47 }
 0x3de   :  { %9104 = vst [vmem:[#allocation47_spill] sm:$0xff] %v7603_v17  ;;  %v2383_v39 = vadd.f32 %v2302_v48, %v2191_v5  ;;  %v7615_v13 = vpop.eup %4339  ;;  %4345 = vpow2.f32 %v1481_v51  ;;  %v9113_v5 = vld [vmem:[#allocation183_spill] sm:$0xff] }
 0x3df   :  { %v7605_v55 = vpop.f32.mrf.mxu3  ;;  %2444 = vst.msk [vmem:[#allocation3 + $0x150] sm:$0xff] %vm9108_vm14, %v2379_v11  ;;  %v2190_v11 = vmul.f32 %v7611_v32, %v2126_v30  ;;  %v1368_v27 = vsub.f32 %v9113_v5, %v9112_v42  ;;  %4347 = vpow2.f32 %v1483_v2  ;;  %vm9144_vm14 = vmmov %vm8977_vm0 }
 0x3e0   :  { %9105 = vst [vmem:[#allocation36_spill] sm:$0xff] %v7605_v55  ;;  %v2304_v17 = vpop.xlane.xlu1 %2303  ;;  %v1364_v55 = vsub.f32 %v9111_v14, %v9110_v60  ;;  %v9117_v60 = vld [vmem:[#allocation190_spill] sm:$0xff] }
 0x3e1   :  { %2448 = vst.msk [vmem:[#allocation3 + $0x170] sm:$0xff] %vm9109_vm3, %v2383_v39  ;;  %v2384_v50 = vadd.f32 %v2304_v17, %v2192_v31  ;;  %v7624_v39 = vpop.eup %4341  ;;  %v2194_v17 = vmul.f32 %v7615_v13, %v2130_v26  ;;  %v2131_v31 = vld [vmem:[#allocation3 + $0x190] sm:$0xff]  ;;  %v1487_v5 = vmul.f32 1.442695, %v1368_v27  ;;  %vm9145_vm3 = vmmov %vm8977_vm0 }
 0x3e2   :  { %2682 = vperm.xlu2 %4114, %v7382_v63   ;;  %v1479_v40 = vmul.f32 1.442695, %v1364_v55  ;;  %v2195_v26 = vmul.f32 %v7624_v39, %v2131_v31  ;;  %v2129_v55 = vld [vmem:[#allocation3 + $0x180] sm:$0xff]  ;;  %v9123_v27 = vld [vmem:[#allocation192_spill] sm:$0xff] }
 0x3e3   :  { %2449 = vst.msk [vmem:[#allocation3 + $0x178] sm:$0xff] %vm9114_vm10, %v2384_v50  ;;  %v9118_v50 = vld [vmem:[#allocation187_spill] sm:$0xff]  ;;  %v7636_v42 = vpop.eup %4343  ;;  %vm9146_vm10 = vmmov %vm8977_vm0 }
 0x3e4   :  { %v2300_v48 = vpop.xlane.xlu0 %2299  ;;  %v1369_v14 = vsub.f32 %v9118_v50, %v9117_v60  ;;  %4349 = vpow2.f32 %v1479_v40  ;;  %v2133_v60 = vld [vmem:[#allocation3 + $0x1a0] sm:$0xff] }
 0x3e5   :  { %v2382_v47 = vadd.f32 %v2300_v48, %v2190_v11  ;;  %v3085_v6 = vpop.f32.mrf.mxu2  ;;  %v2308_v30 = vpop.xlane.xlu2 %2307  ;;  %4351 = vpow2.f32 %v1487_v5  ;;  %v9127_v5 = vld [vmem:[#allocation196_spill] sm:$0xff] }
 0x3e6   :  { %v7628_v63 = vadd.f32 %v3085_v6, %v7496_v1  ;;  %v2386_v11 = vadd.f32 %v2308_v30, %v2194_v17  ;;  %v7640_v6 = vpop.eup %4345  ;;  %v1489_v50 = vmul.f32 1.442695, %v1369_v14  ;;  %v9124_v17 = vld [vmem:[#allocation189_spill] sm:$0xff] }
 0x3e7   :  { %v3265_v61 = vpop.f32.mrf.mxu3  ;;  %2447 = vst.msk [vmem:[#allocation3 + $0x168] sm:$0xff] %vm9119_vm7, %v2382_v47  ;;  %v2193_v47 = vmul.f32 %v7636_v42, %v2129_v55  ;;  %v1371_v31 = vsub.f32 %v9124_v17, %v9123_v27  ;;  %v9128_v55 = vld [vmem:[#allocation193_spill] sm:$0xff]  ;;  %vm9148_vm7 = vnez %v8900_v28  ;;  %v9150_v28 = vld [vmem:[#allocation200_spill] sm:$0xff] }
 0x3e8   :  { %9115 = vst [vmem:[#allocation28_spill] sm:$0xff] %v7628_v63  ;;  %v7631_v51 = vadd.f32 %v3265_v61, %v7480_v25  ;;  %v2310_v1 = vpop.xlane.xlu1 %2309  ;;  %v9121_v61 = vld [vmem:[#allocation185_spill] sm:$0xff]  ;;  %v9122_v25 = vld [vmem:[#allocation182_spill] sm:$0xff]  ;;  %4353 = vpow2.f32 %v1489_v50 }
 0x3e9   :  { %2451 = vst.msk [vmem:[#allocation3 + $0x188] sm:$0xff] %vm9120_vm15, %v2386_v11  ;;  %v1367_v2 = vsub.f32 %v9122_v25, %v9121_v61  ;;  %v2387_v48 = vadd.f32 %v2310_v1, %v2195_v26  ;;  %v7649_v11 = vpop.eup %4347  ;;  %v2197_v61 = vmul.f32 %v7640_v6, %v2133_v60  ;;  %v2134_v26 = vld [vmem:[#allocation3 + $0x1a8] sm:$0xff]  ;;  %v1372_v25 = vsub.f32 %v9128_v55, %v9127_v5  ;;  %v2136_v5 = vld [vmem:[#allocation3 + $0x1b8] sm:$0xff]  ;;  %vm9152_vm15 = vmmov %vm8977_vm0 }
 0x3ea   :  { %9116 = vst [vmem:[#allocation22_spill] sm:$0xff] %v7631_v51  ;;  %2697 = vperm.xlu2 %4114, %v7408_v8   ;;  %v7658_v27 = vpop.eup %4349  ;;  %v1493_v17 = vmul.f32 1.442695, %v1371_v31  ;;  %v9133_v31 = vld [vmem:[#allocation198_spill] sm:$0xff] }
 0x3eb   :  { %2452 = vst.msk [vmem:[#allocation3 + $0x190] sm:$0xff] %vm9125_vm12, %v2387_v48  ;;  %v1485_v1 = vmul.f32 1.442695, %v1367_v2  ;;  %v7662_v60 = vpop.eup %4351  ;;  %v1495_v55 = vmul.f32 1.442695, %v1372_v25 }
 0x3ec   :  { %v2306_v30 = vpop.xlane.xlu0 %2305 }
 0x3ed   :  { %v2385_v40 = vadd.f32 %v2306_v30, %v2193_v47  ;;  %v2314_v8 = vpop.xlane.xlu2 %2313  ;;  %v2198_v47 = vmul.f32 %v7649_v11, %v2134_v26  ;;  %v2132_v30 = vld [vmem:[#allocation3 + $0x198] sm:$0xff]  ;;  %4355 = vpow2.f32 %v1485_v1 }
 0x3ee   :  { %v2389_v48 = vadd.f32 %v2314_v8, %v2197_v61  ;;  %4357 = vpow2.f32 %v1493_v17  ;;  %v9134_v61 = vld [vmem:[#allocation195_spill] sm:$0xff] }
 0x3ef   :  { %v3268_v63 = vpop.f32.mrf.mxu3  ;;  %2450 = vst.msk [vmem:[#allocation3 + $0x180] sm:$0xff] %vm9129_vm11, %v2385_v40  ;;  %v2196_v40 = vmul.f32 %v7658_v27, %v2132_v30  ;;  %v1374_v26 = vsub.f32 %v9134_v61, %v9133_v31  ;;  %4359 = vpow2.f32 %v1495_v55  ;;  %v9139_v61 = vld [vmem:[#allocation194_spill] sm:$0xff]  ;;  %v2139_v55 = vld [vmem:[#allocation3 + $0x1d0] sm:$0xff]  ;;  %vm9161_vm11 = vmmov %vm8977_vm0 }
 0x3f0   :  { %v7653_v14 = vadd.f32 %v3268_v63, %v7507_v29  ;;  %2454 = vst.msk [vmem:[#allocation3 + $0x1a0] sm:$0xff] %vm9130_vm1, %v2389_v48  ;;  %v2316_v2 = vpop.xlane.xlu1 %2315  ;;  %v9131_v29 = vld [vmem:[#allocation191_spill] sm:$0xff]  ;;  %v9132_v63 = vld [vmem:[#allocation188_spill] sm:$0xff]  ;;  %v7671_v48 = vpop.eup %4353 }
 0x3f1   :  { %v1370_v50 = vsub.f32 %v9132_v63, %v9131_v29  ;;  %v2390_v51 = vadd.f32 %v2316_v2, %v2198_v47  ;;  %v2200_v47 = vmul.f32 %v7662_v60, %v2136_v5  ;;  %v2137_v2 = vld [vmem:[#allocation3 + $0x1c0] sm:$0xff]  ;;  %v1499_v30 = vmul.f32 1.442695, %v1374_v26  ;;  %v2135_v63 = vld [vmem:[#allocation3 + $0x1b0] sm:$0xff]  ;;  %v9138_v5 = vld [vmem:[#allocation197_spill] sm:$0xff] }
 0x3f2   :  { %9126 = vst [vmem:[#allocation48_spill] sm:$0xff] %v7653_v14  ;;  %2712 = vperm.xlu2 %4114, %v7433_v3  }
 0x3f3   :  { %2455 = vst.msk [vmem:[#allocation3 + $0x1a8] sm:$0xff] %vm9135_vm4, %v2390_v51  ;;  %v1491_v25 = vmul.f32 1.442695, %v1370_v50  ;;  %v7677_v17 = vpop.eup %4355  ;;  %v2201_v51 = vmul.f32 %v7671_v48, %v2137_v2  ;;  %v1373_v50 = vsub.f32 %v9139_v61, %v9138_v5 }
 0x3f4   :  { %v2312_v8 = vpop.xlane.xlu0 %2311  ;;  %v7681_v31 = vpop.eup %4357 }
 0x3f5   :  { %v2388_v1 = vadd.f32 %v2312_v8, %v2196_v40  ;;  %v2320_v29 = vpop.xlane.xlu2 %2319  ;;  %4361 = vpow2.f32 %v1491_v25  ;;  %v2140_v25 = vld [vmem:[#allocation3 + $0x1d8] sm:$0xff] }
 0x3f6   :  { %v2392_v3 = vadd.f32 %v2320_v29, %v2200_v47  ;;  %4363 = vpow2.f32 %v1499_v30  ;;  %v7688_v47 = vpop.eup %4359 }
 0x3f7   :  { %v7673_v14 = vpop.f32.mrf.mxu3  ;;  %2453 = vst.msk [vmem:[#allocation3 + $0x198] sm:$0xff] %vm8977_vm0, %v2388_v1  ;;  %v2199_v1 = vmul.f32 %v7677_v17, %v2135_v63  ;;  %v2204_v30 = vmul.f32 %v7688_v47, %v2140_v25 }
 0x3f8   :  { %9136 = vst [vmem:[#allocation25_spill] sm:$0xff] %v7673_v14  ;;  %v2322_v40 = vpop.xlane.xlu1 %2321  ;;  %v1497_v14 = vmul.f32 1.442695, %v1373_v50 }
 0x3f9   :  { %2457 = vst.msk [vmem:[#allocation3 + $0x1b8] sm:$0xff] %vm9137_vm8, %v2392_v3  ;;  %v2393_v8 = vadd.f32 %v2322_v40, %v2201_v51  ;;  %v2203_v3 = vmul.f32 %v7681_v31, %v2139_v55  ;;  %v2138_v40 = vld [vmem:[#allocation3 + $0x1c8] sm:$0xff] }
 0x3fa   :  { %2727 = vperm.xlu2 %4114, %v7459_v33   ;;  %4365 = vpow2.f32 %v1497_v14 }
 0x3fb   :  { %2458 = vst.msk [vmem:[#allocation3 + $0x1c0] sm:$0xff] %vm9140_vm6, %v2393_v8  ;;  %v4362_v63 = vpop.eup %4361 }
 0x3fc   :  { %v2318_v26 = vpop.xlane.xlu0 %2317  ;;  %v7697_v8 = vpop.eup %4363 }
 0x3fd   :  { %v2391_v2 = vadd.f32 %v2318_v26, %v2199_v1  ;;  %v2326_v51 = vpop.xlane.xlu2 %2325  ;;  %v2142_v1 = vld [vmem:[#allocation3 + $0x1e8] sm:$0xff] }
 0x3fe   :  { %v2395_v33 = vadd.f32 %v2326_v51, %v2203_v3  ;;  %v2141_v51 = vld [vmem:[#allocation3 + $0x1e0] sm:$0xff] }
 0x3ff   :  { %v3274_v29 = vpop.f32.mrf.mxu3  ;;  %2456 = vst.msk [vmem:[#allocation3 + $0x1b0] sm:$0xff] %vm9141_vm9, %v2391_v2  ;;  %v2206_v2 = vmul.f32 %v7697_v8, %v2142_v1 }
 0x400   :  { %v7692_v5 = vadd.f32 %v3274_v29, %v7556_v36  ;;  %2460 = vst.msk [vmem:[#allocation3 + $0x1d0] sm:$0xff] %vm9142_vm5, %v2395_v33  ;;  %v2202_v36 = vmul.f32 %v4362_v63, %v2138_v40  ;;  %v4366_v25 = vpop.eup %4365  ;;  %v9147_v40 = vld [vmem:[#allocation113_spill] sm:$0xff] }
 0x401   :  { %v2205_v14 = vmul.f32 %v4366_v25, %v2141_v51 }
 0x402   :  { %2742 = vperm.xlu2 %4114, %v7488_v19  }
 0x403   :  { %v2328_v61 = vpop.xlane.xlu1 %2327 }
 0x404   :  { %v2396_v55 = vadd.f32 %v2328_v61, %v2204_v30  ;;  %v2324_v50 = vpop.xlane.xlu0 %2323 }
 0x405   :  { %v2394_v26 = vadd.f32 %v2324_v50, %v2202_v36  ;;  %v2332_v29 = vpop.xlane.xlu2 %2331 }
 0x406   :  { %2461 = vst.msk [vmem:[#allocation3 + $0x1d8] sm:$0xff] %vm9143_vm13, %v2396_v55  ;;  %v2398_v3 = vadd.f32 %v2332_v29, %v2206_v2 }
 0x407   :  { %2459 = vst.msk [vmem:[#allocation3 + $0x1c8] sm:$0xff] %vm9144_vm14, %v2394_v26 }
 0x408   :  { %2463 = vst.msk [vmem:[#allocation3 + $0x1e8] sm:$0xff] %vm9145_vm3, %v2398_v3  ;;  %v2144_v3 = vld [vmem:[#allocation3 + $0x1f8] sm:$0xff] }
 0x40a   :  { %2924 = vperm.xlu2 %4114, %v7515_v20   ;;  %v9149_v20 = vld [vmem:[#allocation202_spill] sm:$0xff] }
 0x40c   :  { %v2330_v33 = vpop.xlane.xlu0 %2329 }
 0x40d   :  { %v2397_v19 = vadd.f32 %v2330_v33, %v2205_v14  ;;  %v1818_v30 = vpop.permute.xlu2 %1817  ;;  %v9160_v14 = vld [vmem:[#allocation16_spill] sm:$0xff] }
 0x40e   :  { %v1887_v61 = vsub.f32 %v9147_v40, %v1818_v30  ;;  %v9163_v30 = vld [vmem:[#allocation46_spill] sm:$0xff] }
 0x40f   :  { %2462 = vst.msk [vmem:[#allocation3 + $0x1e0] sm:$0xff] %vm9146_vm10, %v2397_v19 }
 0x410   :  { %v2013_v55 = vmul.f32 1.442695, %v1887_v61 }
 0x412   :  { %4367 = vpow2.f32 %v2013_v55  ;;  %2939 = vperm.xlu2 %4114, %v7539_v54   ;;  %v1376_v54 = vsub.f32 %v9150_v28, %v9149_v20 }
 0x418   :  { %v4368_v1 = vpop.eup %4367 }
 0x419   :  { %4103 = vmatmul.msk.f32.gmra.mxu3 %vm9148_vm7, %v4368_v1  ;;  %v2079_v36 = vsel %vm9148_vm7, %v4368_v1, 0.0  ;;  %v9164_v1 = vld [vmem:[#allocation20_spill] sm:$0xff] }
 0x41a   :  { %2954 = vperm.xlu2 %4114, %v7564_v41   ;;  %2333 = vadd.xlane.f32.xlu1 %v2079_v36  ;;  %v1503_v41 = vmul.f32 1.442695, %v1376_v54 }
 0x41c   :  { %4369 = vpow2.f32 %v1503_v41 }
 0x422   :  { %2969 = vperm.xlu2 %4114, %v7588_v23   ;;  %v7725_v23 = vpop.eup %4369 }
 0x42a   :  { %2984 = vperm.xlu2 %4114, %v7611_v32   ;;  %v2143_v32 = vld [vmem:[#allocation3 + $0x1f0] sm:$0xff] }
 0x432   :  { %3117 = vperm.xlu2 %4114, %v7636_v42  }
 0x433   :  { %1822 = vperm.xlu1 %4113, %v9149_v20  }
 0x43a   :  { %3132 = vperm.xlu2 %4114, %v7658_v27  }
 0x43b   :  { %2560 = vperm.xlu1 %4113, %v7109_v43   ;;  %v9151_v43 = vld [vmem:[#allocation199_spill] sm:$0xff] }
 0x442   :  { %3147 = vperm.xlu2 %4114, %v7677_v17  }
 0x443   :  { %2580 = vperm.xlu1 %4113, %v7183_v9   ;;  %v1375_v9 = vsub.f32 %v9151_v43, %v9030_v10 }
 0x44a   :  { %3162 = vperm.xlu2 %4114, %v4362_v63  }
 0x44b   :  { %2595 = vperm.xlu1 %4113, %v7225_v45   ;;  %v1501_v45 = vmul.f32 1.442695, %v1375_v9 }
 0x44d   :  { %4371 = vpow2.f32 %v1501_v45 }
 0x452   :  { %3177 = vperm.xlu2 %4114, %v4366_v25  }
 0x453   :  { %2610 = vperm.xlu1 %4113, %v7262_v15   ;;  %v4372_v15 = vpop.eup %4371 }
 0x45a   :  { %3192 = vperm.xlu2 %4114, %v7725_v23  }
 0x45b   :  { %2625 = vperm.xlu1 %4113, %v7300_v18   ;;  %v2207_v18 = vmul.f32 %v4372_v15, %v2143_v32 }
 0x463   :  { %2677 = vperm.xlu1 %4113, %v7338_v24  }
 0x46b   :  { %2692 = vperm.xlu1 %4113, %v7373_v59  }
 0x473   :  { %2707 = vperm.xlu1 %4113, %v7399_v44   ;;  %v9153_v44 = vld [vmem:[#allocation114_spill] sm:$0xff] }
 0x47b   :  { %2722 = vperm.xlu1 %4113, %v7422_v49  }
 0x483   :  { %2737 = vperm.xlu1 %4113, %v7448_v4  }
 0x48b   :  { %2919 = vperm.xlu1 %4113, %v7476_v21  }
 0x48d   :  { %v2334_v42 = vpop.xlane.xlu1 %2333 }
 0x48e   :  { %v2399_v24 = vadd.f32 %v2334_v42, %v2207_v18  ;;  %v3308_v42 = vld [vmem:[#allocation4 + $0x30] sm:$0xff] }
 0x490   :  { %2464 = vst.msk [vmem:[#allocation3 + $0x1f0] sm:$0xff] %vm9152_vm15, %v2399_v24 }
 0x493   :  { %2934 = vperm.xlu1 %4113, %v7503_v62  }
 0x49b   :  { %2949 = vperm.xlu1 %4113, %v7528_v22   ;;  %v7750_v22 = vpop.permute.xlu2 %2555 }
 0x4a3   :  { %2964 = vperm.xlu1 %4113, %v7552_v12  }
 0x4a5   :  { %v1823_v59 = vpop.permute.xlu1 %1822 }
 0x4a6   :  { %v1888_v49 = vsub.f32 %v9153_v44, %v1823_v59  ;;  %v9166_v59 = vld [vmem:[#allocation204_spill] sm:$0xff] }
 0x4a7   :  { %vm9167_vm4 = vnez %v9166_v59  ;;  %v9168_v44 = vld [vmem:[#allocation12_spill] sm:$0xff] }
 0x4a8   :  { %v2015_v10 = vmul.f32 1.442695, %v1888_v49  ;;  %vm9169_vm0 = vnez %v9168_v44 }
 0x4aa   :  { %4373 = vpow2.f32 %v2015_v10 }
 0x4ab   :  { %2979 = vperm.xlu1 %4113, %v7577_v37   ;;  %v7755_v37 = vpop.permute.xlu2 %2570 }
 0x4ad   :  { %v2561_v4 = vpop.permute.xlu1 %2560 }
 0x4b0   :  { %v4374_v21 = vpop.eup %4373 }
 0x4b1   :  { %4104 = vmatmul.msk.f32.gmra.mxu3 %vm8906_vm2, %v4374_v21  ;;  %v2080_v27 = vsel %vm8906_vm2, %v4374_v21, 0.0 }
 0x4b2   :  { %2335 = vadd.xlane.f32.xlu0 %v2080_v27 }
 0x4b3   :  { %2994 = vperm.xlu1 %4113, %v7601_v58   ;;  %v7762_v46 = vpop.permute.xlu2 %2585 }
 0x4b5   :  { %v7748_v62 = vpop.permute.xlu1 %2580 }
 0x4bb   :  { %3127 = vperm.xlu1 %4113, %v7624_v39   ;;  %v9154_v39 = vld [vmem:[#allocation10_spill] sm:$0xff] }
 0x4bc   :  { %vm9155_vm2 = vcmp.lt.s32.totalorder %v9154_v39, 8 }
 0x4bd   :  { %v7753_v12 = vpop.permute.xlu1 %2595  ;;  %v7770_v63 = vsel %vm9155_vm2, %v2561_v4, 0.0  ;;  %vm9165_vm1 = vmmov %vm9155_vm2  ;;  %v7851_v4 = vpop.f32.mrf.mxu3 }
 0x4be   :  { %vm9171_vm8 = vmmov %vm9165_vm1 }
 0x4bf   :  { %v2636_v27 = vsel %vm9171_vm8, %v7755_v37, 0.0  ;;  %v9174_v37 = vld [vmem:[#allocation29_spill] sm:$0xff]  ;;  %vm9175_vm6 = vmmov %vm9165_vm1 }
 0x4c0   :  { %vm9180_vm9 = vmmov %vm9165_vm1 }
 0x4c1   :  { %vm9185_vm5 = vmmov %vm9165_vm1 }
 0x4c2   :  { %vm9187_vm13 = vmmov %vm9165_vm1 }
 0x4c3   :  { %3142 = vperm.xlu1 %4113, %v7649_v11   ;;  %v7774_v11 = vpop.permute.xlu2 %2600  ;;  %vm9188_vm14 = vmmov %vm9165_vm1 }
 0x4c4   :  { %vm9189_vm3 = vmmov %vm9165_vm1 }
 0x4c5   :  { %v7758_v17 = vpop.permute.xlu1 %2610  ;;  %vm9191_vm10 = vmmov %vm9165_vm1 }
 0x4c6   :  { %2565 = vperm.xlu0 %4112, %v7145_v38   ;;  %v9156_v38 = vld [vmem:[#allocation203_spill] sm:$0xff]  ;;  %vm9193_vm7 = vmmov %vm9165_vm1 }
 0x4c7   :  { %vm9157_vm12 = vnez %v9156_v38  ;;  %vm9198_vm15 = vmmov %vm9165_vm1 }
 0x4c8   :  { %vm9199_vm2 = vmmov %vm9165_vm1 }
 0x4c9   :  { %vm9204_vm8 = vmmov %vm9165_vm1 }
 0x4cb   :  { %3157 = vperm.xlu1 %4113, %v7671_v48  }
 0x4cd   :  { %v7764_v58 = vpop.permute.xlu1 %2625 }
 0x4ce   :  { %2575 = vperm.xlu0 %4112, %v7153_v56   ;;  %v7782_v56 = vpop.permute.xlu2 %2615 }
 0x4d3   :  { %3172 = vperm.xlu1 %4113, %v7688_v47  }
 0x4d5   :  { %v7772_v50 = vpop.permute.xlu1 %2677 }
 0x4d6   :  { %v2751_v48 = vsel %vm9157_vm12, %v7772_v50, %v7770_v63  ;;  %2590 = vperm.xlu0 %4112, %v7199_v35   ;;  %v7785_v47 = vpop.permute.xlu2 %2630  ;;  %v3312_v63 = vld [vmem:[#allocation4 + $0x50] sm:$0xff] }
 0x4db   :  { %3187 = vperm.xlu1 %4113, %v4372_v15  }
 0x4dd   :  { %v7805_v25 = vpop.permute.xlu1 %2692 }
 0x4de   :  { %2605 = vperm.xlu0 %4112, %v7244_v57   ;;  %v7788_v26 = vpop.permute.xlu2 %2682 }
 0x4e5   :  { %v7812_v33 = vpop.permute.xlu1 %2707 }
 0x4e6   :  { %2620 = vperm.xlu0 %4112, %v7284_v7   ;;  %v7791_v2 = vpop.permute.xlu2 %2697  ;;  %v9158_v7 = vld [vmem:[#allocation21_spill] sm:$0xff] }
 0x4ed   :  { %v7819_v61 = vpop.permute.xlu1 %2722 }
 0x4ee   :  { %2672 = vperm.xlu0 %4112, %v7321_v53   ;;  %v7795_v35 = vpop.permute.xlu2 %2712  ;;  %v9159_v53 = vld [vmem:[#allocation44_spill] sm:$0xff] }
 0x4f5   :  { %v7826_v20 = vpop.permute.xlu1 %2737 }
 0x4f6   :  { %2687 = vperm.xlu0 %4112, %v7357_v34   ;;  %v7798_v57 = vpop.permute.xlu2 %2727  ;;  %v2208_v34 = vmul.f32 %v7725_v23, %v2144_v3 }
 0x4fd   :  { %v2920_v41 = vpop.permute.xlu1 %2919 }
 0x4fe   :  { %2702 = vperm.xlu0 %4112, %v7389_v16   ;;  %v7801_v29 = vpop.permute.xlu2 %2742 }
 0x505   :  { %v2935_v9 = vpop.permute.xlu1 %2934 }
 0x506   :  { %2717 = vperm.xlu0 %4112, %v7412_v0   ;;  %v7807_v51 = vpop.permute.xlu2 %2924 }
 0x50d   :  { %v2950_v18 = vpop.permute.xlu1 %2949 }
 0x50e   :  { %2732 = vperm.xlu0 %4112, %v7437_v52   ;;  %v9162_v52 = vld [vmem:[#allocation24_spill] sm:$0xff]  ;;  %v7814_v19 = vpop.permute.xlu2 %2939 }
 0x516   :  { %2747 = vperm.xlu0 %4112, %v9158_v7   ;;  %v7821_v55 = vpop.permute.xlu2 %2954  ;;  %v3311_v7 = vld [vmem:[#allocation4 + $0x18] sm:$0xff] }
 0x51e   :  { %2929 = vperm.xlu0 %4112, %v9159_v53   ;;  %v7828_v28 = vpop.permute.xlu2 %2969 }
 0x525   :  { %v2336_v16 = vpop.xlane.xlu0 %2335 }
 0x526   :  { %v2400_v0 = vadd.f32 %v2336_v16, %v2208_v34  ;;  %2944 = vperm.xlu0 %4112, %v9160_v14   ;;  %v7833_v23 = vpop.permute.xlu2 %2984  ;;  %v2965_v34 = vpop.permute.xlu1 %2964 }
 0x528   :  { %2465 = vst.msk [vmem:[#allocation3 + $0x1f8] sm:$0xff] %vm9161_vm11, %v2400_v0  ;;  %vm9201_vm11 = vmmov %vm9165_vm1 }
 0x52e   :  { %2959 = vperm.xlu0 %4112, %v9162_v52   ;;  %v3118_v45 = vpop.permute.xlu2 %3117 }
 0x536   :  { %2974 = vperm.xlu0 %4112, %v9163_v30   ;;  %v3133_v24 = vpop.permute.xlu2 %3132  ;;  %v3280_v30 = vpop.f32.mrf.mxu3 }
 0x538   :  { %v7817_v40 = vpop.permute.xlu0 %2565 }
 0x53e   :  { %2989 = vperm.xlu0 %4112, %v9164_v1   ;;  %v3148_v0 = vpop.permute.xlu2 %3147  ;;  %v9173_v1 = vld [vmem:[#allocation15_spill] sm:$0xff] }
 0x540   :  { %v7824_v36 = vpop.permute.xlu0 %2575 }
 0x546   :  { %3122 = vperm.xlu0 %4112, %v7615_v13   ;;  %v2633_v13 = vsel %vm9165_vm1, %v7750_v22, 0.0 }
 0x548   :  { %v7831_v54 = vpop.permute.xlu0 %2590 }
 0x54e   :  { %3137 = vperm.xlu0 %4112, %v7640_v6  }
 0x550   :  { %v7836_v43 = vpop.permute.xlu0 %2605 }
 0x556   :  { %3152 = vperm.xlu0 %4112, %v7662_v60  }
 0x558   :  { %v7839_v15 = vpop.permute.xlu0 %2620 }
 0x55e   :  { %3167 = vperm.xlu0 %4112, %v7681_v31   ;;  %v9170_v31 = vld [vmem:[#allocation18_spill] sm:$0xff] }
 0x560   :  { %v2673_v32 = vpop.permute.xlu0 %2672 }
 0x561   :  { %v2750_v6 = vsel %vm9157_vm12, %v2673_v32, %v2633_v13  ;;  %v3314_v32 = vld [vmem:[#allocation4 + $0x8] sm:$0xff] }
 0x562   :  { %v2997_v60 = vsel %vm9167_vm4, %v2920_v41, %v2750_v6  ;;  %v2883_v41 = vadd.f32 %v9174_v37, %v9173_v1  ;;  %v7890_v37 = vpop.f32.mrf.mxu0 }
 0x563   :  { %v3195_v49 = vsel %vm9169_vm0, %v3118_v45, %v2997_v60  ;;  %v2639_v45 = vsel %vm9175_vm6, %v7762_v46, 0.0 }
 0x564   :  { %v3324_v10 = vmul.f32 %v3308_v42, %v3195_v49  ;;  %v9176_v42 = vld [vmem:[#allocation13_spill] sm:$0xff]  ;;  %v9177_v49 = vld [vmem:[#allocation36_spill] sm:$0xff] }
 0x565   :  { %v3100_v6 = vadd.f32 %v9176_v42, %v2883_v41 }
 0x566   :  { %v3340_v21 = vadd.f32 %v3324_v10, %v9170_v31  ;;  %3182 = vperm.xlu0 %4112, %v7697_v8   ;;  %v9172_v8 = vld [vmem:[#allocation34_spill] sm:$0xff] }
 0x567   :  { %v3298_v10 = vadd.f32 %v9177_v49, %v3100_v6 }
 0x568   :  { %3356 = vst [vmem:[#allocation4 + $0x30] sm:$0xff] %v3340_v21  ;;  %v2688_v22 = vpop.permute.xlu0 %2687  ;;  %v2980_v21 = vpop.permute.xlu1 %2979 }
 0x569   :  { %v2753_v53 = vsel %vm9157_vm12, %v2688_v22, %v2636_v27  ;;  %v3163_v27 = vpop.permute.xlu2 %3162  ;;  %v9178_v22 = vld [vmem:[#allocation17_spill] sm:$0xff] }
 0x56a   :  { %v3000_v3 = vsel %vm9167_vm4, %v2935_v9, %v2753_v53 }
 0x56b   :  { %v3198_v16 = vsel %vm9169_vm0, %v3133_v24, %v3000_v3  ;;  %v2642_v3 = vsel %vm9180_vm9, %v7774_v11, 0.0 }
 0x56c   :  { %v3327_v14 = vmul.f32 %v3311_v7, %v3198_v16  ;;  %v9179_v7 = vld [vmem:[#allocation30_spill] sm:$0xff] }
 0x56d   :  { %v2892_v53 = vadd.f32 %v9179_v7, %v9178_v22  ;;  %v9186_v7 = vld [vmem:[#allocation47_spill] sm:$0xff] }
 0x56e   :  { %v3343_v52 = vadd.f32 %v3327_v14, %v9172_v8  ;;  %v7883_v14 = vpop.f32.mrf.mxu3  ;;  %v9181_v8 = vld [vmem:[#allocation45_spill] sm:$0xff] }
 0x570   :  { %3359 = vst [vmem:[#allocation4 + $0x18] sm:$0xff] %v3343_v52  ;;  %v2703_v13 = vpop.permute.xlu0 %2702  ;;  %v3103_v52 = vadd.f32 %v9181_v8, %v2892_v53  ;;  %v2995_v6 = vpop.permute.xlu1 %2994 }
 0x571   :  { %v2756_v9 = vsel %vm9157_vm12, %v2703_v13, %v2639_v45  ;;  %v9182_v45 = vld [vmem:[#allocation25_spill] sm:$0xff] }
 0x572   :  { %v3003_v24 = vsel %vm9167_vm4, %v2950_v18, %v2756_v9  ;;  %v3317_v18 = vld [vmem:[#allocation4 + $0x20] sm:$0xff]  ;;  %v3301_v11 = vadd.f32 %v9182_v45, %v3103_v52  ;;  %v7897_v9 = vpop.f32.mrf.mxu2  ;;  %v2648_v45 = vsel %vm9187_vm13, %v7785_v47, 0.0  ;;  %v2635_v47 = vsel %vm9188_vm14, %v7817_v40, 0.0 }
 0x573   :  { %v3201_v60 = vsel %vm9169_vm0, %v3148_v0, %v3003_v24  ;;  %v9183_v24 = vld [vmem:[#allocation14_spill] sm:$0xff]  ;;  %v2638_v40 = vsel %vm9189_vm3, %v7748_v62, 0.0  ;;  %v2641_v62 = vsel %vm9191_vm10, %v7753_v12, 0.0  ;;  %v2644_v12 = vsel %vm9193_vm7, %v7758_v17, 0.0 }
 0x574   :  { %v3330_v31 = vmul.f32 %v3314_v32, %v3201_v60  ;;  %v7895_v32 = vpop.f32.mrf.mxu1  ;;  %v9184_v60 = vld [vmem:[#allocation32_spill] sm:$0xff] }
 0x575   :  { %v2901_v49 = vadd.f32 %v9184_v60, %v9183_v24  ;;  %v3323_v24 = vld [vmem:[#allocation4 + $0x28] sm:$0xff] }
 0x576   :  { %v3346_v46 = vadd.f32 %v3330_v31, %v3298_v10  ;;  %v3178_v10 = vpop.permute.xlu2 %3177 }
 0x577   :  { %v3106_v53 = vadd.f32 %v9186_v7, %v2901_v49  ;;  %v3310_v7 = vld [vmem:[#allocation4 + $0x58] sm:$0xff] }
 0x578   :  { %3362 = vst [vmem:[#allocation4 + $0x8] sm:$0xff] %v3346_v46  ;;  %v2718_v16 = vpop.permute.xlu0 %2717  ;;  %v3320_v46 = vld [vmem:[#allocation4 + $0x60] sm:$0xff] }
 0x579   :  { %v2759_v0 = vsel %vm9157_vm12, %v2718_v16, %v2642_v3 }
 0x57a   :  { %v3006_v1 = vsel %vm9167_vm4, %v2965_v34, %v2759_v0  ;;  %v2645_v34 = vsel %vm9185_vm5, %v7782_v56, 0.0  ;;  %v2844_v56 = vpop.f32.mrf.mxu0 }
 0x57b   :  { %v3204_v41 = vsel %vm9169_vm0, %v3163_v27, %v3006_v1  ;;  %v7904_v27 = vpop.f32.mrf.mxu3  ;;  %v3091_v1 = vpop.f32.mrf.mxu2 }
 0x57c   :  { %v3333_v13 = vmul.f32 %v3317_v18, %v3204_v41  ;;  %v3304_v18 = vadd.f32 %v3280_v30, %v3106_v53  ;;  %v2909_v52 = vpop.f32.mrf.mxu1 }
 0x57d   :  { %v2910_v41 = vadd.f32 %v2909_v52, %v2844_v56 }
 0x57e   :  { %v3349_v42 = vadd.f32 %v3333_v13, %v3301_v11  ;;  %v3128_v13 = vpop.permute.xlu1 %3127  ;;  %v3193_v30 = vpop.permute.xlu2 %3192 }
 0x57f   :  { %v3109_v60 = vadd.f32 %v3091_v1, %v2910_v41 }
 0x580   :  { %3365 = vst [vmem:[#allocation4 + $0x20] sm:$0xff] %v3349_v42  ;;  %v2733_v31 = vpop.permute.xlu0 %2732 }
 0x581   :  { %v2762_v22 = vsel %vm9157_vm12, %v2733_v31, %v2645_v34 }
 0x582   :  { %v3009_v3 = vsel %vm9167_vm4, %v2980_v21, %v2762_v22  ;;  %v2752_v22 = vsel %vm9157_vm12, %v7788_v26, %v2635_v47  ;;  %v2755_v26 = vsel %vm9157_vm12, %v7791_v2, %v2638_v40  ;;  %v2758_v2 = vsel %vm9157_vm12, %v7795_v35, %v2641_v62  ;;  %v9196_v47 = vld [vmem:[#allocation43_spill] sm:$0xff] }
 0x583   :  { %v3207_v16 = vsel %vm9169_vm0, %v3178_v10, %v3009_v3  ;;  %v3289_v42 = vpop.f32.mrf.mxu3  ;;  %v2761_v35 = vsel %vm9157_vm12, %v7798_v57, %v2644_v12  ;;  %v2907_v57 = vadd.f32 %v7895_v32, %v7890_v37  ;;  %v3309_v32 = vld [vmem:[#allocation4] sm:$0xff] }
 0x584   :  { %v3336_v0 = vmul.f32 %v3320_v46, %v3207_v16  ;;  %v3307_v10 = vadd.f32 %v3289_v42, %v3109_v60 }
 0x586   :  { %v3352_v8 = vadd.f32 %v3336_v0, %v3304_v18  ;;  %v3143_v16 = vpop.permute.xlu1 %3142  ;;  %v9190_v0 = vld [vmem:[#allocation23_spill] sm:$0xff] }
 0x588   :  { %3368 = vst [vmem:[#allocation4 + $0x60] sm:$0xff] %v3352_v8  ;;  %v2748_v11 = vpop.permute.xlu0 %2747  ;;  %v3313_v8 = vld [vmem:[#allocation4 + $0x68] sm:$0xff] }
 0x589   :  { %v2765_v21 = vsel %vm9157_vm12, %v2748_v11, %v2648_v45 }
 0x58a   :  { %v3012_v49 = vsel %vm9167_vm4, %v2995_v6, %v2765_v21 }
 0x58b   :  { %v3210_v34 = vsel %vm9169_vm0, %v3193_v30, %v3012_v49 }
 0x58c   :  { %v3339_v31 = vmul.f32 %v3323_v24, %v3210_v34  ;;  %v3316_v24 = vld [vmem:[#allocation4 + $0x40] sm:$0xff]  ;;  %v9194_v34 = vld [vmem:[#allocation48_spill] sm:$0xff] }
 0x58e   :  { %v3355_v46 = vadd.f32 %v3339_v31, %v3307_v10  ;;  %v3158_v11 = vpop.permute.xlu1 %3157  ;;  %v9195_v31 = vld [vmem:[#allocation31_spill] sm:$0xff] }
 0x590   :  { %3371 = vst [vmem:[#allocation4 + $0x28] sm:$0xff] %v3355_v46  ;;  %v2930_v53 = vpop.permute.xlu0 %2929  ;;  %v2898_v46 = vadd.f32 %v9196_v47, %v9195_v31  ;;  %v9203_v31 = vld [vmem:[#allocation22_spill] sm:$0xff] }
 0x591   :  { %v2999_v6 = vsel %vm9167_vm4, %v2930_v53, %v2752_v22 }
 0x592   :  { %v3197_v3 = vsel %vm9169_vm0, %v3128_v13, %v2999_v6  ;;  %v9192_v13 = vld [vmem:[#allocation35_spill] sm:$0xff] }
 0x593   :  { %v3326_v18 = vmul.f32 %v3310_v7, %v3197_v3  ;;  %v3319_v7 = vld [vmem:[#allocation4 + $0x38] sm:$0xff]  ;;  %v9197_v6 = vld [vmem:[#allocation27_spill] sm:$0xff] }
 0x594   :  { %v3105_v3 = vadd.f32 %v9197_v6, %v2898_v46  ;;  %v3318_v46 = vld [vmem:[#allocation4 + $0x10] sm:$0xff] }
 0x595   :  { %v3342_v56 = vadd.f32 %v3326_v18, %v9190_v0  ;;  %v2647_v0 = vsel %vm9198_vm15, %v7764_v58, 0.0  ;;  %v3321_v6 = vld [vmem:[#allocation4 + $0x70] sm:$0xff] }
 0x596   :  { %v3173_v22 = vpop.permute.xlu1 %3172  ;;  %v3303_v18 = vadd.f32 %v7851_v4, %v3105_v3 }
 0x597   :  { %3358 = vst [vmem:[#allocation4 + $0x58] sm:$0xff] %v3342_v56 }
 0x598   :  { %v2945_v52 = vpop.permute.xlu0 %2944 }
 0x599   :  { %v3002_v1 = vsel %vm9167_vm4, %v2945_v52, %v2755_v26  ;;  %v2764_v26 = vsel %vm9157_vm12, %v7801_v29, %v2647_v0  ;;  %v2998_v29 = vsel %vm9167_vm4, %v7807_v51, %v2751_v48 }
 0x59a   :  { %v3200_v41 = vsel %vm9169_vm0, %v3143_v16, %v3002_v1  ;;  %v3108_v1 = vadd.f32 %v7897_v9, %v2907_v57 }
 0x59b   :  { %v3329_v45 = vmul.f32 %v3313_v8, %v3200_v41  ;;  %v3322_v8 = vld [vmem:[#allocation4 + $0x78] sm:$0xff] }
 0x59d   :  { %v3345_v42 = vadd.f32 %v3329_v45, %v9192_v13  ;;  %v3306_v45 = vadd.f32 %v7904_v27, %v3108_v1  ;;  %v2637_v27 = vsel %vm9199_vm2, %v7824_v36, 0.0  ;;  %v2640_v36 = vsel %vm9201_vm11, %v7831_v54, 0.0 }
 0x59e   :  { %v3188_v41 = vpop.permute.xlu1 %3187  ;;  %v2643_v54 = vsel %vm9165_vm1, %v7836_v43, 0.0  ;;  %v2646_v43 = vsel %vm9204_vm8, %v7839_v15, 0.0 }
 0x59f   :  { %3361 = vst [vmem:[#allocation4 + $0x68] sm:$0xff] %v3345_v42  ;;  %v9200_v42 = vld [vmem:[#allocation33_spill] sm:$0xff] }
 0x5a0   :  { %v2960_v21 = vpop.permute.xlu0 %2959 }
 0x5a1   :  { %v3005_v60 = vsel %vm9167_vm4, %v2960_v21, %v2758_v2 }
 0x5a2   :  { %v3203_v30 = vsel %vm9169_vm0, %v3158_v11, %v3005_v60  ;;  %v9202_v60 = vld [vmem:[#allocation19_spill] sm:$0xff] }
 0x5a3   :  { %v3332_v49 = vmul.f32 %v3316_v24, %v3203_v30  ;;  %v2754_v24 = vsel %vm9157_vm12, %v7805_v25, %v2637_v27  ;;  %v2757_v25 = vsel %vm9157_vm12, %v7812_v33, %v2640_v36  ;;  %v2760_v33 = vsel %vm9157_vm12, %v7819_v61, %v2643_v54 }
 0x5a4   :  { %v3001_v48 = vsel %vm9167_vm4, %v7814_v19, %v2754_v24  ;;  %v3004_v19 = vsel %vm9167_vm4, %v7821_v55, %v2757_v25  ;;  %v3007_v55 = vsel %vm9167_vm4, %v7828_v28, %v2760_v33  ;;  %v2763_v61 = vsel %vm9157_vm12, %v7826_v20, %v2646_v43 }
 0x5a5   :  { %v3348_v10 = vadd.f32 %v3332_v49, %v9194_v34  ;;  %v3315_v49 = vld [vmem:[#allocation4 + $0x48] sm:$0xff]  ;;  %v3010_v28 = vsel %vm9167_vm4, %v7833_v23, %v2763_v61 }
 0x5a7   :  { %3364 = vst [vmem:[#allocation4 + $0x40] sm:$0xff] %v3348_v10 }
 0x5a8   :  { %v2975_v53 = vpop.permute.xlu0 %2974 }
 0x5a9   :  { %v3008_v16 = vsel %vm9167_vm4, %v2975_v53, %v2761_v35 }
 0x5aa   :  { %v3206_v17 = vsel %vm9169_vm0, %v3173_v22, %v3008_v16 }
 0x5ab   :  { %v3335_v40 = vmul.f32 %v3319_v7, %v3206_v17  ;;  %v9205_v17 = vld [vmem:[#allocation28_spill] sm:$0xff] }
 0x5ac   :  { %v3305_v39 = vadd.f32 %v7883_v14, %v9205_v17 }
 0x5ad   :  { %v3351_v56 = vadd.f32 %v3335_v40, %v3303_v18 }
 0x5af   :  { %3367 = vst [vmem:[#allocation4 + $0x38] sm:$0xff] %v3351_v56 }
 0x5b0   :  { %v2990_v52 = vpop.permute.xlu0 %2989 }
 0x5b1   :  { %v3011_v4 = vsel %vm9167_vm4, %v2990_v52, %v2764_v26 }
 0x5b2   :  { %v3209_v58 = vsel %vm9169_vm0, %v3188_v41, %v3011_v4 }
 0x5b3   :  { %v3338_v62 = vmul.f32 %v3322_v8, %v3209_v58 }
 0x5b5   :  { %v3354_v37 = vadd.f32 %v3338_v62, %v3306_v45 }
 0x5b7   :  { %3370 = vst [vmem:[#allocation4 + $0x78] sm:$0xff] %v3354_v37 }
 0x5b8   :  { %v3123_v11 = vpop.permute.xlu0 %3122 }
 0x5b9   :  { %v3196_v9 = vsel %vm9169_vm0, %v3123_v11, %v2998_v29 }
 0x5ba   :  { %v3325_v13 = vmul.f32 %v3309_v32, %v3196_v9 }
 0x5bc   :  { %v3341_v2 = vadd.f32 %v3325_v13, %v9200_v42 }
 0x5be   :  { %3357 = vst [vmem:[#allocation4] sm:$0xff] %v3341_v2 }
 0x5c0   :  { %v3138_v50 = vpop.permute.xlu0 %3137 }
 0x5c1   :  { %v3199_v51 = vsel %vm9169_vm0, %v3138_v50, %v3001_v48 }
 0x5c2   :  { %v3328_v21 = vmul.f32 %v3312_v63, %v3199_v51 }
 0x5c4   :  { %v3344_v30 = vadd.f32 %v3328_v21, %v9202_v60 }
 0x5c6   :  { %3360 = vst [vmem:[#allocation4 + $0x50] sm:$0xff] %v3344_v30 }
 0x5c8   :  { %v3153_v12 = vpop.permute.xlu0 %3152 }
 0x5c9   :  { %v3202_v34 = vsel %vm9169_vm0, %v3153_v12, %v3004_v19 }
 0x5ca   :  { %v3331_v10 = vmul.f32 %v3315_v49, %v3202_v34 }
 0x5cc   :  { %v3347_v47 = vadd.f32 %v3331_v10, %v9203_v31 }
 0x5ce   :  { %3363 = vst [vmem:[#allocation4 + $0x48] sm:$0xff] %v3347_v47 }
 0x5d0   :  { %v3168_v22 = vpop.permute.xlu0 %3167 }
 0x5d1   :  { %v3205_v35 = vsel %vm9169_vm0, %v3168_v22, %v3007_v55 }
 0x5d2   :  { %v3334_v7 = vmul.f32 %v3318_v46, %v3205_v35 }
 0x5d4   :  { %v3350_v53 = vadd.f32 %v3334_v7, %v7692_v5 }
 0x5d6   :  { %3366 = vst [vmem:[#allocation4 + $0x10] sm:$0xff] %v3350_v53 }
 0x5d8   :  { %v3183_v3 = vpop.permute.xlu0 %3182 }
 0x5d9   :  { %v3208_v16 = vsel %vm9169_vm0, %v3183_v3, %v3010_v28 }
 0x5da   :  { %v3337_v15 = vmul.f32 %v3321_v6, %v3208_v16 }
 0x5dc   :  { %v3353_v18 = vadd.f32 %v3337_v15, %v3305_v39 }
 0x5de   :  { %3369 = vst [vmem:[#allocation4 + $0x70] sm:$0xff] %v3353_v18 }
 0x5df PF:  { %v3382_v5 = vld [vmem:[#allocation3 + $0x20] sm:$0xff]  ;;  %v3380_v38 = vld [vmem:[#allocation3 + $0x10] sm:$0xff]  ;;  %v4535_v40 = vmov 0   ;;  %v3383_v23 = vld [vmem:[#allocation3 + $0x28] sm:$0xff]  ;;  %s4536_s4 = smov [#allocation7]   ;;  %s3964_s11 = sshll.u32 %s8310_s5, 4  ;;  %s3965_s11 = int_to_ptr.hbm [resolvable:$true] %s3964_s11 }
 0x5e0   :  { %v3378_v20 = vld [vmem:[#allocation3] sm:$0xff]  ;;  %4377 = vset.pattern.permute.xlu2 %v4535_v40  ;;  %4376 = vset.pattern.permute.xlu1 %v4535_v40  ;;  %4378 = vrcp.f32 %v3382_v5  ;;  %v3381_v59 = vld [vmem:[#allocation3 + $0x18] sm:$0xff]  ;;  %v3379_v44 = vld [vmem:[#allocation3 + $0x8] sm:$0xff]  ;;  %s3962_s8 = sshll.u32 %s4536_s4, 4  ;;  %s4537_s12 = smov 128   ;;  %s3963_s8 = int_to_ptr.vmem [resolvable:$true] %s3962_s8 }
 0x5e1   :  { %4375 = vset.pattern.permute.xlu0 %v4535_v40  ;;  %4380 = vrcp.f32 %v3380_v38  ;;  %v3386_v57 = vld [vmem:[#allocation3 + $0x40] sm:$0xff]  ;;  %v3385_v8 = vld [vmem:[#allocation3 + $0x38] sm:$0xff]  ;;  %v3384_v1 = vld [vmem:[#allocation3 + $0x30] sm:$0xff]  ;;  %s4538_s13 = smov 8  }
 0x5e2   :  { %4382 = vrcp.f32 %v3378_v20  ;;  %v3389_v4 = vld [vmem:[#allocation3 + $0x58] sm:$0xff]  ;;  %v3388_v45 = vld [vmem:[#allocation3 + $0x50] sm:$0xff]  ;;  %v3387_v37 = vld [vmem:[#allocation3 + $0x48] sm:$0xff] }
 0x5e3   :  { %4384 = vrcp.f32 %v3383_v23  ;;  %v3392_v11 = vld [vmem:[#allocation3 + $0x70] sm:$0xff]  ;;  %v3391_v9 = vld [vmem:[#allocation3 + $0x68] sm:$0xff]  ;;  %v3390_v13 = vld [vmem:[#allocation3 + $0x60] sm:$0xff] }
 0x5e4   :  { %4386 = vrcp.f32 %v3381_v59  ;;  %v3513_v2 = vld [vmem:[#allocation3 + $0x88] sm:$0xff]  ;;  %v3512_v63 = vld [vmem:[#allocation3 + $0x80] sm:$0xff]  ;;  %v3393_v48 = vld [vmem:[#allocation3 + $0x78] sm:$0xff] }
 0x5e5   :  { %4388 = vrcp.f32 %v3379_v44  ;;  %v3516_v36 = vld [vmem:[#allocation3 + $0xa0] sm:$0xff]  ;;  %v3515_v60 = vld [vmem:[#allocation3 + $0x98] sm:$0xff]  ;;  %v3514_v25 = vld [vmem:[#allocation3 + $0x90] sm:$0xff] }
 0x5e6   :  { %v4379_v0 = vpop.eup %4378  ;;  %4390 = vrcp.f32 %v3386_v57  ;;  %v3519_v12 = vld [vmem:[#allocation3 + $0xb8] sm:$0xff]  ;;  %v3518_v34 = vld [vmem:[#allocation3 + $0xb0] sm:$0xff]  ;;  %v3517_v10 = vld [vmem:[#allocation3 + $0xa8] sm:$0xff] }
 0x5e7   :  { %v4381_v14 = vpop.eup %4380  ;;  %3434 = vperm.xlu2 %4377, %v4379_v0   ;;  %4392 = vrcp.f32 %v3385_v8  ;;  %v3522_v47 = vld [vmem:[#allocation3 + $0xd0] sm:$0xff]  ;;  %v3521_v46 = vld [vmem:[#allocation3 + $0xc8] sm:$0xff]  ;;  %v3520_v55 = vld [vmem:[#allocation3 + $0xc0] sm:$0xff] }
 0x5e8   :  { %v4383_v56 = vpop.eup %4382  ;;  %3424 = vperm.xlu1 %4376, %v4381_v14   ;;  %4394 = vrcp.f32 %v3384_v1  ;;  %v3525_v43 = vld [vmem:[#allocation3 + $0xe8] sm:$0xff]  ;;  %v3524_v53 = vld [vmem:[#allocation3 + $0xe0] sm:$0xff]  ;;  %v3523_v6 = vld [vmem:[#allocation3 + $0xd8] sm:$0xff] }
 0x5e9   :  { %3414 = vperm.xlu0 %4375, %v4383_v56   ;;  %v4385_v26 = vpop.eup %4384  ;;  %4396 = vrcp.f32 %v3389_v4  ;;  %v3646_v28 = vld [vmem:[#allocation3 + $0x100] sm:$0xff]  ;;  %v3527_v17 = vld [vmem:[#allocation3 + $0xf8] sm:$0xff]  ;;  %v3526_v15 = vld [vmem:[#allocation3 + $0xf0] sm:$0xff] }
 0x5ea   :  { %v4387_v52 = vpop.eup %4386  ;;  %4398 = vrcp.f32 %v3388_v45  ;;  %v3649_v5 = vld [vmem:[#allocation3 + $0x118] sm:$0xff]  ;;  %v3648_v20 = vld [vmem:[#allocation3 + $0x110] sm:$0xff]  ;;  %v3647_v23 = vld [vmem:[#allocation3 + $0x108] sm:$0xff] }
 0x5eb   :  { %v4389_v41 = vpop.eup %4388  ;;  %4400 = vrcp.f32 %v3387_v37  ;;  %v3652_v44 = vld [vmem:[#allocation3 + $0x130] sm:$0xff]  ;;  %v3651_v14 = vld [vmem:[#allocation3 + $0x128] sm:$0xff]  ;;  %v3650_v57 = vld [vmem:[#allocation3 + $0x120] sm:$0xff] }
 0x5ec   :  { %v4391_v58 = vpop.eup %4390  ;;  %4402 = vrcp.f32 %v3392_v11  ;;  %v3658_v37 = vld [vmem:[#allocation3 + $0x160] sm:$0xff]  ;;  %v3657_v11 = vld [vmem:[#allocation3 + $0x158] sm:$0xff] }
 0x5ed   :  { %v4393_v62 = vpop.eup %4392  ;;  %4404 = vrcp.f32 %v3391_v9  ;;  %v3656_v9 = vld [vmem:[#allocation3 + $0x150] sm:$0xff] }
 0x5ee   :  { %v4395_v32 = vpop.eup %4394  ;;  %4406 = vrcp.f32 %v3390_v13 }
 0x5ef   :  { %3439 = vperm.xlu2 %4377, %v4385_v26   ;;  %v4397_v29 = vpop.eup %4396  ;;  %4408 = vrcp.f32 %v3513_v2 }
 0x5f0   :  { %3429 = vperm.xlu1 %4376, %v4387_v52   ;;  %v4399_v27 = vpop.eup %4398  ;;  %4410 = vrcp.f32 %v3512_v63  ;;  %v3655_v52 = vld [vmem:[#allocation3 + $0x148] sm:$0xff] }
 0x5f1   :  { %3419 = vperm.xlu0 %4375, %v4389_v41   ;;  %v4401_v42 = vpop.eup %4400  ;;  %4412 = vrcp.f32 %v3393_v48  ;;  %v3654_v41 = vld [vmem:[#allocation3 + $0x140] sm:$0xff] }
 0x5f2   :  { %v4403_v24 = vpop.eup %4402  ;;  %4414 = vrcp.f32 %v3516_v36 }
 0x5f3   :  { %v4405_v50 = vpop.eup %4404  ;;  %4416 = vrcp.f32 %v3515_v60  ;;  %v3782_v60 = vld [vmem:[#allocation3 + $0x190] sm:$0xff] }
 0x5f4   :  { %v4407_v51 = vpop.eup %4406  ;;  %4418 = vrcp.f32 %v3514_v25  ;;  %v3781_v25 = vld [vmem:[#allocation3 + $0x188] sm:$0xff] }
 0x5f5   :  { %v4409_v21 = vpop.eup %4408  ;;  %4420 = vrcp.f32 %v3519_v12  ;;  %v3780_v12 = vld [vmem:[#allocation3 + $0x180] sm:$0xff] }
 0x5f6   :  { %v4411_v30 = vpop.eup %4410  ;;  %4422 = vrcp.f32 %v3518_v34 }
 0x5f7   :  { %3454 = vperm.xlu2 %4377, %v4391_v58   ;;  %v4413_v49 = vpop.eup %4412  ;;  %4424 = vrcp.f32 %v3517_v10  ;;  %v3653_v58 = vld [vmem:[#allocation3 + $0x138] sm:$0xff] }
 0x5f8   :  { %3449 = vperm.xlu1 %4376, %v4393_v62   ;;  %v4415_v19 = vpop.eup %4414  ;;  %4426 = vrcp.f32 %v3522_v47 }
 0x5f9   :  { %3444 = vperm.xlu0 %4375, %v4395_v32   ;;  %v4417_v54 = vpop.eup %4416  ;;  %4428 = vrcp.f32 %v3521_v46  ;;  %v3784_v46 = vld [vmem:[#allocation3 + $0x1a0] sm:$0xff] }
 0x5fa   :  { %v4419_v31 = vpop.eup %4418  ;;  %4430 = vrcp.f32 %v3520_v55  ;;  %v3783_v55 = vld [vmem:[#allocation3 + $0x198] sm:$0xff] }
 0x5fb   :  { %v4421_v33 = vpop.eup %4420  ;;  %4432 = vrcp.f32 %v3525_v43  ;;  %v3925_v43 = vld [vmem:[#allocation4 + $0x28] sm:$0xff] }
 0x5fc   :  { %v4423_v22 = vpop.eup %4422  ;;  %4434 = vrcp.f32 %v3524_v53 }
 0x5fd   :  { %v4425_v35 = vpop.eup %4424  ;;  %4436 = vrcp.f32 %v3523_v6 }
 0x5fe   :  { %v4427_v7 = vpop.eup %4426  ;;  %4438 = vrcp.f32 %v3646_v28  ;;  %v3788_v28 = vld [vmem:[#allocation3 + $0x1c0] sm:$0xff] }
 0x5ff   :  { %3469 = vperm.xlu2 %4377, %v4397_v29   ;;  %v4429_v61 = vpop.eup %4428  ;;  %4440 = vrcp.f32 %v3527_v17  ;;  %v3787_v17 = vld [vmem:[#allocation3 + $0x1b8] sm:$0xff] }
 0x600   :  { %3464 = vperm.xlu1 %4376, %v4399_v27   ;;  %v4431_v3 = vpop.eup %4430  ;;  %4442 = vrcp.f32 %v3526_v15  ;;  %v3786_v15 = vld [vmem:[#allocation3 + $0x1b0] sm:$0xff] }
 0x601   :  { %3459 = vperm.xlu0 %4375, %v4401_v42   ;;  %v4433_v16 = vpop.eup %4432  ;;  %4444 = vrcp.f32 %v3649_v5  ;;  %v3661_v42 = vld [vmem:[#allocation3 + $0x178] sm:$0xff] }
 0x602   :  { %v4435_v39 = vpop.eup %4434  ;;  %4446 = vrcp.f32 %v3648_v20 }
 0x603   :  { %v4437_v18 = vpop.eup %4436  ;;  %4448 = vrcp.f32 %v3647_v23 }
 0x604   :  { %v4439_v38 = vpop.eup %4438  ;;  %4450 = vrcp.f32 %v3652_v44 }
 0x605   :  { %v4441_v40 = vpop.eup %4440  ;;  %4452 = vrcp.f32 %v3651_v14 }
 0x606   :  { %v4443_v59 = vpop.eup %4442  ;;  %4454 = vrcp.f32 %v3650_v57 }
 0x607   :  { %3484 = vperm.xlu2 %4377, %v4403_v24   ;;  %v4445_v0 = vpop.eup %4444  ;;  %4456 = vrcp.f32 %v3655_v52  ;;  %v3660_v24 = vld [vmem:[#allocation3 + $0x170] sm:$0xff] }
 0x608   :  { %3479 = vperm.xlu1 %4376, %v4405_v50   ;;  %v4447_v56 = vpop.eup %4446  ;;  %4458 = vrcp.f32 %v3654_v41  ;;  %v3659_v50 = vld [vmem:[#allocation3 + $0x168] sm:$0xff] }
 0x609   :  { %3474 = vperm.xlu0 %4375, %v4407_v51   ;;  %v4449_v26 = vpop.eup %4448  ;;  %4460 = vrcp.f32 %v3653_v58 }
 0x60a   :  { %v4451_v1 = vpop.eup %4450  ;;  %4462 = vrcp.f32 %v3658_v37 }
 0x60b   :  { %v4453_v4 = vpop.eup %4452  ;;  %4464 = vrcp.f32 %v3657_v11 }
 0x60c   :  { %v4455_v45 = vpop.eup %4454  ;;  %4466 = vrcp.f32 %v3656_v9 }
 0x60d   :  { %v4457_v32 = vpop.eup %4456  ;;  %4468 = vrcp.f32 %v3661_v42 }
 0x60e   :  { %v4459_v29 = vpop.eup %4458  ;;  %4470 = vrcp.f32 %v3660_v24 }
 0x60f   :  { %3553 = vperm.xlu2 %4377, %v4409_v21   ;;  %v4461_v27 = vpop.eup %4460  ;;  %4472 = vrcp.f32 %v3659_v50 }
 0x610   :  { %3548 = vperm.xlu1 %4376, %v4411_v30   ;;  %v4463_v2 = vpop.eup %4462  ;;  %4474 = vrcp.f32 %v3782_v60  ;;  %v3795_v60 = vld [vmem:[#allocation3 + $0x1f8] sm:$0xff] }
 0x611   :  { %3489 = vperm.xlu0 %4375, %v4413_v49   ;;  %v4465_v63 = vpop.eup %4464  ;;  %4476 = vrcp.f32 %v3781_v25 }
 0x612   :  { %v4467_v48 = vpop.eup %4466  ;;  %4478 = vrcp.f32 %v3780_v12 }
 0x613   :  { %v4469_v30 = vpop.eup %4468 }
 0x614   :  { %v4471_v49 = vpop.eup %4470 }
 0x617   :  { %3568 = vperm.xlu2 %4377, %v4415_v19   ;;  %v4473_v19 = vpop.eup %4472 }
 0x618   :  { %3563 = vperm.xlu1 %4376, %v4417_v54   ;;  %v4475_v47 = vpop.eup %4474 }
 0x619   :  { %3558 = vperm.xlu0 %4375, %v4419_v31   ;;  %v3785_v31 = vld [vmem:[#allocation3 + $0x1a8] sm:$0xff] }
 0x61a   :  { %4480 = vrcp.f32 %v3785_v31 }
 0x61b   :  { %4482 = vrcp.f32 %v3784_v46 }
 0x61c   :  { %4484 = vrcp.f32 %v3783_v55 }
 0x61d   :  { %4486 = vrcp.f32 %v3788_v28 }
 0x61e   :  { %4488 = vrcp.f32 %v3787_v17 }
 0x61f   :  { %3583 = vperm.xlu2 %4377, %v4421_v33   ;;  %v9206_v33 = vld [vmem:[#allocation10_spill] sm:$0xff]  ;;  %4490 = vrcp.f32 %v3786_v15 }
 0x620   :  { %3578 = vperm.xlu1 %4376, %v4423_v22   ;;  %vm3508_vm12 = vcmp.ge.s32.totalorder %v9206_v33, 8  ;;  %vm3509_vm4 = vcmp.lt.s32.totalorder %v9206_v33, 16  ;;  %v4477_v22 = vpop.eup %4476  ;;  %vm3376_vm6 = vcmp.lt.s32.totalorder %v9206_v33, 8  ;;  %vm3642_vm9 = vcmp.ge.s32.totalorder %v9206_v33, 16 }
 0x621   :  { %3573 = vperm.xlu0 %4375, %v4425_v35   ;;  %v4479_v35 = vpop.eup %4478  ;;  %vm8061_vm0 = vmand %vm3508_vm12, %vm3509_vm4  ;;  %vm3643_vm5 = vcmp.lt.s32.totalorder %v9206_v33, 24  ;;  %vm3776_vm14 = vcmp.ge.s32.totalorder %v9206_v33, 24  ;;  %vm3777_vm3 = vcmp.lt.s32.totalorder %v9206_v33, 32 }
 0x622   :  { %vm8133_vm13 = vmand %vm3642_vm9, %vm3643_vm5 }
 0x623   :  { %vm8186_vm10 = vmand %vm3776_vm14, %vm3777_vm3 }
 0x627   :  { %3598 = vperm.xlu2 %4377, %v4427_v7  }
 0x628   :  { %3593 = vperm.xlu1 %4376, %v4429_v61  }
 0x629   :  { %3588 = vperm.xlu0 %4375, %v4431_v3  }
 0x62f   :  { %3613 = vperm.xlu2 %4377, %v4433_v16   ;;  %v4481_v16 = vpop.eup %4480 }
 0x630   :  { %3608 = vperm.xlu1 %4376, %v4435_v39   ;;  %v4483_v39 = vpop.eup %4482 }
 0x631   :  { %3603 = vperm.xlu0 %4375, %v4437_v18   ;;  %v4485_v18 = vpop.eup %4484 }
 0x632   :  { %v4487_v44 = vpop.eup %4486 }
 0x633   :  { %v4489_v14 = vpop.eup %4488 }
 0x634   :  { %v4491_v57 = vpop.eup %4490 }
 0x637   :  { %3682 = vperm.xlu2 %4377, %v4439_v38  }
 0x638   :  { %3623 = vperm.xlu1 %4376, %v4441_v40  }
 0x639   :  { %3618 = vperm.xlu0 %4375, %v4443_v59   ;;  %v3791_v59 = vld [vmem:[#allocation3 + $0x1d8] sm:$0xff] }
 0x63a   :  { %4492 = vrcp.f32 %v3791_v59 }
 0x63f   :  { %3697 = vperm.xlu2 %4377, %v4445_v0   ;;  %v3790_v0 = vld [vmem:[#allocation3 + $0x1d0] sm:$0xff] }
 0x640   :  { %3692 = vperm.xlu1 %4376, %v4447_v56   ;;  %v3789_v56 = vld [vmem:[#allocation3 + $0x1c8] sm:$0xff]  ;;  %4494 = vrcp.f32 %v3790_v0  ;;  %v4493_v58 = vpop.eup %4492 }
 0x641   :  { %3687 = vperm.xlu0 %4375, %v4449_v26   ;;  %v8043_v8 = vpop.permute.xlu2 %3434  ;;  %4496 = vrcp.f32 %v3789_v56 }
 0x642   :  { %v8081_v5 = vsel %vm3376_vm6, %v8043_v8, 0.0 }
 0x646   :  { %v4495_v37 = vpop.eup %4494 }
 0x647   :  { %3712 = vperm.xlu2 %4377, %v4451_v1   ;;  %v4497_v11 = vpop.eup %4496 }
 0x648   :  { %3707 = vperm.xlu1 %4376, %v4453_v4   ;;  %v3794_v4 = vld [vmem:[#allocation3 + $0x1f0] sm:$0xff] }
 0x649   :  { %3702 = vperm.xlu0 %4375, %v4455_v45   ;;  %v8045_v62 = vpop.permute.xlu2 %3439  ;;  %v3793_v45 = vld [vmem:[#allocation3 + $0x1e8] sm:$0xff]  ;;  %4498 = vrcp.f32 %v3794_v4 }
 0x64a   :  { %4500 = vrcp.f32 %v3793_v45 }
 0x64f   :  { %3727 = vperm.xlu2 %4377, %v4457_v32   ;;  %v3792_v32 = vld [vmem:[#allocation3 + $0x1e0] sm:$0xff]  ;;  %v4499_v50 = vpop.eup %4498 }
 0x650   :  { %3722 = vperm.xlu1 %4376, %v4459_v29   ;;  %4502 = vrcp.f32 %v3792_v32 }
 0x651   :  { %3717 = vperm.xlu0 %4375, %v4461_v27   ;;  %v8047_v13 = vpop.permute.xlu2 %3454  ;;  %4504 = vrcp.f32 %v3795_v60 }
 0x657   :  { %3742 = vperm.xlu2 %4377, %v4463_v2  }
 0x658   :  { %3737 = vperm.xlu1 %4376, %v4465_v63  }
 0x659   :  { %3732 = vperm.xlu0 %4375, %v4467_v48   ;;  %v8049_v51 = vpop.permute.xlu2 %3469  ;;  %v4501_v48 = vpop.eup %4500 }
 0x65a   :  { %v8051_v36 = vpop.permute.xlu1 %3424 }
 0x65b   :  { %v8053_v21 = vpop.permute.xlu0 %3414 }
 0x65c   :  { %v3492_v27 = vsel %vm3376_vm6, %v8053_v21, 0.0 }
 0x65f   :  { %3757 = vperm.xlu2 %4377, %v4469_v30   ;;  %v4503_v30 = vpop.eup %4502 }
 0x660   :  { %3752 = vperm.xlu1 %4376, %v4471_v49  }
 0x661   :  { %3747 = vperm.xlu0 %4375, %v4473_v19   ;;  %v8055_v34 = vpop.permute.xlu2 %3484 }
 0x662   :  { %v8057_v54 = vpop.permute.xlu1 %3429 }
 0x663   :  { %v3420_v10 = vpop.permute.xlu0 %3419  ;;  %v3495_v49 = vsel %vm3376_vm6, %v8057_v54, 0.0 }
 0x664   :  { %v8068_v7 = vsel %vm3376_vm6, %v3420_v10, 0.0 }
 0x667   :  { %3826 = vperm.xlu2 %4377, %v4475_v47   ;;  %v4505_v47 = vpop.eup %4504 }
 0x668   :  { %3821 = vperm.xlu1 %4376, %v4477_v22  }
 0x669   :  { %3816 = vperm.xlu0 %4375, %v4479_v35   ;;  %v8070_v53 = vpop.permute.xlu2 %3553 }
 0x66a   :  { %v3627_v61 = vsel %vm8061_vm0, %v8070_v53, %v8068_v7  ;;  %v3450_v6 = vpop.permute.xlu1 %3449  ;;  %v3506_v53 = vsel %vm3376_vm6, %v8055_v34, 0.0 }
 0x66b   :  { %v8076_v3 = vpop.permute.xlu0 %3444  ;;  %v8093_v26 = vsel %vm3376_vm6, %v3450_v6, 0.0 }
 0x66c   :  { %v3498_v22 = vsel %vm3376_vm6, %v8076_v3, 0.0 }
 0x66f   :  { %3841 = vperm.xlu2 %4377, %v4481_v16  }
 0x670   :  { %3836 = vperm.xlu1 %4376, %v4483_v39  }
 0x671   :  { %3831 = vperm.xlu0 %4375, %v4485_v18   ;;  %v8083_v38 = vpop.permute.xlu2 %3568 }
 0x672   :  { %v3630_v20 = vsel %vm8061_vm0, %v8083_v38, %v8081_v5  ;;  %v3465_v40 = vpop.permute.xlu1 %3464  ;;  %v3917_v38 = vld [vmem:[#allocation4 + $0x48] sm:$0xff] }
 0x673   :  { %v8089_v23 = vpop.permute.xlu0 %3459  ;;  %v8103_v29 = vsel %vm3376_vm6, %v3465_v40, 0.0 }
 0x674   :  { %v3501_v17 = vsel %vm3376_vm6, %v8089_v23, 0.0 }
 0x677   :  { %3856 = vperm.xlu2 %4377, %v4487_v44  }
 0x678   :  { %3851 = vperm.xlu1 %4376, %v4489_v14  }
 0x679   :  { %3846 = vperm.xlu0 %4375, %v4491_v57   ;;  %v8095_v8 = vpop.permute.xlu2 %3583 }
 0x67a   :  { %v3633_v52 = vsel %vm8061_vm0, %v8095_v8, %v8093_v26  ;;  %v3480_v1 = vpop.permute.xlu1 %3479 }
 0x67b   :  { %v3475_v41 = vpop.permute.xlu0 %3474  ;;  %v8118_v21 = vsel %vm3376_vm6, %v3480_v1, 0.0 }
 0x67c   :  { %v3504_v59 = vsel %vm3376_vm6, %v3475_v41, 0.0 }
 0x67f   :  { %3871 = vperm.xlu2 %4377, %v4493_v58  }
 0x680   :  { %3866 = vperm.xlu1 %4376, %v4495_v37  }
 0x681   :  { %3861 = vperm.xlu0 %4375, %v4497_v11   ;;  %v8105_v9 = vpop.permute.xlu2 %3598 }
 0x682   :  { %v3636_v42 = vsel %vm8061_vm0, %v8105_v9, %v8103_v29  ;;  %v3549_v2 = vpop.permute.xlu1 %3548 }
 0x683   :  { %v3626_v24 = vsel %vm8061_vm0, %v3549_v2, %v3492_v27  ;;  %v3490_v63 = vpop.permute.xlu0 %3489 }
 0x684   :  { %v3507_v57 = vsel %vm3376_vm6, %v3490_v63, 0.0 }
 0x687   :  { %3886 = vperm.xlu2 %4377, %v4499_v50   ;;  %v3494_v50 = vsel %vm3376_vm6, %v8051_v36, 0.0  ;;  %v3497_v36 = vsel %vm3376_vm6, %v8045_v62, 0.0  ;;  %v3500_v62 = vsel %vm3376_vm6, %v8047_v13, 0.0  ;;  %v3503_v13 = vsel %vm3376_vm6, %v8049_v51, 0.0 }
 0x688   :  { %3881 = vperm.xlu1 %4376, %v4501_v48  }
 0x689   :  { %3876 = vperm.xlu0 %4375, %v4503_v30   ;;  %v8120_v25 = vpop.permute.xlu2 %3613  ;;  %v3912_v30 = vld [vmem:[#allocation4 + $0x58] sm:$0xff] }
 0x68a   :  { %v3639_v12 = vsel %vm8061_vm0, %v8120_v25, %v8118_v21  ;;  %v3564_v19 = vpop.permute.xlu1 %3563 }
 0x68b   :  { %v3629_v10 = vsel %vm8061_vm0, %v3564_v19, %v3495_v49  ;;  %v3559_v31 = vpop.permute.xlu0 %3558 }
 0x68c   :  { %v3628_v60 = vsel %vm8061_vm0, %v3559_v31, %v3494_v50  ;;  %v3915_v31 = vld [vmem:[#allocation4 + $0x68] sm:$0xff] }
 0x691   :  { %3891 = vperm.xlu0 %4375, %v4505_v47   ;;  %v3683_v54 = vpop.permute.xlu2 %3682 }
 0x692   :  { %v8142_v55 = vsel %vm8133_vm13, %v3683_v54, %v3626_v24  ;;  %v3579_v35 = vpop.permute.xlu1 %3578 }
 0x693   :  { %v3632_v6 = vsel %vm8061_vm0, %v3579_v35, %v3498_v22  ;;  %v3574_v28 = vpop.permute.xlu0 %3573 }
 0x694   :  { %v3631_v35 = vsel %vm8061_vm0, %v3574_v28, %v3497_v36 }
 0x699   :  { %v3698_v16 = vpop.permute.xlu2 %3697 }
 0x69a   :  { %v8151_v39 = vsel %vm8133_vm13, %v3698_v16, %v3629_v10  ;;  %v3594_v15 = vpop.permute.xlu1 %3593 }
 0x69b   :  { %v3635_v3 = vsel %vm8061_vm0, %v3594_v15, %v3501_v17  ;;  %v3589_v18 = vpop.permute.xlu0 %3588 }
 0x69c   :  { %v3634_v28 = vsel %vm8061_vm0, %v3589_v18, %v3500_v62 }
 0x6a1   :  { %v3713_v40 = vpop.permute.xlu2 %3712 }
 0x6a2   :  { %v8159_v44 = vsel %vm8133_vm13, %v3713_v40, %v3632_v6  ;;  %v3609_v0 = vpop.permute.xlu1 %3608 }
 0x6a3   :  { %v3638_v23 = vsel %vm8061_vm0, %v3609_v0, %v3504_v59  ;;  %v3604_v14 = vpop.permute.xlu0 %3603  ;;  %v3918_v59 = vld [vmem:[#allocation4 + $0x40] sm:$0xff] }
 0x6a4   :  { %v3637_v18 = vsel %vm8061_vm0, %v3604_v14, %v3503_v13  ;;  %v3923_v13 = vld [vmem:[#allocation4 + $0x70] sm:$0xff] }
 0x6a9   :  { %v3728_v56 = vpop.permute.xlu2 %3727 }
 0x6aa   :  { %v8167_v1 = vsel %vm8133_vm13, %v3728_v56, %v3635_v3  ;;  %v3624_v4 = vpop.permute.xlu1 %3623 }
 0x6ab   :  { %v3641_v41 = vsel %vm8061_vm0, %v3624_v4, %v3507_v57  ;;  %v8171_v58 = vpop.permute.xlu0 %3618 }
 0x6b1   :  { %v3743_v45 = vpop.permute.xlu2 %3742 }
 0x6b2   :  { %v8175_v37 = vsel %vm8133_vm13, %v3743_v45, %v3638_v23  ;;  %v3693_v32 = vpop.permute.xlu1 %3692  ;;  %v3921_v45 = vld [vmem:[#allocation4 + $0x38] sm:$0xff] }
 0x6b3   :  { %v3688_v11 = vpop.permute.xlu0 %3687  ;;  %v3762_v49 = vsel %vm8133_vm13, %v3693_v32, %v3628_v60 }
 0x6b4   :  { %v3761_v50 = vsel %vm8133_vm13, %v3688_v11, %v3627_v61  ;;  %v3640_v61 = vsel %vm8061_vm0, %v8171_v58, %v3506_v53  ;;  %v3924_v11 = vld [vmem:[#allocation4 + $0x78] sm:$0xff] }
 0x6b9   :  { %v3758_v27 = vpop.permute.xlu2 %3757 }
 0x6ba   :  { %v8179_v2 = vsel %vm8133_vm13, %v3758_v27, %v3641_v41  ;;  %v3708_v24 = vpop.permute.xlu1 %3707 }
 0x6bb   :  { %v3703_v63 = vpop.permute.xlu0 %3702  ;;  %v3765_v6 = vsel %vm8133_vm13, %v3708_v24, %v3631_v35  ;;  %v3911_v24 = vld [vmem:[#allocation4] sm:$0xff]  ;;  %v3914_v35 = vld [vmem:[#allocation4 + $0x50] sm:$0xff] }
 0x6bc   :  { %v3764_v33 = vsel %vm8133_vm13, %v3703_v63, %v3630_v20 }
 0x6c1   :  { %v3827_v19 = vpop.permute.xlu2 %3826 }
 0x6c2   :  { %v3896_v10 = vsel %vm8186_vm10, %v3827_v19, %v3762_v49  ;;  %v3723_v47 = vpop.permute.xlu1 %3722 }
 0x6c3   :  { %v3928_v54 = vmul.f32 %v3912_v30, %v3896_v10  ;;  %v3718_v22 = vpop.permute.xlu0 %3717  ;;  %v3768_v0 = vsel %vm8133_vm13, %v3723_v47, %v3634_v28  ;;  %v3910_v30 = vld [vmem:[#allocation4 + $0x30] sm:$0xff] }
 0x6c4   :  { %v3767_v20 = vsel %vm8133_vm13, %v3718_v22, %v3633_v52  ;;  %v3919_v52 = vld [vmem:[#allocation4 + $0x20] sm:$0xff] }
 0x6c5   :  { %3944 = vst [vmem:[#allocation7 + $0x10] sm:$0xff] %v3928_v54 }
 0x6c9   :  { %v3842_v16 = vpop.permute.xlu2 %3841 }
 0x6ca   :  { %v3899_v17 = vsel %vm8186_vm10, %v3842_v16, %v3765_v6  ;;  %v3738_v15 = vpop.permute.xlu1 %3737 }
 0x6cb   :  { %v3931_v3 = vmul.f32 %v3915_v31, %v3899_v17  ;;  %v8205_v40 = vpop.permute.xlu0 %3732  ;;  %v3771_v32 = vsel %vm8133_vm13, %v3738_v15, %v3637_v18  ;;  %v3913_v31 = vld [vmem:[#allocation4 + $0x18] sm:$0xff] }
 0x6cc   :  { %v3770_v26 = vsel %vm8133_vm13, %v8205_v40, %v3636_v42  ;;  %v3922_v42 = vld [vmem:[#allocation4 + $0x60] sm:$0xff] }
 0x6cd   :  { %3947 = vst [vmem:[#allocation7 + $0x28] sm:$0xff] %v3931_v3  ;;  %v3916_v3 = vld [vmem:[#allocation4 + $0x8] sm:$0xff] }
 0x6d1   :  { %v3857_v23 = vpop.permute.xlu2 %3856 }
 0x6d2   :  { %v3902_v56 = vsel %vm8186_vm10, %v3857_v23, %v3768_v0  ;;  %v3753_v57 = vpop.permute.xlu1 %3752  ;;  %v3920_v23 = vld [vmem:[#allocation4 + $0x10] sm:$0xff] }
 0x6d3   :  { %v3934_v4 = vmul.f32 %v3918_v59, %v3902_v56  ;;  %v8216_v41 = vpop.permute.xlu0 %3747  ;;  %v3774_v54 = vsel %vm8133_vm13, %v3753_v57, %v3640_v61 }
 0x6d4   :  { %v3773_v29 = vsel %vm8133_vm13, %v8216_v41, %v3639_v12 }
 0x6d5   :  { %3950 = vst [vmem:[#allocation7 + $0x40] sm:$0xff] %v3934_v4 }
 0x6d9   :  { %v3872_v27 = vpop.permute.xlu2 %3871 }
 0x6da   :  { %v3905_v51 = vsel %vm8186_vm10, %v3872_v27, %v3771_v32  ;;  %v3822_v60 = vpop.permute.xlu1 %3821 }
 0x6db   :  { %v3937_v14 = vmul.f32 %v3921_v45, %v3905_v51  ;;  %v3895_v49 = vsel %vm8186_vm10, %v3822_v60, %v3761_v50  ;;  %v3817_v19 = vpop.permute.xlu0 %3816 }
 0x6dc   :  { %v3927_v10 = vmul.f32 %v3911_v24, %v3895_v49  ;;  %v3894_v47 = vsel %vm8186_vm10, %v3817_v19, %v8142_v55 }
 0x6dd   :  { %3953 = vst [vmem:[#allocation7 + $0x58] sm:$0xff] %v3937_v14  ;;  %v3926_v7 = vmul.f32 %v3910_v30, %v3894_v47 }
 0x6de   :  { %3943 = vst [vmem:[#allocation7 + $0x8] sm:$0xff] %v3927_v10 }
 0x6df   :  { %3942 = vst [vmem:[#allocation7] sm:$0xff] %v3926_v7 }
 0x6e1   :  { %v3887_v36 = vpop.permute.xlu2 %3886 }
 0x6e2   :  { %v3908_v34 = vsel %vm8186_vm10, %v3887_v36, %v3774_v54  ;;  %v3837_v55 = vpop.permute.xlu1 %3836 }
 0x6e3   :  { %v3940_v58 = vmul.f32 %v3924_v11, %v3908_v34  ;;  %v3898_v6 = vsel %vm8186_vm10, %v3837_v55, %v3764_v33  ;;  %v3832_v16 = vpop.permute.xlu0 %3831 }
 0x6e4   :  { %v3930_v17 = vmul.f32 %v3914_v35, %v3898_v6  ;;  %v3897_v15 = vsel %vm8186_vm10, %v3832_v16, %v8151_v39 }
 0x6e5   :  { %3956 = vst [vmem:[#allocation7 + $0x70] sm:$0xff] %v3940_v58  ;;  %v3929_v5 = vmul.f32 %v3913_v31, %v3897_v15 }
 0x6e6   :  { %3946 = vst [vmem:[#allocation7 + $0x20] sm:$0xff] %v3930_v17 }
 0x6e7   :  { %3945 = vst [vmem:[#allocation7 + $0x18] sm:$0xff] %v3929_v5 }
 0x6ea   :  { %v3852_v63 = vpop.permute.xlu1 %3851 }
 0x6eb   :  { %v3901_v62 = vsel %vm8186_vm10, %v3852_v63, %v3767_v20  ;;  %v3847_v28 = vpop.permute.xlu0 %3846 }
 0x6ec   :  { %v3933_v39 = vmul.f32 %v3917_v38, %v3901_v62  ;;  %v3900_v59 = vsel %vm8186_vm10, %v3847_v28, %v8159_v44 }
 0x6ed   :  { %v3932_v0 = vmul.f32 %v3916_v3, %v3900_v59 }
 0x6ee   :  { %3949 = vst [vmem:[#allocation7 + $0x38] sm:$0xff] %v3933_v39 }
 0x6ef   :  { %3948 = vst [vmem:[#allocation7 + $0x30] sm:$0xff] %v3932_v0 }
 0x6f2   :  { %v3867_v8 = vpop.permute.xlu1 %3866 }
 0x6f3   :  { %v3904_v22 = vsel %vm8186_vm10, %v3867_v8, %v3770_v26  ;;  %v3862_v56 = vpop.permute.xlu0 %3861 }
 0x6f4   :  { %v3936_v44 = vmul.f32 %v3920_v23, %v3904_v22  ;;  %v3903_v57 = vsel %vm8186_vm10, %v3862_v56, %v8167_v1 }
 0x6f5   :  { %v3935_v4 = vmul.f32 %v3919_v52, %v3903_v57 }
 0x6f6   :  { %3952 = vst [vmem:[#allocation7 + $0x50] sm:$0xff] %v3936_v44 }
 0x6f7   :  { %3951 = vst [vmem:[#allocation7 + $0x48] sm:$0xff] %v3935_v4 }
 0x6fa   :  { %v3882_v9 = vpop.permute.xlu1 %3881 }
 0x6fb   :  { %v3907_v40 = vsel %vm8186_vm10, %v3882_v9, %v3773_v29  ;;  %v3877_v18 = vpop.permute.xlu0 %3876 }
 0x6fc   :  { %v3939_v1 = vmul.f32 %v3923_v13, %v3907_v40  ;;  %v3906_v45 = vsel %vm8186_vm10, %v3877_v18, %v8175_v37 }
 0x6fd   :  { %v3938_v32 = vmul.f32 %v3922_v42, %v3906_v45 }
 0x6fe   :  { %3955 = vst [vmem:[#allocation7 + $0x68] sm:$0xff] %v3939_v1 }
 0x6ff   :  { %3954 = vst [vmem:[#allocation7 + $0x60] sm:$0xff] %v3938_v32 }
 0x703   :  { %v3892_v21 = vpop.permute.xlu0 %3891 }
 0x704   :  { %v3909_v25 = vsel %vm8186_vm10, %v3892_v21, %v8179_v2 }
 0x705   :  { %v3941_v12 = vmul.f32 %v3925_v43, %v3909_v25 }
 0x707   :  { %3957 = vst [vmem:[#allocation7 + $0x78] sm:$0xff] %v3941_v12 }
 0x708   :  { %3970 = dma.vmem_to_hbm [thread:$0]  %s3963_s8, 2048, %s3965_s11, [#allocation8], %s4537_s12, %s4537_s12, %s4538_s13  }
 0x709   :  { %4530 = dma.done.wait [#allocation8], 2048  }
 0x70a   :  { %4531 = vsyncadd [#allocation8], 4294965248 }
 0x70b   :  { %3975 = vsyncpa [#allocation8], 1 }

</bundles_post_ra>
